<compile_context>
chip_gen: v7x
topology: tpu7x:2x2x1
jax: 0.10.0
libtpu: 0.0.40
codegen_flags: <defaults>
</compile_context>

<pallas_src>
import functools

import jax
import jax.numpy as jnp
from jax.experimental import pallas as pl
from jax.experimental.pallas import tpu as pltpu


# ------------------------------ fused kernel ------------------------------- #

def _bottleneck_kernel(x_ref, xt_ref, xb_ref,
                       w1_ref, b1_ref, w2_ref, b2_ref, w3_ref, b3_ref,
                       o_ref, y1p_ref, *, rows_valid_last):
    # x_ref:  (1, R, W, Cin)   bf16  -- row tile (also the residual identity)
    # xt_ref: (1, 1, W, Cin)   bf16  -- row above the tile (clamped at edges)
    # xb_ref: (1, 1, W, Cin)   bf16  -- row below the tile (clamped at edges)
    # w1_ref: (Cin, width)        bf16 (BN1 scale folded)   b1_ref: (1, width) f32
    # w2_ref: (9, width, width)   bf16 (BN2 scale folded)   b2_ref: (1, width) f32
    # w3_ref: (width, Cout)       bf16 (BN3 scale folded)   b3_ref: (1, Cout)  f32
    # o_ref:  (1, R, W, Cout)  bf16
    # y1p_ref: (R+2, W+2, width) bf16 VMEM scratch (stage-1 output, halo + W pad)
    _, R, W, Cin = x_ref.shape
    width = w1_ref.shape[1]
    Cout = w3_ref.shape[1]
    L = R * W

    t = pl.program_id(1)
    num_t = pl.num_programs(1)

    # ---- stage 1: 1x1 conv (BN1 folded) + shift + ReLU on the R rows ------ #
    x2d = x_ref[...].reshape(L, Cin)
    y1c = jnp.dot(x2d, w1_ref[...], preferred_element_type=jnp.float32)
    y1c = jnp.maximum(y1c + b1_ref[...], 0.0)

    zc = jnp.zeros((R, 1, width), y1p_ref.dtype)
    y1p_ref[1:R + 1, :, :] = jnp.concatenate(
        [zc, y1c.astype(y1p_ref.dtype).reshape(R, W, width), zc], axis=1)

    # Padded tail rows of the image (wrapper zero-padded H up to a multiple of
    # R) must act as conv zero-padding, not as stage-1(0) = relu(b1).
    if rows_valid_last != R:          # static: only emitted when H % R != 0
        pad = R - rows_valid_last

        @pl.when(t == num_t - 1)
        def _():
            y1p_ref[1 + rows_valid_last:R + 1, :, :] = jnp.zeros(
                (pad, W + 2, width), y1p_ref.dtype)

    # ---- stage 1 on the two halo rows (masked to zero at the image border) #
    xh = jnp.concatenate([xt_ref[0, 0], xb_ref[0, 0]], axis=0)      # (2W, Cin)
    y1h = jnp.dot(xh, w1_ref[...], preferred_element_type=jnp.float32)
    y1h = jnp.maximum(y1h + b1_ref[...], 0.0)
    top_live = (t > 0).astype(jnp.float32)
    bot_live = (t < num_t - 1).astype(jnp.float32)

    zc1 = jnp.zeros((1, 1, width), y1p_ref.dtype)

    def _store_halo(row_idx, vals, live):
        v = (vals * live).astype(y1p_ref.dtype).reshape(1, W, width)
        y1p_ref[row_idx:row_idx + 1, :, :] = jnp.concatenate([zc1, v, zc1],
                                                             axis=1)

    _store_halo(0, y1h[:W], top_live)
    _store_halo(R + 1, y1h[W:], bot_live)

    # ---- stage 2: 3x3 conv (BN2 folded) + shift + ReLU -------------------- #
    # Nine accumulating matmuls against static (R, W) windows of the W-padded
    # scratch: no shifted operand copies, no edge selects, no im2col concat.
    acc = jnp.zeros((L, width), jnp.float32)
    for ky in range(3):
        for kx in range(3):
            a = y1p_ref[ky:ky + R, kx:kx + W, :].reshape(L, width)
            acc = acc + jnp.dot(a, w2_ref[ky * 3 + kx],
                                preferred_element_type=jnp.float32)
    y2 = jnp.maximum(acc + b2_ref[...], 0.0).astype(jnp.bfloat16)

    # ---- stage 3: 1x1 conv (BN3 folded) + shift + residual + ReLU --------- #
    y3 = jnp.dot(y2, w3_ref[...], preferred_element_type=jnp.float32)
    y3 = (y3 + b3_ref[...]).reshape(R, W, Cout)
    idn = x_ref[0].astype(jnp.float32)                       # (R, W, Cin)
    o_ref[0] = jnp.maximum(y3 + idn, 0.0).astype(o_ref.dtype)


# ------------------------------ sizing helpers ------------------------------ #

def _vmem_budget_bytes():
    try:
        info = pltpu.get_tpu_info()
        cap = int(getattr(info, "vmem_capacity_bytes", 128 << 20))
    except Exception:
        cap = 64 << 20                      # conservative (v7x-sized) fallback
    return (cap * 3) // 4                   # ~96 MiB on v5e/v6e, ~48 MiB on v7x


def _est_vmem_bytes(R, W, cin, width, cout):
    L = R * W
    blocks = (2 * L * cin * 2             # double-buffered bf16 x tiles
              + 2 * 2 * W * cin * 2 * 2   # halo row blocks
              + 2 * L * cout * 2)         # double-buffered bf16 out tiles
    weights = 2 * 2 * (cin * width + 9 * width * width + width * cout)
    scratch = (R + 2) * (W + 2) * width * 2
    temps = 10 * L * max(width, cout) * 4  # in-kernel f32 temporaries headroom
    return int(blocks + weights + scratch + temps + (2 << 20))


def _pick_row_tile(H, W, cin, width, cout, budget, target_rows=1024):
    # Prefer a divisor of H (no padding); otherwise ceil-div tiling + padding.
    for R in range(H, 0, -1):
        if H % R == 0 and R * W <= target_rows and \
                _est_vmem_bytes(R, W, cin, width, cout) <= budget:
            return R
    R = max(1, min(H, max(1, target_rows // max(W, 1))))
    while R > 1 and _est_vmem_bytes(R, W, cin, width, cout) > budget:
        R -= 1
    return R


# -------------------------------- wrappers ---------------------------------- #

def _fold_bn(gamma, beta, mean, var, eps):
    scale = gamma / jnp.sqrt(var + eps)
    shift = beta - mean * scale
    return scale.astype(jnp.float32), shift.reshape(1, -1).astype(jnp.float32)


def bottleneck_forward_nhwc(x_nhwc, params, eps=1e-5, row_tile=None):
    """Fused Bottleneck. x_nhwc: (N, H, W, Cin) -> (N, H, W, Cout) bf16."""
    x = x_nhwc.astype(jnp.bfloat16)
    N, H, W, Cin = x.shape

    sc1, sh1 = _fold_bn(params["g1"], params["b1"], params["m1"], params["v1"], eps)
    sc2, sh2 = _fold_bn(params["g2"], params["b2"], params["m2"], params["v2"], eps)
    sc3, sh3 = _fold_bn(params["g3"], params["b3"], params["m3"], params["v3"], eps)

    # conv1x1 weight (width, Cin, 1, 1) -> (Cin, width), BN1 scale folded.
    w1 = (params["w1"][:, :, 0, 0].T * sc1[None, :]).astype(jnp.bfloat16)
    width = w1.shape[1]
    # conv3x3 weight (width, width, 3, 3) -> (ky, kx, in, out), BN2 folded,
    # packed as (9, width, width) so tap (ky, kx) is w2[ky*3 + kx].
    w2 = jnp.transpose(params["w2"], (2, 3, 1, 0)) * sc2[None, None, None, :]
    w2 = w2.reshape(9, width, width).astype(jnp.bfloat16)
    # conv1x1 weight (Cout, width, 1, 1) -> (width, Cout), BN3 scale folded.
    w3 = (params["w3"][:, :, 0, 0].T * sc3[None, :]).astype(jnp.bfloat16)
    Cout = w3.shape[1]
    assert Cout == Cin, "residual add requires inplanes == planes * expansion"

    budget = _vmem_budget_bytes()
    if row_tile is None:
        R = _pick_row_tile(H, W, Cin, width, Cout, budget)
    else:
        R = int(row_tile)
    R = max(1, min(R, H))
    T = -(-H // R)                       # ceil-div
    H_pad = T * R
    rows_valid_last = H - (T - 1) * R
    if H_pad != H:
        x = jnp.pad(x, ((0, 0), (0, H_pad - H), (0, 0), (0, 0)))

    est = _est_vmem_bytes(R, W, Cin, width, Cout)
    vmem_limit = int(min(budget, max(int(est * 1.25), 32 << 20)))

    kernel = functools.partial(_bottleneck_kernel,
                               rows_valid_last=rows_valid_last)

    top_map = lambda n, t: (n, jnp.maximum(t * R - 1, 0), 0, 0)
    bot_map = lambda n, t: (n, jnp.minimum((t + 1) * R, H_pad - 1), 0, 0)

    y = pl.pallas_call(
        kernel,
        out_shape=jax.ShapeDtypeStruct((N, H_pad, W, Cout), jnp.bfloat16),
        grid=(N, T),
        in_specs=[
            pl.BlockSpec((1, R, W, Cin), lambda n, t: (n, t, 0, 0)),
            pl.BlockSpec((1, 1, W, Cin), top_map),
            pl.BlockSpec((1, 1, W, Cin), bot_map),
            pl.BlockSpec((Cin, width), lambda n, t: (0, 0)),
            pl.BlockSpec((1, width), lambda n, t: (0, 0)),
            pl.BlockSpec((9, width, width), lambda n, t: (0, 0, 0)),
            pl.BlockSpec((1, width), lambda n, t: (0, 0)),
            pl.BlockSpec((width, Cout), lambda n, t: (0, 0)),
            pl.BlockSpec((1, Cout), lambda n, t: (0, 0)),
        ],
        out_specs=pl.BlockSpec((1, R, W, Cout), lambda n, t: (n, t, 0, 0)),
        scratch_shapes=[pltpu.VMEM((R + 2, W + 2, width), jnp.bfloat16)],
        compiler_params=pltpu.CompilerParams(
            dimension_semantics=("parallel", "parallel"),
            vmem_limit_bytes=vmem_limit),
    )(x, x, x, w1, sh1, w2, sh2, w3, sh3)

    if H_pad != H:
        y = y[:, :H]
    return y


def bottleneck_forward(x_nchw, params, eps=1e-5, row_tile=None):
    """PyTorch-layout adapter: (N, Cin, H, W) -> (N, Cout, H, W) bf16."""
    # TODO(synk): keep the surrounding model in NHWC so these two full-image
    # transposes (separate XLA ops, HBM round trips) disappear entirely.
    x = jnp.transpose(x_nchw, (0, 2, 3, 1))
    y = bottleneck_forward_nhwc(x, params, eps=eps, row_tile=row_tile)
    return jnp.transpose(y, (0, 3, 1, 2))


# --------------------------- pure-JAX reference ----------------------------- #

def _ref_forward(x_nchw, p, eps=1e-5):
    dn = ("NCHW", "OIHW", "NCHW")

    def bn(y, g, b, m, v):
        g, b, m, v = (t[None, :, None, None] for t in (g, b, m, v))
        return (y - m) / jnp.sqrt(v + eps) * g + b

    y = jax.lax.conv_general_dilated(x_nchw, p["w1"], (1, 1), "VALID",
                                     dimension_numbers=dn)
    y = jax.nn.relu(bn(y, p["g1"], p["b1"], p["m1"], p["v1"]))
    y = jax.lax.conv_general_dilated(y, p["w2"], (1, 1), ((1, 1), (1, 1)),
                                     dimension_numbers=dn)
    y = jax.nn.relu(bn(y, p["g2"], p["b2"], p["m2"], p["v2"]))
    y = jax.lax.conv_general_dilated(y, p["w3"], (1, 1), "VALID",
                                     dimension_numbers=dn)
    y = bn(y, p["g3"], p["b3"], p["m3"], p["v3"])
    return jax.nn.relu(y + x_nchw)


# ---------------------------------- main ------------------------------------ #

if __name__ == "__main__":
    # Bottleneck(inplanes=16, planes=4) -> width=4, out channels=16.
    inplanes, planes = 16, 4
    width, expansion = planes, 4
    cout = planes * expansion
    N, H, W = 2, 16, 16

    key = jax.random.PRNGKey(0)
    ks = jax.random.split(key, 16)
    params = {
        "w1": 0.1 * jax.random.normal(ks[0], (width, inplanes, 1, 1), jnp.float32),
        "w2": 0.1 * jax.random.normal(ks[1], (width, width, 3, 3), jnp.float32),
        "w3": 0.1 * jax.random.normal(ks[2], (cout, width, 1, 1), jnp.float32),
        "g1": jax.random.uniform(ks[3], (width,), jnp.float32, 0.5, 1.5),
        "b1": 0.1 * jax.random.normal(ks[4], (width,), jnp.float32),
        "m1": 0.1 * jax.random.normal(ks[5], (width,), jnp.float32),
        "v1": jax.random.uniform(ks[6], (width,), jnp.float32, 0.5, 1.5),
        "g2": jax.random.uniform(ks[7], (width,), jnp.float32, 0.5, 1.5),
        "b2": 0.1 * jax.random.normal(ks[8], (width,), jnp.float32),
        "m2": 0.1 * jax.random.normal(ks[9], (width,), jnp.float32),
        "v2": jax.random.uniform(ks[10], (width,), jnp.float32, 0.5, 1.5),
        "g3": jax.random.uniform(ks[11], (cout,), jnp.float32, 0.5, 1.5),
        "b3": 0.1 * jax.random.normal(ks[12], (cout,), jnp.float32),
        "m3": 0.1 * jax.random.normal(ks[13], (cout,), jnp.float32),
        "v3": jax.random.uniform(ks[14], (cout,), jnp.float32, 0.5, 1.5),
    }

    x = jax.random.normal(ks[15], (N, inplanes, H, W), jnp.float32)
    ref = jax.block_until_ready(_ref_forward(x, params))

    # row_tile=None -> auto (single tile); 4 -> multi-tile divisor path;
    # 3 -> non-divisor path (H padded to 18, tail-row masking exercised).
    for rt in (None, 4, 3):
        out = jax.block_until_ready(bottleneck_forward(x, params, row_tile=rt))
        assert out.shape == (N, cout, H, W), (rt, out.shape)
        o32 = out.astype(jnp.float32)
        err = float(jnp.max(jnp.abs(o32 - ref)))
        # bf16 activations / weights / output vs a pure-f32 reference ->
        # inference-grade tolerance.
        if not bool(jnp.allclose(o32, ref, atol=8e-2, rtol=8e-2)):
            raise AssertionError(
                f"Pallas Bottleneck mismatch vs JAX reference "
                f"(row_tile={rt}, max abs err {err})")

    print("KERNEL_OK")
</pallas_src>

<mosaic_0001>
module attributes {stable_mosaic.version = 11 : i64} {
  func.func @_bottleneck_kernel(%arg0: i32, %arg1: i32, %arg2: memref<1x16x16x16xbf16, #tpu.memory_space<vmem>>, %arg3: memref<1x1x16x16xbf16, #tpu.memory_space<vmem>>, %arg4: memref<1x1x16x16xbf16, #tpu.memory_space<vmem>>, %arg5: memref<16x4xbf16, #tpu.memory_space<vmem>>, %arg6: memref<1x4xf32, #tpu.memory_space<vmem>>, %arg7: memref<9x4x4xbf16, #tpu.memory_space<vmem>>, %arg8: memref<1x4xf32, #tpu.memory_space<vmem>>, %arg9: memref<4x16xbf16, #tpu.memory_space<vmem>>, %arg10: memref<1x16xf32, #tpu.memory_space<vmem>>, %arg11: memref<1x16x16x16xbf16, #tpu.memory_space<vmem>>, %arg12: memref<18x18x4xbf16, #tpu.memory_space<vmem>>) attributes {dimension_semantics = [#tpu.dimension_semantics<parallel>, #tpu.dimension_semantics<parallel>], iteration_bounds = array<i64: 2, 1>, scalar_prefetch = 0 : i64, scratch_operands = 1 : i64, tpu.core_type = #tpu.core_type<tc>, window_params = [{transform_indices = @transform_0, window_bounds = array<i64: 1, 16, 16, 16>}, {transform_indices = @transform_1, window_bounds = array<i64: 1, 1, 16, 16>}, {transform_indices = @transform_2, window_bounds = array<i64: 1, 1, 16, 16>}, {pipeline_mode = #tpu.pipeline_mode<synchronous>, transform_indices = @transform_3, window_bounds = array<i64: 16, 4>}, {pipeline_mode = #tpu.pipeline_mode<synchronous>, transform_indices = @transform_4, window_bounds = array<i64: 1, 4>}, {pipeline_mode = #tpu.pipeline_mode<synchronous>, transform_indices = @transform_5, window_bounds = array<i64: 9, 4, 4>}, {pipeline_mode = #tpu.pipeline_mode<synchronous>, transform_indices = @transform_6, window_bounds = array<i64: 1, 4>}, {pipeline_mode = #tpu.pipeline_mode<synchronous>, transform_indices = @transform_7, window_bounds = array<i64: 4, 16>}, {pipeline_mode = #tpu.pipeline_mode<synchronous>, transform_indices = @transform_8, window_bounds = array<i64: 1, 16>}, {transform_indices = @transform_9, window_bounds = array<i64: 1, 16, 16, 16>}]} {
    %c0 = arith.constant 0 : index
    %c0_0 = arith.constant 0 : index
    %c0_1 = arith.constant 0 : index
    %c0_2 = arith.constant 0 : index
    %0 = vector.load %arg2[%c0, %c0_0, %c0_1, %c0_2] : memref<1x16x16x16xbf16, #tpu.memory_space<vmem>>, vector<1x16x16x16xbf16>
    %1 = vector.shape_cast %0 : vector<1x16x16x16xbf16> to vector<256x16xbf16>
    %c0_3 = arith.constant 0 : index
    %c0_4 = arith.constant 0 : index
    %2 = vector.load %arg5[%c0_3, %c0_4] : memref<16x4xbf16, #tpu.memory_space<vmem>>, vector<16x4xbf16>
    %cst = arith.constant dense<0.000000e+00> : vector<256x4xf32>
    %3 = tpu.matmul %1, %2, %cst {dimension_numbers = #tpu.dot_dimension_numbers<[1], [0], [0], [1], [0, 0, 1, 1], [], []>} : vector<256x16xbf16>, vector<16x4xbf16>, vector<256x4xf32> -> vector<256x4xf32>
    %c0_5 = arith.constant 0 : index
    %c0_6 = arith.constant 0 : index
    %4 = vector.load %arg6[%c0_5, %c0_6] : memref<1x4xf32, #tpu.memory_space<vmem>>, vector<1x4xf32>
    %5 = vector.broadcast %4 : vector<1x4xf32> to vector<256x4xf32>
    %6 = arith.addf %3, %5 : vector<256x4xf32>
    %cst_7 = arith.constant 0.000000e+00 : f32
    %7 = vector.broadcast %cst_7 : f32 to vector<256x4xf32>
    %8 = arith.maximumf %6, %7 : vector<256x4xf32>
    %cst_8 = arith.constant 0.000000e+00 : bf16
    %9 = vector.broadcast %cst_8 : bf16 to vector<16x1x4xbf16>
    %10 = arith.truncf %8 : vector<256x4xf32> to vector<256x4xbf16>
    %11 = vector.shape_cast %10 : vector<256x4xbf16> to vector<16x16x4xbf16>
    %12 = tpu.concatenate %9, %11, %9 in 1 : vector<16x1x4xbf16>, vector<16x16x4xbf16>, vector<16x1x4xbf16> -> vector<16x18x4xbf16>
    %c1 = arith.constant 1 : index
    %c0_9 = arith.constant 0 : index
    %c0_10 = arith.constant 0 : index
    %13 = vector.load %arg12[%c1, %c0_9, %c0_10] : memref<18x18x4xbf16, #tpu.memory_space<vmem>>, vector<16x18x4xbf16>
    tpu.vector_store %arg12[%c1, %c0_9, %c0_10], %12 {strides = array<i32>} : memref<18x18x4xbf16, #tpu.memory_space<vmem>>, vector<16x18x4xbf16>,
    %c0_11 = arith.constant 0 : index
    %c0_12 = arith.constant 0 : index
    %c0_13 = arith.constant 0 : index
    %c0_14 = arith.constant 0 : index
    %14 = vector.load %arg3[%c0_11, %c0_12, %c0_13, %c0_14] : memref<1x1x16x16xbf16, #tpu.memory_space<vmem>>, vector<1x1x16x16xbf16>
    %15 = vector.shape_cast %14 : vector<1x1x16x16xbf16> to vector<16x16xbf16>
    %c0_15 = arith.constant 0 : index
    %c0_16 = arith.constant 0 : index
    %c0_17 = arith.constant 0 : index
    %c0_18 = arith.constant 0 : index
    %16 = vector.load %arg4[%c0_15, %c0_16, %c0_17, %c0_18] : memref<1x1x16x16xbf16, #tpu.memory_space<vmem>>, vector<1x1x16x16xbf16>
    %17 = vector.shape_cast %16 : vector<1x1x16x16xbf16> to vector<16x16xbf16>
    %18 = tpu.concatenate %15, %17 in 0 : vector<16x16xbf16>, vector<16x16xbf16> -> vector<32x16xbf16>
    %c0_19 = arith.constant 0 : index
    %c0_20 = arith.constant 0 : index
    %19 = vector.load %arg5[%c0_19, %c0_20] : memref<16x4xbf16, #tpu.memory_space<vmem>>, vector<16x4xbf16>
    %cst_21 = arith.constant dense<0.000000e+00> : vector<32x4xf32>
    %20 = tpu.matmul %18, %19, %cst_21 {dimension_numbers = #tpu.dot_dimension_numbers<[1], [0], [0], [1], [0, 0, 1, 1], [], []>} : vector<32x16xbf16>, vector<16x4xbf16>, vector<32x4xf32> -> vector<32x4xf32>
    %c0_22 = arith.constant 0 : index
    %c0_23 = arith.constant 0 : index
    %21 = vector.load %arg6[%c0_22, %c0_23] : memref<1x4xf32, #tpu.memory_space<vmem>>, vector<1x4xf32>
    %22 = vector.broadcast %21 : vector<1x4xf32> to vector<32x4xf32>
    %23 = arith.addf %20, %22 : vector<32x4xf32>
    %cst_24 = arith.constant 0.000000e+00 : f32
    %24 = vector.broadcast %cst_24 : f32 to vector<32x4xf32>
    %25 = arith.maximumf %23, %24 : vector<32x4xf32>
    %c0_i32 = arith.constant 0 : i32
    %26 = arith.cmpi sgt, %arg1, %c0_i32 : i32
    %27 = arith.extui %26 : i1 to i32
    %28 = arith.sitofp %27 : i32 to f32
    %c0_i32_25 = arith.constant 0 : i32
    %29 = arith.cmpi slt, %arg1, %c0_i32_25 : i32
    %30 = arith.extui %29 : i1 to i32
    %31 = arith.sitofp %30 : i32 to f32
    %cst_26 = arith.constant 0.000000e+00 : bf16
    %32 = vector.broadcast %cst_26 : bf16 to vector<1x1x4xbf16>
    %33 = vector.extract_strided_slice %25 {offsets = [0, 0], sizes = [16, 4], strides = [1, 1]} : vector<32x4xf32> to vector<16x4xf32>
    %34 = vector.broadcast %28 : f32 to vector<16x4xf32>
    %35 = arith.mulf %33, %34 : vector<16x4xf32>
    %36 = arith.truncf %35 : vector<16x4xf32> to vector<16x4xbf16>
    %37 = vector.shape_cast %36 : vector<16x4xbf16> to vector<1x16x4xbf16>
    %38 = tpu.concatenate %32, %37, %32 in 1 : vector<1x1x4xbf16>, vector<1x16x4xbf16>, vector<1x1x4xbf16> -> vector<1x18x4xbf16>
    %c0_27 = arith.constant 0 : index
    %c0_28 = arith.constant 0 : index
    %c0_29 = arith.constant 0 : index
    %39 = vector.load %arg12[%c0_27, %c0_28, %c0_29] : memref<18x18x4xbf16, #tpu.memory_space<vmem>>, vector<1x18x4xbf16>
    tpu.vector_store %arg12[%c0_27, %c0_28, %c0_29], %38 {strides = array<i32>} : memref<18x18x4xbf16, #tpu.memory_space<vmem>>, vector<1x18x4xbf16>,
    %40 = vector.extract_strided_slice %25 {offsets = [16, 0], sizes = [16, 4], strides = [1, 1]} : vector<32x4xf32> to vector<16x4xf32>
    %41 = vector.broadcast %31 : f32 to vector<16x4xf32>
    %42 = arith.mulf %40, %41 : vector<16x4xf32>
    %43 = arith.truncf %42 : vector<16x4xf32> to vector<16x4xbf16>
    %44 = vector.shape_cast %43 : vector<16x4xbf16> to vector<1x16x4xbf16>
    %45 = tpu.concatenate %32, %44, %32 in 1 : vector<1x1x4xbf16>, vector<1x16x4xbf16>, vector<1x1x4xbf16> -> vector<1x18x4xbf16>
    %c17 = arith.constant 17 : index
    %c0_30 = arith.constant 0 : index
    %c0_31 = arith.constant 0 : index
    %46 = vector.load %arg12[%c17, %c0_30, %c0_31] : memref<18x18x4xbf16, #tpu.memory_space<vmem>>, vector<1x18x4xbf16>
    tpu.vector_store %arg12[%c17, %c0_30, %c0_31], %45 {strides = array<i32>} : memref<18x18x4xbf16, #tpu.memory_space<vmem>>, vector<1x18x4xbf16>,
    %cst_32 = arith.constant 0.000000e+00 : f32
    %47 = vector.broadcast %cst_32 : f32 to vector<256x4xf32>
    %c0_33 = arith.constant 0 : index
    %c0_34 = arith.constant 0 : index
    %c0_35 = arith.constant 0 : index
    %48 = vector.load %arg12[%c0_33, %c0_34, %c0_35] : memref<18x18x4xbf16, #tpu.memory_space<vmem>>, vector<16x16x4xbf16>
    %49 = vector.shape_cast %48 : vector<16x16x4xbf16> to vector<256x4xbf16>
    %c0_36 = arith.constant 0 : index
    %c0_37 = arith.constant 0 : index
    %c0_38 = arith.constant 0 : index
    %50 = vector.load %arg7[%c0_36, %c0_37, %c0_38] : memref<9x4x4xbf16, #tpu.memory_space<vmem>>, vector<1x4x4xbf16>
    %51 = vector.shape_cast %50 : vector<1x4x4xbf16> to vector<4x4xbf16>
    %cst_39 = arith.constant dense<0.000000e+00> : vector<256x4xf32>
    %52 = tpu.matmul %49, %51, %cst_39 {dimension_numbers = #tpu.dot_dimension_numbers<[1], [0], [0], [1], [0, 0, 1, 1], [], []>} : vector<256x4xbf16>, vector<4x4xbf16>, vector<256x4xf32> -> vector<256x4xf32>
    %53 = arith.addf %47, %52 : vector<256x4xf32>
    %c0_40 = arith.constant 0 : index
    %c1_41 = arith.constant 1 : index
    %c0_42 = arith.constant 0 : index
    %54 = vector.load %arg12[%c0_40, %c1_41, %c0_42] : memref<18x18x4xbf16, #tpu.memory_space<vmem>>, vector<16x16x4xbf16>
    %55 = vector.shape_cast %54 : vector<16x16x4xbf16> to vector<256x4xbf16>
    %c1_43 = arith.constant 1 : index
    %c0_44 = arith.constant 0 : index
    %c0_45 = arith.constant 0 : index
    %56 = vector.load %arg7[%c1_43, %c0_44, %c0_45] : memref<9x4x4xbf16, #tpu.memory_space<vmem>>, vector<1x4x4xbf16>
    %57 = vector.shape_cast %56 : vector<1x4x4xbf16> to vector<4x4xbf16>
    %cst_46 = arith.constant dense<0.000000e+00> : vector<256x4xf32>
    %58 = tpu.matmul %55, %57, %cst_46 {dimension_numbers = #tpu.dot_dimension_numbers<[1], [0], [0], [1], [0, 0, 1, 1], [], []>} : vector<256x4xbf16>, vector<4x4xbf16>, vector<256x4xf32> -> vector<256x4xf32>
    %59 = arith.addf %53, %58 : vector<256x4xf32>
    %c0_47 = arith.constant 0 : index
    %c2 = arith.constant 2 : index
    %c0_48 = arith.constant 0 : index
    %60 = vector.load %arg12[%c0_47, %c2, %c0_48] : memref<18x18x4xbf16, #tpu.memory_space<vmem>>, vector<16x16x4xbf16>
    %61 = vector.shape_cast %60 : vector<16x16x4xbf16> to vector<256x4xbf16>
    %c2_49 = arith.constant 2 : index
    %c0_50 = arith.constant 0 : index
    %c0_51 = arith.constant 0 : index
    %62 = vector.load %arg7[%c2_49, %c0_50, %c0_51] : memref<9x4x4xbf16, #tpu.memory_space<vmem>>, vector<1x4x4xbf16>
    %63 = vector.shape_cast %62 : vector<1x4x4xbf16> to vector<4x4xbf16>
    %cst_52 = arith.constant dense<0.000000e+00> : vector<256x4xf32>
    %64 = tpu.matmul %61, %63, %cst_52 {dimension_numbers = #tpu.dot_dimension_numbers<[1], [0], [0], [1], [0, 0, 1, 1], [], []>} : vector<256x4xbf16>, vector<4x4xbf16>, vector<256x4xf32> -> vector<256x4xf32>
    %65 = arith.addf %59, %64 : vector<256x4xf32>
    %c1_53 = arith.constant 1 : index
    %c0_54 = arith.constant 0 : index
    %c0_55 = arith.constant 0 : index
    %66 = vector.load %arg12[%c1_53, %c0_54, %c0_55] : memref<18x18x4xbf16, #tpu.memory_space<vmem>>, vector<16x16x4xbf16>
    %67 = vector.shape_cast %66 : vector<16x16x4xbf16> to vector<256x4xbf16>
    %c3 = arith.constant 3 : index
    %c0_56 = arith.constant 0 : index
    %c0_57 = arith.constant 0 : index
    %68 = vector.load %arg7[%c3, %c0_56, %c0_57] : memref<9x4x4xbf16, #tpu.memory_space<vmem>>, vector<1x4x4xbf16>
    %69 = vector.shape_cast %68 : vector<1x4x4xbf16> to vector<4x4xbf16>
    %cst_58 = arith.constant dense<0.000000e+00> : vector<256x4xf32>
    %70 = tpu.matmul %67, %69, %cst_58 {dimension_numbers = #tpu.dot_dimension_numbers<[1], [0], [0], [1], [0, 0, 1, 1], [], []>} : vector<256x4xbf16>, vector<4x4xbf16>, vector<256x4xf32> -> vector<256x4xf32>
    %71 = arith.addf %65, %70 : vector<256x4xf32>
    %c1_59 = arith.constant 1 : index
    %c1_60 = arith.constant 1 : index
    %c0_61 = arith.constant 0 : index
    %72 = vector.load %arg12[%c1_59, %c1_60, %c0_61] : memref<18x18x4xbf16, #tpu.memory_space<vmem>>, vector<16x16x4xbf16>
    %73 = vector.shape_cast %72 : vector<16x16x4xbf16> to vector<256x4xbf16>
    %c4 = arith.constant 4 : index
    %c0_62 = arith.constant 0 : index
    %c0_63 = arith.constant 0 : index
    %74 = vector.load %arg7[%c4, %c0_62, %c0_63] : memref<9x4x4xbf16, #tpu.memory_space<vmem>>, vector<1x4x4xbf16>
    %75 = vector.shape_cast %74 : vector<1x4x4xbf16> to vector<4x4xbf16>
    %cst_64 = arith.constant dense<0.000000e+00> : vector<256x4xf32>
    %76 = tpu.matmul %73, %75, %cst_64 {dimension_numbers = #tpu.dot_dimension_numbers<[1], [0], [0], [1], [0, 0, 1, 1], [], []>} : vector<256x4xbf16>, vector<4x4xbf16>, vector<256x4xf32> -> vector<256x4xf32>
    %77 = arith.addf %71, %76 : vector<256x4xf32>
    %c1_65 = arith.constant 1 : index
    %c2_66 = arith.constant 2 : index
    %c0_67 = arith.constant 0 : index
    %78 = vector.load %arg12[%c1_65, %c2_66, %c0_67] : memref<18x18x4xbf16, #tpu.memory_space<vmem>>, vector<16x16x4xbf16>
    %79 = vector.shape_cast %78 : vector<16x16x4xbf16> to vector<256x4xbf16>
    %c5 = arith.constant 5 : index
    %c0_68 = arith.constant 0 : index
    %c0_69 = arith.constant 0 : index
    %80 = vector.load %arg7[%c5, %c0_68, %c0_69] : memref<9x4x4xbf16, #tpu.memory_space<vmem>>, vector<1x4x4xbf16>
    %81 = vector.shape_cast %80 : vector<1x4x4xbf16> to vector<4x4xbf16>
    %cst_70 = arith.constant dense<0.000000e+00> : vector<256x4xf32>
    %82 = tpu.matmul %79, %81, %cst_70 {dimension_numbers = #tpu.dot_dimension_numbers<[1], [0], [0], [1], [0, 0, 1, 1], [], []>} : vector<256x4xbf16>, vector<4x4xbf16>, vector<256x4xf32> -> vector<256x4xf32>
    %83 = arith.addf %77, %82 : vector<256x4xf32>
    %c2_71 = arith.constant 2 : index
    %c0_72 = arith.constant 0 : index
    %c0_73 = arith.constant 0 : index
    %84 = vector.load %arg12[%c2_71, %c0_72, %c0_73] : memref<18x18x4xbf16, #tpu.memory_space<vmem>>, vector<16x16x4xbf16>
    %85 = vector.shape_cast %84 : vector<16x16x4xbf16> to vector<256x4xbf16>
    %c6 = arith.constant 6 : index
    %c0_74 = arith.constant 0 : index
    %c0_75 = arith.constant 0 : index
    %86 = vector.load %arg7[%c6, %c0_74, %c0_75] : memref<9x4x4xbf16, #tpu.memory_space<vmem>>, vector<1x4x4xbf16>
    %87 = vector.shape_cast %86 : vector<1x4x4xbf16> to vector<4x4xbf16>
    %cst_76 = arith.constant dense<0.000000e+00> : vector<256x4xf32>
    %88 = tpu.matmul %85, %87, %cst_76 {dimension_numbers = #tpu.dot_dimension_numbers<[1], [0], [0], [1], [0, 0, 1, 1], [], []>} : vector<256x4xbf16>, vector<4x4xbf16>, vector<256x4xf32> -> vector<256x4xf32>
    %89 = arith.addf %83, %88 : vector<256x4xf32>
    %c2_77 = arith.constant 2 : index
    %c1_78 = arith.constant 1 : index
    %c0_79 = arith.constant 0 : index
    %90 = vector.load %arg12[%c2_77, %c1_78, %c0_79] : memref<18x18x4xbf16, #tpu.memory_space<vmem>>, vector<16x16x4xbf16>
    %91 = vector.shape_cast %90 : vector<16x16x4xbf16> to vector<256x4xbf16>
    %c7 = arith.constant 7 : index
    %c0_80 = arith.constant 0 : index
    %c0_81 = arith.constant 0 : index
    %92 = vector.load %arg7[%c7, %c0_80, %c0_81] : memref<9x4x4xbf16, #tpu.memory_space<vmem>>, vector<1x4x4xbf16>
    %93 = vector.shape_cast %92 : vector<1x4x4xbf16> to vector<4x4xbf16>
    %cst_82 = arith.constant dense<0.000000e+00> : vector<256x4xf32>
    %94 = tpu.matmul %91, %93, %cst_82 {dimension_numbers = #tpu.dot_dimension_numbers<[1], [0], [0], [1], [0, 0, 1, 1], [], []>} : vector<256x4xbf16>, vector<4x4xbf16>, vector<256x4xf32> -> vector<256x4xf32>
    %95 = arith.addf %89, %94 : vector<256x4xf32>
    %c2_83 = arith.constant 2 : index
    %c2_84 = arith.constant 2 : index
    %c0_85 = arith.constant 0 : index
    %96 = vector.load %arg12[%c2_83, %c2_84, %c0_85] : memref<18x18x4xbf16, #tpu.memory_space<vmem>>, vector<16x16x4xbf16>
    %97 = vector.shape_cast %96 : vector<16x16x4xbf16> to vector<256x4xbf16>
    %c8 = arith.constant 8 : index
    %c0_86 = arith.constant 0 : index
    %c0_87 = arith.constant 0 : index
    %98 = vector.load %arg7[%c8, %c0_86, %c0_87] : memref<9x4x4xbf16, #tpu.memory_space<vmem>>, vector<1x4x4xbf16>
    %99 = vector.shape_cast %98 : vector<1x4x4xbf16> to vector<4x4xbf16>
    %cst_88 = arith.constant dense<0.000000e+00> : vector<256x4xf32>
    %100 = tpu.matmul %97, %99, %cst_88 {dimension_numbers = #tpu.dot_dimension_numbers<[1], [0], [0], [1], [0, 0, 1, 1], [], []>} : vector<256x4xbf16>, vector<4x4xbf16>, vector<256x4xf32> -> vector<256x4xf32>
    %101 = arith.addf %95, %100 : vector<256x4xf32>
    %c0_89 = arith.constant 0 : index
    %c0_90 = arith.constant 0 : index
    %102 = vector.load %arg8[%c0_89, %c0_90] : memref<1x4xf32, #tpu.memory_space<vmem>>, vector<1x4xf32>
    %103 = vector.broadcast %102 : vector<1x4xf32> to vector<256x4xf32>
    %104 = arith.addf %101, %103 : vector<256x4xf32>
    %cst_91 = arith.constant 0.000000e+00 : f32
    %105 = vector.broadcast %cst_91 : f32 to vector<256x4xf32>
    %106 = arith.maximumf %104, %105 : vector<256x4xf32>
    %107 = arith.truncf %106 : vector<256x4xf32> to vector<256x4xbf16>
    %c0_92 = arith.constant 0 : index
    %c0_93 = arith.constant 0 : index
    %108 = vector.load %arg9[%c0_92, %c0_93] : memref<4x16xbf16, #tpu.memory_space<vmem>>, vector<4x16xbf16>
    %cst_94 = arith.constant dense<0.000000e+00> : vector<256x16xf32>
    %109 = tpu.matmul %107, %108, %cst_94 {dimension_numbers = #tpu.dot_dimension_numbers<[1], [0], [0], [1], [0, 0, 1, 1], [], []>} : vector<256x4xbf16>, vector<4x16xbf16>, vector<256x16xf32> -> vector<256x16xf32>
    %c0_95 = arith.constant 0 : index
    %c0_96 = arith.constant 0 : index
    %110 = vector.load %arg10[%c0_95, %c0_96] : memref<1x16xf32, #tpu.memory_space<vmem>>, vector<1x16xf32>
    %111 = vector.broadcast %110 : vector<1x16xf32> to vector<256x16xf32>
    %112 = arith.addf %109, %111 : vector<256x16xf32>
    %113 = vector.shape_cast %112 : vector<256x16xf32> to vector<16x16x16xf32>
    %c0_97 = arith.constant 0 : index
    %c0_98 = arith.constant 0 : index
    %c0_99 = arith.constant 0 : index
    %c0_100 = arith.constant 0 : index
    %114 = vector.load %arg2[%c0_97, %c0_98, %c0_99, %c0_100] : memref<1x16x16x16xbf16, #tpu.memory_space<vmem>>, vector<1x16x16x16xbf16>
    %115 = vector.shape_cast %114 : vector<1x16x16x16xbf16> to vector<16x16x16xbf16>
    %116 = arith.extf %115 : vector<16x16x16xbf16> to vector<16x16x16xf32>
    %117 = arith.addf %113, %116 : vector<16x16x16xf32>
    %cst_101 = arith.constant 0.000000e+00 : f32
    %118 = vector.broadcast %cst_101 : f32 to vector<16x16x16xf32>
    %119 = arith.maximumf %117, %118 : vector<16x16x16xf32>
    %120 = arith.truncf %119 : vector<16x16x16xf32> to vector<16x16x16xbf16>
    %c0_102 = arith.constant 0 : index
    %c0_103 = arith.constant 0 : index
    %c0_104 = arith.constant 0 : index
    %c0_105 = arith.constant 0 : index
    %121 = vector.load %arg11[%c0_102, %c0_103, %c0_104, %c0_105] : memref<1x16x16x16xbf16, #tpu.memory_space<vmem>>, vector<1x16x16x16xbf16>
    %122 = vector.shape_cast %121 : vector<1x16x16x16xbf16> to vector<16x16x16xbf16>
    %123 = vector.shape_cast %120 : vector<16x16x16xbf16> to vector<1x16x16x16xbf16>
    tpu.vector_store %arg11[%c0_102, %c0_103, %c0_104, %c0_105], %123 {strides = array<i32>} : memref<1x16x16x16xbf16, #tpu.memory_space<vmem>>, vector<1x16x16x16xbf16>,
    return
  }
  func.func @transform_0(%arg0: i32, %arg1: i32) -> (i32, i32, i32, i32) {
    %c0_i32 = arith.constant 0 : i32
    %c0_i32_0 = arith.constant 0 : i32
    %c0_i32_1 = arith.constant 0 : i32
    return %arg0, %arg1, %c0_i32, %c0_i32_0 : i32, i32, i32, i32
  }
  func.func @transform_1(%arg0: i32, %arg1: i32) -> (i32, i32, i32, i32) {
    %c16_i32 = arith.constant 16 : i32
    %0 = arith.muli %arg1, %c16_i32 : i32
    %c1_i32 = arith.constant 1 : i32
    %1 = arith.subi %0, %c1_i32 : i32
    %c0_i32 = arith.constant 0 : i32
    %2 = arith.maxsi %1, %c0_i32 : i32
    %c0_i32_0 = arith.constant 0 : i32
    %c0_i32_1 = arith.constant 0 : i32
    %c0_i32_2 = arith.constant 0 : i32
    return %arg0, %2, %c0_i32_0, %c0_i32_1 : i32, i32, i32, i32
  }
  func.func @transform_2(%arg0: i32, %arg1: i32) -> (i32, i32, i32, i32) {
    %c1_i32 = arith.constant 1 : i32
    %0 = arith.addi %arg1, %c1_i32 : i32
    %c16_i32 = arith.constant 16 : i32
    %1 = arith.muli %0, %c16_i32 : i32
    %c15_i32 = arith.constant 15 : i32
    %2 = arith.minsi %1, %c15_i32 : i32
    %c0_i32 = arith.constant 0 : i32
    %c0_i32_0 = arith.constant 0 : i32
    %c0_i32_1 = arith.constant 0 : i32
    return %arg0, %2, %c0_i32, %c0_i32_0 : i32, i32, i32, i32
  }
  func.func @transform_3(%arg0: i32, %arg1: i32) -> (i32, i32) {
    %c0_i32 = arith.constant 0 : i32
    %c0_i32_0 = arith.constant 0 : i32
    %c0_i32_1 = arith.constant 0 : i32
    return %c0_i32, %c0_i32_0 : i32, i32
  }
  func.func @transform_4(%arg0: i32, %arg1: i32) -> (i32, i32) {
    %c0_i32 = arith.constant 0 : i32
    %c0_i32_0 = arith.constant 0 : i32
    %c0_i32_1 = arith.constant 0 : i32
    return %c0_i32, %c0_i32_0 : i32, i32
  }
  func.func @transform_5(%arg0: i32, %arg1: i32) -> (i32, i32, i32) {
    %c0_i32 = arith.constant 0 : i32
    %c0_i32_0 = arith.constant 0 : i32
    %c0_i32_1 = arith.constant 0 : i32
    %c0_i32_2 = arith.constant 0 : i32
    return %c0_i32, %c0_i32_0, %c0_i32_1 : i32, i32, i32
  }
  func.func @transform_6(%arg0: i32, %arg1: i32) -> (i32, i32) {
    %c0_i32 = arith.constant 0 : i32
    %c0_i32_0 = arith.constant 0 : i32
    %c0_i32_1 = arith.constant 0 : i32
    return %c0_i32, %c0_i32_0 : i32, i32
  }
  func.func @transform_7(%arg0: i32, %arg1: i32) -> (i32, i32) {
    %c0_i32 = arith.constant 0 : i32
    %c0_i32_0 = arith.constant 0 : i32
    %c0_i32_1 = arith.constant 0 : i32
    return %c0_i32, %c0_i32_0 : i32, i32
  }
  func.func @transform_8(%arg0: i32, %arg1: i32) -> (i32, i32) {
    %c0_i32 = arith.constant 0 : i32
    %c0_i32_0 = arith.constant 0 : i32
    %c0_i32_1 = arith.constant 0 : i32
    return %c0_i32, %c0_i32_0 : i32, i32
  }
  func.func @transform_9(%arg0: i32, %arg1: i32) -> (i32, i32, i32, i32) {
    %c0_i32 = arith.constant 0 : i32
    %c0_i32_0 = arith.constant 0 : i32
    %c0_i32_1 = arith.constant 0 : i32
    return %arg0, %arg1, %c0_i32, %c0_i32_0 : i32, i32, i32, i32
  }
}

</mosaic_0001>

<bundles_post_ra>
// kernel: tpu_custom_call.1
= control target key start
LH: loop header
LB: loop body
LE: loop exit
PB: predicated region body
PF: predicated region fallthrough
CT: control target
= control target key end

     0   :  { %s10730_s0 = inlined_call_operand.hbm [shape: bf16[2,16,16,16], index: 0, kind: input, shape index: {}]   ;;  %s10731_s1 = inlined_call_operand.hbm [shape: bf16[2,16,16,16], index: 1, kind: input, shape index: {}]   ;;  %s10732_s2 = inlined_call_operand.hbm [shape: bf16[2,16,16,16], index: 2, kind: input, shape index: {}]   ;;  %s10733_s3 = inlined_call_operand.vmem [shape: bf16[16,4], index: 3, kind: input, shape index: {}]   ;;  %s10734_s4 = inlined_call_operand.vmem [shape: f32[1,4], index: 4, kind: input, shape index: {}]   ;;  %s10735_s5 = inlined_call_operand.vmem [shape: bf16[9,4,4], index: 5, kind: input, shape index: {}]   ;;  %s10736_s6 = inlined_call_operand.vmem [shape: f32[1,4], index: 6, kind: input, shape index: {}]   ;;  %s10737_s7 = inlined_call_operand.vmem [shape: bf16[4,16], index: 7, kind: input, shape index: {}]   ;;  %s10738_s8 = inlined_call_operand.vmem [shape: f32[1,16], index: 8, kind: input, shape index: {}]   ;;  %s10739_s9 = inlined_call_operand.hbm [shape: bf16[2,16,16,16], index: 9, kind: output, shape index: {}]  }
   0x1   :  { %10784 = sst [smem:[#allocation39_spill]] %s10731_s1 }
   0x2   :  { %10785 = sst [smem:[#allocation40_spill]] %s10739_s9 }
   0x3   :  { %14 = vsyncpa [#allocation4], 0 }
   0x4   :  { %16 = vsyncpa [#allocation4 + $0x1], 0 }
   0x5   :  { %17 = vsyncpa [#allocation7], 0 }
   0x6   :  { %19 = vsyncpa [#allocation7 + $0x1], 0 }
   0x7   :  { %20 = vsyncpa [#allocation5], 0 }
   0x8   :  { %22 = vsyncpa [#allocation5 + $0x1], 0  ;;  %s8624_s30 = smov 0   ;;  %s8626_s10 = smov 0  }
   0x9   :  { %s8628_s11 = smov 0   ;;  %s8630_s12 = smov 0  }
   0xa   :  { %s8632_s13 = smov 0   ;;  %s8634_s14 = smov 0  }
   0xb LB: > { %10786 = sst [smem:[#allocation13_spill]] %s8544_s30  ;;  %s8655_s15 = sadd.s32 4294967295, %s8564_s14   ;;  %s8564_s14 = sphi %s8634_s14, %s28_s14   ;;  %s8560_s13 = sphi %s8632_s13, %s10902_s13   ;;  %s8556_s12 = sphi %s8630_s12, %s10901_s12   ;;  %s8552_s11 = sphi %s8628_s11, %s10900_s11   ;;  %s8548_s10 = sphi %s8626_s10, %s10904_s10   ;;  %s8544_s30 = sphi %s8624_s30, %s10903_s30  }
   0xc   : > { %10787 = sst [smem:[#allocation14_spill]] %s8552_s11  ;;  %s6742_s16 = sadd.s32 4294967294, %s8564_s14  }
   0xd   : > { %10788 = sst [smem:[#allocation15_spill]] %s8556_s12  ;;  %s40_s17 = sadd.s32 1, %s8560_s13 }
   0xe   : > { %10789 = sst [smem:[#allocation16_spill]] %s8560_s13  ;;  %s49_s18 = sadd.s32 1, %s8552_s11 }
   0xf   : > { %10790 = sst [smem:[#allocation17_spill]] %s8564_s14  ;;  %p42_p0 = scmp.ge.s32.totalorder %s40_s17, 2 }
  0x10   : > { %p56_p1 = scmp.ne.s32.totalorder %s8552_s11, %s8548_s10  ;;  %p57_p2 = scmp.eq.s32.totalorder %s8564_s14, 0 }
  0x11   : > { %p62_p3 = scmp.ne.s32.totalorder %s8548_s10, %s8544_s30  ;;  %s10906_s17 = smov (%p42_p0, %s40_s17), 0 }
  0x12   : > { %10791 = sst [smem:[#allocation18_spill]] %s10906_s17  ;;  %p8667_p4 = por %p57_p2, %p56_p1 }
  0x13   : > { %p63_p5 = scmp.eq.s32.totalorder %s8655_s15, 0  ;;  %s44_s20 = ssub.s32 %s8560_s13, %s10906_s17 }
  0x14   : > { %p286_p6 = scmp.eq.s32.totalorder %s8655_s15, 1  ;;  %p47_p7 = scmp.eq.s32.totalorder %s44_s20, 0 }
  0x15   : > { %p8675_p8 = por %p63_p5, %p62_p3  ;;  %p292_p10 = scmp.eq.s32.totalorder %s6742_s16, 1 }
  0x16   : > { %p8679_p9 = por %p286_p6, %p56_p1  ;;  %p8230_p13 = scmp.lt.s32.totalorder %s8564_s14, 2 }
  0x17   : > { %s10793_s21 = scalar_select %p8675_p8, 1, 0 }
  0x18   : > { %s10794_s22 = scalar_select %p8679_p9, 1, 0 }
  0x19   : > { %s8684_s23 = scalar_select %p47_p7, %s8552_s11, %s49_s18  }
  0x1a   : > { %10795 = sst [smem:[#allocation19_spill]] %s10794_s22  ;;  %p8686_p11 = por %p292_p10, %p62_p3 }
  0x1b   : > { %10796 = sst [smem:[#allocation20_spill]] %s8684_s23  ;;  %s8693_s25 = sand.u32 1, %s8552_s11  }
  0x1c   : > { %s10797_s24 = scalar_select %p8686_p11, 1, 0 }
  0x1d   : > { %s8696_s26 = sshll.u32 %s8560_s13, 11  ;;  %p8700_p0 = pnand %p8230_p13, %p8667_p4 }
  0x1e   : > { %10798 = sst [smem:[#allocation21_spill]] %s10797_s24  ;;  %s354_s28 = sand.u32 1, %s8564_s14  }
  0x1f   : > { %s6748_s29 = sshll.u32 %s8693_s25, 3  ;;  %s10800_s1 = sld [smem:[#allocation39_spill]] }
  0x20   : > { %s358_s17 = scalar_lea.vmem [#allocation6], %s6748_s29  ;;  %s8714_s19 = scalar_lea.vmem [#allocation8], %s6748_s29 }
  0x21   : > { %s371_s13 = sshll.u32 %s358_s17, 4  ;;  %s398_s23 = sshll.u32 %s8714_s19, 4  ;;  %s8712_s13 = int_to_ptr.vmem [resolvable:$true] %s371_s13  ;;  %s8752_s23 = int_to_ptr.vmem [resolvable:$true] %s398_s23 }
  0x22   : > { %s8717_s11 = scalar_lea.sflag [#allocation7], %s354_s28  ;;  %p8723_p2 = pneg %p8700_p0 }
  0x25   : > { %s8710_s20 = scalar_lea.hbm %s10800_s1, %s8696_s26  ;;  %s8393_s29 = scalar_lea.hbm %s10800_s1, 4096 }
  0x26   : > { %s8388_s24 = scalar_lea.hbm %s8710_s20, 128  ;;  %p8394_p5 = scmp.lt.u32.totalorder %s8710_s20, %s10800_s1 }
  0x27   : > { %p8389_p1 = scmp.ne.s32.totalorder %s8710_s20, %s8388_s24  ;;  %p8395_p6 = scmp.lt.u32.totalorder %s8393_s29, %s8388_s24 }
  0x28   : > { %p8397_p10 = scmp.lt.u32.totalorder %s8388_s24, %s8710_s20 }
  0x29   : > { %p8391_p3 = pnand %p8723_p2, %p8389_p1  ;;  %p8396_p7 = por %p8395_p6, %p8394_p5 }
  0x2b   : > { %p8392_p4 = pneg %p8391_p3  ;;  %p8398_p13 = por %p8397_p10, %p8396_p7 }
  0x2d   : > { %p8399_p12 = pnand %p8398_p13, %p8392_p4 }
  0x2f   : > { %8402 = shalt.err (!%p8399_p12)
}
  0x30   : > { %s8403_s28 = scalar_lea.vmem %s8712_s13, 128  ;;  %s8566_s17 = smov [#allocation6]  }
  0x31   : > { %p8404_p1 = scmp.ne.s32.totalorder %s8712_s13, %s8403_s28  ;;  %s8408_s18 = sshll.u32 %s8566_s17, 4  ;;  %s8409_s18 = int_to_ptr.vmem [resolvable:$false] %s8408_s18 }
  0x32   : > { %s8410_s9 = scalar_lea.vmem %s8409_s18, 256  ;;  %p8411_p9 = scmp.lt.s32.totalorder %s8712_s13, %s8409_s18 }
  0x33   : > { %p8406_p3 = pnand %p8404_p1, %p8723_p2  ;;  %p8412_p8 = scmp.lt.s32.totalorder %s8410_s9, %s8403_s28 }
  0x35   : > { %p8407_p11 = pneg %p8406_p3  ;;  %p8413_p5 = por %p8412_p8, %p8411_p9 }
  0x37   : > { %p8414_p6 = pnand %p8413_p5, %p8407_p11 }
  0x39   : > { %8417 = shalt.err (!%p8414_p6)
}
  0x3a   : > { %s10748_s30 = smov 64   ;;  %s10750_s24 = smov 4  }
  0x3b   : > { %8222 = dma.hbm_to_vmem [thread:$0]  (!%p8700_p0), %s8710_s20, 128, %s8712_s13, %s8717_s11, %s10748_s30, %s10748_s30, %s10750_s24  }
  0x3c   : > { %p6754_p8 = scmp.ge.s32.totalorder %s8564_s14, 1  ;;  %p406_p9 = scmp.lt.s32.totalorder %s8564_s14, 3 }
  0x3d   : > { %s6745_s28 = sshll.u32 %s8693_s25, 7  ;;  %s8765_s9 = scalar_lea.hbm %s10730_s0, %s8696_s26 }
  0x3e   : > { %p8756_p11 = pnand %p6754_p8, %p406_p9  ;;  %s334_s13 = scalar_lea.vmem [#allocation3], %s6745_s28 }
  0x3f   : > { %s344_s20 = sshll.u32 %s334_s13, 4  ;;  %s7255_s19 = sadd.s32 1920, %s8696_s26  ;;  %s8768_s20 = int_to_ptr.vmem [resolvable:$true] %s344_s20 }
  0x40   : > { %s10802_s29 = scalar_select %p8756_p11, 1, 0 }
  0x41   : > { %s8773_s1 = scalar_lea.hbm %s10732_s2, %s7255_s19  ;;  %s331_s14 = scalar_lea.sflag [#allocation4], %s8693_s25 }
  0x42   : > { %s8418_s22 = scalar_lea.hbm %s8765_s9, 2048  ;;  %s8423_s12 = scalar_lea.hbm %s10730_s0, 4096 }
  0x43   : > { %p8419_p12 = scmp.ne.s32.totalorder %s8765_s9, %s8418_s22  ;;  %p8424_p10 = scmp.lt.u32.totalorder %s8765_s9, %s10730_s0 }
  0x44   : > { %p8425_p13 = scmp.lt.u32.totalorder %s8423_s12, %s8418_s22  ;;  %p8427_p3 = scmp.lt.u32.totalorder %s8418_s22, %s8765_s9 }
  0x45   : > { %p8421_p4 = pnand %p8419_p12, %p8723_p2 }
  0x46   : > { %p8426_p1 = por %p8425_p13, %p8424_p10 }
  0x47   : > { %p8422_p7 = pneg %p8421_p4 }
  0x48   : > { %p8428_p5 = por %p8427_p3, %p8426_p1 }
  0x4a   : > { %p8429_p6 = pnand %p8428_p5, %p8422_p7 }
  0x4c   : > { %8432 = shalt.err (!%p8429_p6)
}
  0x4d   : > { %s8433_s26 = scalar_lea.vmem %s8768_s20, 2048  ;;  %s8569_s30 = smov [#allocation3]  }
  0x4e   : > { %p8434_p8 = scmp.ne.s32.totalorder %s8768_s20, %s8433_s26  ;;  %s8438_s24 = sshll.u32 %s8569_s30, 4  ;;  %s8439_s24 = int_to_ptr.vmem [resolvable:$false] %s8438_s24 }
  0x4f   : > { %s8440_s19 = scalar_lea.vmem %s8439_s24, 4096  ;;  %p8441_p4 = scmp.lt.s32.totalorder %s8768_s20, %s8439_s24 }
  0x50   : > { %p8436_p9 = pnand %p8434_p8, %p8723_p2  ;;  %p8442_p11 = scmp.lt.s32.totalorder %s8440_s19, %s8433_s26 }
  0x52   : > { %p8437_p12 = pneg %p8436_p9  ;;  %p8443_p10 = por %p8442_p11, %p8441_p4 }
  0x54   : > { %p8444_p13 = pnand %p8443_p10, %p8437_p12 }
  0x56   : > { %8447 = shalt.err (!%p8444_p13)
}
  0x57   : > { %s10803_s12 = smov 4   ;;  %s10804_s22 = smov 64  }
  0x58   : > { %8219 = dma.hbm_to_vmem [thread:$0]  (!%p8700_p0), %s8765_s9, 2048, %s8768_s20, %s331_s14, %s10804_s22, %s10804_s22, %s10803_s12  }
  0x59   : > { %s8448_s17 = scalar_lea.hbm %s8773_s1, 128  ;;  %s8453_s13 = scalar_lea.hbm %s10732_s2, 4096 }
  0x5a   : > { %p8449_p7 = scmp.ne.s32.totalorder %s8773_s1, %s8448_s17  ;;  %p8454_p3 = scmp.lt.u32.totalorder %s8773_s1, %s10732_s2 }
  0x5b   : > { %p8455_p5 = scmp.lt.u32.totalorder %s8453_s13, %s8448_s17  ;;  %p8457_p8 = scmp.lt.u32.totalorder %s8448_s17, %s8773_s1 }
  0x5c   : > { %p8451_p11 = pnand %p8449_p7, %p8723_p2 }
  0x5d   : > { %p8456_p6 = por %p8455_p5, %p8454_p3 }
  0x5e   : > { %p8452_p1 = pneg %p8451_p11 }
  0x5f   : > { %p8458_p9 = por %p8457_p8, %p8456_p6 }
  0x61   : > { %p8459_p12 = pnand %p8458_p9, %p8452_p1 }
  0x63   : > { %8462 = shalt.err (!%p8459_p12)
}
  0x64   : > { %s8463_s14 = scalar_lea.vmem %s8752_s23, 128  ;;  %s8570_s25 = smov [#allocation8]  }
  0x65   : > { %p8464_p4 = scmp.ne.s32.totalorder %s8752_s23, %s8463_s14  ;;  %s8468_s9 = sshll.u32 %s8570_s25, 4  ;;  %s8469_s9 = int_to_ptr.vmem [resolvable:$false] %s8468_s9 }
  0x66   : > { %s8470_s20 = scalar_lea.vmem %s8469_s9, 256  ;;  %p8471_p7 = scmp.lt.s32.totalorder %s8752_s23, %s8469_s9 }
  0x67   : > { %p8466_p10 = pnand %p8464_p4, %p8723_p2  ;;  %p8472_p11 = scmp.lt.s32.totalorder %s8470_s20, %s8463_s14 }
  0x69   : > { %p8467_p13 = pneg %p8466_p10  ;;  %p8473_p3 = por %p8472_p11, %p8471_p7 }
  0x6b   : > { %p8474_p5 = pnand %p8473_p3, %p8467_p13 }
  0x6d   : > { %8477 = shalt.err (!%p8474_p5)
}
  0x6e   : > { %8225 = dma.hbm_to_vmem [thread:$0]  (!%p8700_p0), %s8773_s1, 128, %s8752_s23, %s8717_s11, %s10804_s22, %s10804_s22, %s10803_s12  }
  0x6f   : > { %p10805_p2 = scmp.ne.s32.totalorder %s10802_s29, 0 }
  0x71   : > { %410 = sbr.rel (%p10805_p2) target bundleno = 1278 (0x4fe), region = 56 }
  0x78   : > { %s8830_s16 = sand.u32 1, %s8548_s10   ;;  %p10806_p1 = scmp.ne.s32.totalorder %s10793_s21, 0 }
  0x79   : > { %s6755_s24 = sshll.u32 %s8830_s16, 7  ;;  %s413_s19 = scalar_lea.sflag [#allocation4], %s8830_s16 }
  0x7a   : > { %s8836_s27 = scalar_lea.vmem [#allocation3], %s6755_s24 }
  0x7b   : > { %8531 = dma.done.wait (%p10806_p1), %s413_s19, 2048  }
  0x7c   : > { %8533 = vsyncadd (%p10806_p1), %s413_s19, 4294965248  ;;  %s421_s1 = sand.u32 1, %s8655_s15   ;;  %s6756_s11 = sshll.u32 %s8830_s16, 3 }
  0x7d   : > { %s422_s23 = scalar_lea.sflag [#allocation7], %s421_s1  ;;  %s425_s29 = scalar_lea.vmem [#allocation6], %s6756_s11 }
  0x7e   : > { %8535 = dma.done.wait (%p10806_p1), %s422_s23, 256  }
  0x7f   : > { %8537 = vsyncadd (%p10806_p1), %s422_s23, 4294967040  ;;  %v8284_v0 = vld [vmem:[%s10733_s3] sm:$0xff]   ;;  %vm617_vm0 = vcmask 130048   ;;  %v8286_v2 = vld [vmem:[%s8836_s27] sm:$0xff]   ;;  %s434_s15 = scalar_lea.vmem [#allocation8], %s6756_s11  ;;  %vm1969_vm1 = vcmask 1041408  }
  0x80   : > { %v8285_v1 = vld [vmem:[%s10733_s3] sm:$0xff]   ;;  %7559 = vmatprep.subr.bf16.mxu0 %v8284_v0  ;;  %7561 = vmatprep.mubr.msk.bf16.mxu0 %vm617_vm0, %v8286_v2  ;;  %v8289_v5 = vld [vmem:[%s434_s15] sm:$0xff]   ;;  %v8292_v8 = vld [vmem:[%s8836_s27 + $0x20] sm:$0xff]   ;;  %vm1019_vm2 = vcmask 1040384   ;;  %vm1020_vm3 = vsmask.f32 256 }
  0x81   : > { %7593 = vmatprep.subr.bf16.mxu1 %v8285_v1  ;;  %7560 = vmatpush3.bf16.msra.mxu0 %v8284_v0  ;;  %v8287_v3 = vld [vmem:[%s425_s29] sm:$0xff]   ;;  %v8290_v6 = vld [vmem:[%s8836_s27 + $0x10] sm:$0xff]   ;;  %v8291_v7 = vld [vmem:[%s8836_s27 + $0x18] sm:$0xff]   ;;  %vm1231_vm4 = vcmask 27648   ;;  %vm1234_vm5 = vcmask 24576   ;;  %vm1920_vm9 = vcmask 31744  }
  0x82   : > { %7594 = vmatpush3.bf16.msra.mxu1 %v8285_v1  ;;  %v8288_v4 = vld [vmem:[%s8836_s27 + $0x8] sm:$0xff]   ;;  %7595 = vmatprep.mubr.msk.bf16.mxu1 %vm617_vm0, %v8287_v3  ;;  %v8294_v10 = vld [vmem:[%s8836_s27 + $0x30] sm:$0xff]   ;;  %v8295_v11 = vld [vmem:[%s8836_s27 + $0x38] sm:$0xff]   ;;  %vm1483_vm7 = vsmask.f32 3328  ;;  %vm2474_vm11 = vcmask 1042432  }
  0x83   : > { %v8293_v9 = vld [vmem:[%s8836_s27 + $0x28] sm:$0xff]   ;;  %v8296_v12 = vld [vmem:[%s8836_s27 + $0x40] sm:$0xff]   ;;  %v8298_v14 = vld [vmem:[%s8836_s27 + $0x50] sm:$0xff]   ;;  %vm1484_vm8 = vsmask.f32 7440  ;;  %vm2475_vm12 = vcmask 1046532  }
  0x84   : > { %7562 = vmatmul.mubr.msk.bf16.vlgmr.msra.gmra.mrb[0].mxu0 %vm617_vm0, %v8288_v4  ;;  %v8297_v13 = vld [vmem:[%s8836_s27 + $0x48] sm:$0xff]   ;;  %v8299_v15 = vld [vmem:[%s8836_s27 + $0x58] sm:$0xff]   ;;  %v8300_v16 = vld [vmem:[%s8836_s27 + $0x60] sm:$0xff]   ;;  %vm6555_vm14 = vcmask 125952   ;;  %s10568_s11 = scalar_lea.vmem [#allocation9], %s6755_s24  ;;  %s10890_s24 = sld [smem:[#allocation15_spill]] }
  0x85   : > { %7596 = vmatmul.mubr.msk.bf16.vlgmr.msra.gmra.mrb[0].mxu1 %vm617_vm0, %v8289_v5  ;;  %7565 = vmatprep.mubr.msk.bf16.mxu0 %vm617_vm0, %v8290_v6  ;;  %v8301_v17 = vld [vmem:[%s8836_s27 + $0x68] sm:$0xff]   ;;  %v8302_v18 = vld [vmem:[%s8836_s27 + $0x70] sm:$0xff]   ;;  %v8303_v19 = vld [vmem:[%s8836_s27 + $0x78] sm:$0xff]   ;;  %s6605_s23 = sshll.u32 %s10568_s11, 4  ;;  %s10891_s29 = sld [smem:[#allocation19_spill]]  ;;  %s10675_s23 = int_to_ptr.vmem [resolvable:$true] %s6605_s23 }
  0x86   : > { %v6853_v20 = vld [vmem:[%s10735_s5 + $0x2] sm:$0x3]  ;;  %v6967_v22 = vld [vmem:[%s10735_s5 + $0x6] sm:$0x3]  ;;  %v8904_v24 = vld [vmem:[%s10735_s5 + $0x8] sm:$0x3] }
  0x87   : > { %8197 = vmatprep.subr.msk.bf16.mxu0 %vm1969_vm1, %v6853_v20  ;;  %v1971_v21 = vsel %vm1969_vm1, %v6853_v20, 0  ;;  %8201 = vmatprep.subr.msk.bf16.mxu1 %vm1969_vm1, %v6967_v22  ;;  %v8898_v23 = vsel %vm1969_vm1, %v6967_v22, 0  ;;  %v8911_v25 = vld [vmem:[%s10734_s4] ss:$0 sm:$0xff]  ;;  %vm8923_vm6 = vmand %vm1019_vm2, %vm1020_vm3  ;;  %s10892_s17 = sld [smem:[#allocation40_spill]]  ;;  %s6589_s15 = scalar_lea.sflag [#allocation5], %s8830_s16 }
  0x88   : > { %7600 = vmatpush3.bf16.msra.mxu0 %v1971_v21  ;;  %10807 = vst [vmem:[#allocation22_spill] sm:$0xff] %v8898_v23  ;;  %7940 = vmatpush3.bf16.msra.mxu1 %v8898_v23  ;;  %vm9070_vm10 = vmor %vm1483_vm7, %vm1484_vm8  ;;  %s8478_s21 = scalar_lea.vmem %s10675_s23, 2048  ;;  %s8571_s28 = smov [#allocation9]  }
  0x89   : > { %8202 = vmatprep.subr.msk.bf16.mxu1 %vm1969_vm1, %v8904_v24  ;;  %vm9573_vm13 = vmor %vm2474_vm11, %vm2475_vm12  ;;  %p8479_p0 = scmp.ne.s32.totalorder %s10675_s23, %s8478_s21  ;;  %s8482_s13 = sshll.u32 %s8571_s28, 4  ;;  %s8483_s13 = int_to_ptr.vmem [resolvable:$false] %s8482_s13 }
  0x8a   : > { %s8484_s26 = scalar_lea.vmem %s8483_s13, 4096  ;;  %p8485_p12 = scmp.lt.s32.totalorder %s10675_s23, %s8483_s13 }
  0x8b   : > { %p10893_p6 = scmp.ne.s32.totalorder %s10891_s29, 0  ;;  %p8486_p4 = scmp.lt.s32.totalorder %s8484_s26, %s8478_s21 }
  0x8c   : > { %7566 = vmatmul.mubr.msk.bf16.gmra.mrb[4].mxu0 %vm617_vm0, %v8291_v7 }
  0x8d   : > { %7569 = vmatprep.mubr.msk.bf16.mxu0 %vm617_vm0, %v8292_v8  ;;  %p8480_p8 = pnand %p8479_p0, %p10893_p6  ;;  %p8487_p10 = por %p8486_p4, %p8485_p12 }
  0x8f   : > { %p8481_p9 = pneg %p8480_p8 }
  0x91   : > { %p8488_p13 = pnand %p8487_p10, %p8481_p9 }
  0x94   : > { %7570 = vmatmul.mubr.msk.bf16.gmra.mrb[8].mxu0 %vm617_vm0, %v8293_v9 }
  0x95   : > { %7573 = vmatprep.mubr.msk.bf16.mxu0 %vm617_vm0, %v8294_v10 }
  0x9c   : > { %7574 = vmatmul.mubr.msk.bf16.gmra.mrb[12].mxu0 %vm617_vm0, %v8295_v11 }
  0x9d   : > { %7577 = vmatprep.mubr.msk.bf16.mxu0 %vm617_vm0, %v8296_v12 }
  0xa4   : > { %7578 = vmatmul.mubr.msk.bf16.gmra.mrb[16].mxu0 %vm617_vm0, %v8297_v13 }
  0xa5   : > { %7581 = vmatprep.mubr.msk.bf16.mxu0 %vm617_vm0, %v8298_v14 }
  0xac   : > { %7582 = vmatmul.mubr.msk.bf16.gmra.mrb[20].mxu0 %vm617_vm0, %v8299_v15 }
  0xad   : > { %7585 = vmatprep.mubr.msk.bf16.mxu0 %vm617_vm0, %v8300_v16 }
  0xb4   : > { %7586 = vmatmul.mubr.msk.bf16.gmra.mrb[24].mxu0 %vm617_vm0, %v8301_v17 }
  0xb5   : > { %7589 = vmatprep.mubr.msk.bf16.mxu0 %vm617_vm0, %v8302_v18 }
  0xbc   : > { %7590 = vmatmul.mubr.msk.bf16.gmra.mrb[28].mxu0 %vm617_vm0, %v8303_v19 }
 0x157   : > { %v7563_v26 = vpop.f32.mrb[0].mxu0 }
 0x158   : > { %v709_v27 = vadd.f32 %v7563_v26, %v8911_v25  ;;  %v7597_v28 = vpop.f32.mrb[0].mxu1  ;;  %v700_v29 = vpop.f32.mrb[1].mxu0 }
 0x159   : > { %v1359_v30 = vadd.f32 %v7597_v28, %v8911_v25  ;;  %v701_v31 = vadd.f32 %v8911_v25, %v700_v29  ;;  %v1350_v32 = vpop.f32.mrb[1].mxu1  ;;  %v7564_v33 = vpop.f32.mrb[2].mxu0 }
 0x15a   : > { %v1351_v34 = vadd.f32 %v8911_v25, %v1350_v32  ;;  %v712_v35 = vadd.f32 %v7564_v33, %v8911_v25  ;;  %v7598_v36 = vpop.f32.mrb[2].mxu1  ;;  %v703_v37 = vpop.f32.mrb[3].mxu0  ;;  %v829_v42 = vmax.f32 %v709_v27, 0.0 }
 0x15b   : > { %v1367_v38 = vmax.f32 %v1359_v30, 0.0  ;;  %v1362_v39 = vadd.f32 %v7598_v36, %v8911_v25  ;;  %v704_v40 = vadd.f32 %v8911_v25, %v703_v37  ;;  %v1353_v41 = vpop.f32.mrb[3].mxu1  ;;  %v827_v47 = vmax.f32 %v701_v31, 0.0 }
 0x15c   : > { %v1365_v43 = vmax.f32 %v1351_v34, 0.0  ;;  %v830_v44 = vmax.f32 %v712_v35, 0.0  ;;  %v1354_v45 = vadd.f32 %v8911_v25, %v1353_v41 }
 0x15d   : > { %v1405_v46 = vmul.f32 0.0, %v1367_v38  ;;  %v1368_v48 = vmax.f32 %v1362_v39, 0.0  ;;  %v828_v49 = vmax.f32 %v704_v40, 0.0 }
 0x15e   : > { %v1376_v50 = vmul.f32 0.0, %v1365_v43  ;;  %v860_v51 = vpack.c.bf16 %v830_v44, %v829_v42  ;;  %v1366_v52 = vmax.f32 %v1354_v45, 0.0 }
 0x15f   : > { %v1406_v53 = vmul.f32 0.0, %v1368_v48  ;;  %v859_v54 = vpack.c.bf16 %v828_v49, %v827_v47  ;;  %v7567_v55 = vpop.f32.mrb[4].mxu0 }
 0x160   : > { %v883_v56 = vshrl.u32 %v860_v51, 16  ;;  %v1377_v57 = vmul.f32 0.0, %v1366_v52  ;;  %v725_v58 = vadd.f32 %v7567_v55, %v8911_v25  ;;  %v716_v59 = vpop.f32.mrb[5].mxu0  ;;  %v886_v60 = vshll.u32 %v860_v51, 16 }
 0x161   : > { %v1407_v62 = vpack.c.bf16 %v1406_v53, %v1405_v46  ;;  %v876_v63 = vshrl.u32 %v859_v54, 16  ;;  %v879_v0 = vshll.u32 %v859_v54, 16  ;;  %v7568_v1 = vpop.f32.mrb[6].mxu0  ;;  %v8928_v4 = vadd.f32 %v8911_v25, %v716_v59 }
 0x162   : > { %v885_v2 = vrot.slane %v883_v56, 7  ;;  %v1378_v3 = vpack.c.bf16 %v1377_v57, %v1376_v50  ;;  %v728_v5 = vadd.f32 %v7568_v1, %v8911_v25  ;;  %v719_v6 = vpop.f32.mrb[7].mxu0  ;;  %v833_v10 = vmax.f32 %v725_v58, 0.0  ;;  %v8960_v50 = vld [vmem:[%s10735_s5 + $0xa] sm:$0x3] }
 0x163   : > { %v1409_v7 = vshrl.u32 %v1407_v62, 16  ;;  %v1412_v8 = vshll.u32 %v1407_v62, 16  ;;  %v878_v9 = vrot.slane %v876_v63, 7  ;;  %v720_v48 = vadd.f32 %v8911_v25, %v719_v6 }
 0x164   : > { %v888_v11 = vor.u32 %v886_v60, %v885_v2  ;;  %v1039_v12 = vsel %vm8923_vm6, %v885_v2, 0  ;;  %v1380_v13 = vshrl.u32 %v1378_v3, 16  ;;  %v1383_v14 = vshll.u32 %v1378_v3, 16 }
 0x165   : > { %v6798_v15 = vcombine.low %v1039_v12, %v1039_v12  ;;  %v1411_v16 = vrot.slane %v1409_v7, 7  ;;  %v881_v17 = vor.u32 %v879_v0, %v878_v9  ;;  %v1038_v18 = vsel %vm8923_vm6, %v878_v9, 0 }
 0x166   : > { %v1023_v19 = vsel %vm8923_vm6, 0, %v888_v11  ;;  %v6795_v20 = vcombine.low %v1038_v18, %v1038_v18  ;;  %v1382_v21 = vrot.slane %v1380_v13, 7  ;;  %v834_v22 = vmax.f32 %v728_v5, 0.0 }
 0x167   : > { %v6796_v26 = vcombine.low %v1023_v19, %v1023_v19  ;;  %v6797_v27 = vcombine.high %v1023_v19, %v1023_v19  ;;  %1238 = vst.msk [vmem:[#allocation2 + $0x20] sm:$0x1] %vm1234_vm5, %v6798_v15  ;;  %v1414_v28 = vor.u32 %v1412_v8, %v1411_v16  ;;  %v1418_v29 = vsel %vm8923_vm6, %v1411_v16, 0  ;;  %v7571_v30 = vpop.f32.mrb[8].mxu0 }
 0x168   : > { %v6852_v31 = vcombine.low %v1418_v29, %v1418_v29  ;;  %v1022_v32 = vsel %vm8923_vm6, 0, %v881_v17  ;;  %1235 = vst.msk [vmem:[#allocation2 + $0x14] sm:$0x1] %vm1234_vm5, %v6795_v20  ;;  %v1385_v33 = vor.u32 %v1383_v14, %v1382_v21  ;;  %v1389_v34 = vsel %vm8923_vm6, %v1382_v21, 0  ;;  %v732_v35 = vpop.f32.mrb[9].mxu0 }
 0x169   : > { %1236 = vst.msk [vmem:[#allocation2 + $0x18] sm:$0xf] %vm1231_vm4, %v6796_v26  ;;  %1237 = vst.msk [vmem:[#allocation2 + $0x1c] sm:$0xf] %vm1231_vm4, %v6797_v27  ;;  %v1417_v36 = vsel %vm8923_vm6, 0, %v1414_v28  ;;  %v6793_v37 = vcombine.low %v1022_v32, %v1022_v32  ;;  %v6794_v38 = vcombine.high %v1022_v32, %v1022_v32  ;;  %v6849_v39 = vcombine.low %v1389_v34, %v1389_v34  ;;  %v7572_v40 = vpop.f32.mrb[10].mxu0 }
 0x16a   : > { %v6850_v41 = vcombine.low %v1417_v36, %v1417_v36  ;;  %v6851_v42 = vcombine.high %v1417_v36, %v1417_v36  ;;  %1433 = vst.msk [vmem:[#allocation2 + $0xd4] sm:$0x1] %vm1234_vm5, %v6852_v31  ;;  %v1388_v43 = vsel %vm8923_vm6, 0, %v1385_v33  ;;  %v862_v44 = vpack.c.bf16 %v834_v22, %v833_v10  ;;  %v735_v45 = vpop.f32.mrb[11].mxu0 }
 0x16b   : > { %1232 = vst.msk [vmem:[#allocation2 + $0xc] sm:$0xf] %vm1231_vm4, %v6793_v37  ;;  %1233 = vst.msk [vmem:[#allocation2 + $0x10] sm:$0xf] %vm1231_vm4, %v6794_v38  ;;  %v6847_v46 = vcombine.low %v1388_v43, %v1388_v43  ;;  %v6848_v47 = vcombine.high %v1388_v43, %v1388_v43  ;;  %v741_v49 = vadd.f32 %v7571_v30, %v8911_v25  ;;  %v8968_v54 = vsel %vm1969_vm1, %v8904_v24, 0 }
 0x16c   : > { %1403 = vst.msk [vmem:[#allocation2 + $0x8] sm:$0x1] %vm1234_vm5, %v6849_v39  ;;  %v897_v51 = vshrl.u32 %v862_v44, 16  ;;  %v733_v52 = vadd.f32 %v8911_v25, %v732_v35  ;;  %v744_v53 = vadd.f32 %v7572_v40, %v8911_v25  ;;  %v831_v55 = vmax.f32 %v8928_v4, 0.0 }
 0x16d   : > { %1431 = vst.msk [vmem:[#allocation2 + $0xcc] sm:$0xf] %vm1231_vm4, %v6850_v41  ;;  %1432 = vst.msk [vmem:[#allocation2 + $0xd0] sm:$0xf] %vm1231_vm4, %v6851_v42  ;;  %v900_v56 = vshll.u32 %v862_v44, 16  ;;  %v832_v57 = vmax.f32 %v720_v48, 0.0  ;;  %v736_v58 = vadd.f32 %v8911_v25, %v735_v45 }
 0x16e   : > { %1401 = vst.msk [vmem:[#allocation2] sm:$0xf] %vm1231_vm4, %v6847_v46  ;;  %1402 = vst.msk [vmem:[#allocation2 + $0x4] sm:$0xf] %vm1231_vm4, %v6848_v47  ;;  %v899_v59 = vrot.slane %v897_v51, 7  ;;  %v837_v60 = vmax.f32 %v741_v49, 0.0 }
 0x16f   : > { %v838_v62 = vmax.f32 %v744_v53, 0.0  ;;  %v8974_v63 = vld [vmem:[#allocation2 + $0x20] sm:$0x1]  ;;  %v8978_v0 = vsel %vm1969_vm1, %v8960_v50, 0  ;;  %v861_v24 = vpack.c.bf16 %v832_v57, %v831_v55  ;;  %v835_v1 = vmax.f32 %v733_v52, 0.0  ;;  %v7575_v3 = vpop.f32.mrb[12].mxu0 }
 0x170   : > { %v836_v2 = vmax.f32 %v736_v58, 0.0  ;;  %v1554_v5 = vshll.u32 %v8974_v63, 16  ;;  %v902_v4 = vor.u32 %v900_v56, %v899_v59  ;;  %v1041_v6 = vsel %vm8923_vm6, %v899_v59, 0  ;;  %v748_v9 = vpop.f32.mrb[13].mxu0  ;;  %v1466_v51 = vld [vmem:[%s10735_s5] sm:$0x3] }
 0x171   : > { %v864_v7 = vpack.c.bf16 %v838_v62, %v837_v60  ;;  %v757_v8 = vadd.f32 %v7575_v3, %v8911_v25  ;;  %v6804_v10 = vcombine.low %v1041_v6, %v1041_v6  ;;  %v890_v11 = vshrl.u32 %v861_v24, 16  ;;  %v7576_v14 = vpop.f32.mrb[14].mxu0  ;;  %8198 = vmatprep.subr.msk.bf16.mxu0 %vm1969_vm1, %v1466_v51 }
 0x172   : > { %v893_v12 = vshll.u32 %v861_v24, 16  ;;  %v863_v13 = vpack.c.bf16 %v836_v2, %v835_v1  ;;  %v1025_v15 = vsel %vm8923_vm6, 0, %v902_v4  ;;  %v751_v19 = vpop.f32.mrb[15].mxu0  ;;  %v749_v29 = vadd.f32 %v8911_v25, %v748_v9 }
 0x173   : > { %v911_v16 = vshrl.u32 %v864_v7, 16  ;;  %v914_v17 = vshll.u32 %v864_v7, 16  ;;  %v841_v18 = vmax.f32 %v757_v8, 0.0  ;;  %v6802_v20 = vcombine.low %v1025_v15, %v1025_v15  ;;  %1244 = vst.msk [vmem:[#allocation2 + $0x38] sm:$0x1] %vm1234_vm5, %v6804_v10 }
 0x174   : > { %v6803_v21 = vcombine.high %v1025_v15, %v1025_v15  ;;  %v892_v22 = vrot.slane %v890_v11, 7  ;;  %v904_v26 = vshrl.u32 %v863_v13, 16  ;;  %v907_v28 = vshll.u32 %v863_v13, 16 }
 0x175   : > { %v913_v27 = vrot.slane %v911_v16, 7  ;;  %v760_v30 = vadd.f32 %v7576_v14, %v8911_v25  ;;  %1242 = vst.msk [vmem:[#allocation2 + $0x30] sm:$0xf] %vm1231_vm4, %v6802_v20  ;;  %v752_v34 = vadd.f32 %v8911_v25, %v751_v19  ;;  %v839_v38 = vmax.f32 %v749_v29, 0.0  ;;  %v1434_v49 = vld [vmem:[#allocation2] sm:$0xf] }
 0x176   : > { %1243 = vst.msk [vmem:[#allocation2 + $0x34] sm:$0xf] %vm1231_vm4, %v6803_v21  ;;  %v895_v31 = vor.u32 %v893_v12, %v892_v22  ;;  %v1040_v32 = vsel %vm8923_vm6, %v892_v22, 0  ;;  %v906_v33 = vrot.slane %v904_v26, 7  ;;  %v9021_v8 = vld [vmem:[#allocation2 + $0x4] sm:$0xf] }
 0x177   : > { %v6801_v35 = vcombine.low %v1040_v32, %v1040_v32  ;;  %v916_v36 = vor.u32 %v914_v17, %v913_v27  ;;  %v1043_v37 = vsel %vm8923_vm6, %v913_v27, 0  ;;  %v7579_v43 = vpop.f32.mrb[16].mxu0  ;;  %v842_v56 = vmax.f32 %v760_v30, 0.0 }
 0x178   : > { %v1024_v39 = vsel %vm8923_vm6, 0, %v895_v31  ;;  %v6810_v40 = vcombine.low %v1043_v37, %v1043_v37  ;;  %v909_v41 = vor.u32 %v907_v28, %v906_v33  ;;  %v1042_v42 = vsel %vm8923_vm6, %v906_v33, 0  ;;  %v764_v48 = vpop.f32.mrb[17].mxu0 }
 0x179   : > { %v6799_v44 = vcombine.low %v1024_v39, %v1024_v39  ;;  %v6800_v45 = vcombine.high %v1024_v39, %v1024_v39  ;;  %1241 = vst.msk [vmem:[#allocation2 + $0x2c] sm:$0x1] %vm1234_vm5, %v6801_v35  ;;  %v1027_v46 = vsel %vm8923_vm6, 0, %v916_v36  ;;  %v6807_v47 = vcombine.low %v1042_v42, %v1042_v42  ;;  %v7580_v57 = vpop.f32.mrb[18].mxu0 }
 0x17a   : > { %v6808_v52 = vcombine.low %v1027_v46, %v1027_v46  ;;  %v6809_v53 = vcombine.high %v1027_v46, %v1027_v46  ;;  %1250 = vst.msk [vmem:[#allocation2 + $0x50] sm:$0x1] %vm1234_vm5, %v6810_v40  ;;  %v1026_v55 = vsel %vm8923_vm6, 0, %v909_v41  ;;  %v840_v60 = vmax.f32 %v752_v34, 0.0  ;;  %v767_v24 = vpop.f32.mrb[19].mxu0 }
 0x17b   : > { %1239 = vst.msk [vmem:[#allocation2 + $0x24] sm:$0xf] %vm1231_vm4, %v6799_v44  ;;  %1240 = vst.msk [vmem:[#allocation2 + $0x28] sm:$0xf] %vm1231_vm4, %v6800_v45  ;;  %v6805_v58 = vcombine.low %v1026_v55, %v1026_v55  ;;  %v6806_v59 = vcombine.high %v1026_v55, %v1026_v55  ;;  %v773_v62 = vadd.f32 %v7579_v43, %v8911_v25  ;;  %v1487_v9 = vshrl.u32 %v1434_v49, 16 }
 0x17c   : > { %1247 = vst.msk [vmem:[#allocation2 + $0x44] sm:$0x1] %vm1234_vm5, %v6807_v47  ;;  %v866_v1 = vpack.c.bf16 %v842_v56, %v841_v18  ;;  %v765_v2 = vadd.f32 %v8911_v25, %v764_v48  ;;  %v776_v3 = vadd.f32 %v7580_v57, %v8911_v25  ;;  %v768_v4 = vadd.f32 %v8911_v25, %v767_v24 }
 0x17d   : > { %1248 = vst.msk [vmem:[#allocation2 + $0x48] sm:$0xf] %vm1231_vm4, %v6808_v52  ;;  %1249 = vst.msk [vmem:[#allocation2 + $0x4c] sm:$0xf] %vm1231_vm4, %v6809_v53  ;;  %v865_v6 = vpack.c.bf16 %v840_v60, %v839_v38  ;;  %v845_v7 = vmax.f32 %v773_v62, 0.0  ;;  %v1490_v10 = vshll.u32 %v1434_v49, 16 }
 0x17e   : > { %1245 = vst.msk [vmem:[#allocation2 + $0x3c] sm:$0xf] %vm1231_vm4, %v6805_v58  ;;  %1246 = vst.msk [vmem:[#allocation2 + $0x40] sm:$0xf] %vm1231_vm4, %v6806_v59  ;;  %v925_v11 = vshrl.u32 %v866_v1, 16  ;;  %v928_v12 = vshll.u32 %v866_v1, 16 }
 0x17f   : > { %v843_v13 = vmax.f32 %v765_v2, 0.0  ;;  %v846_v14 = vmax.f32 %v776_v3, 0.0  ;;  %v918_v15 = vshrl.u32 %v865_v6, 16  ;;  %v921_v16 = vshll.u32 %v865_v6, 16  ;;  %v7583_v21 = vpop.f32.mrb[20].mxu0 }
 0x180   : > { %v844_v17 = vmax.f32 %v768_v4, 0.0  ;;  %v9023_v18 = vrot.slane %v1487_v9, 4  ;;  %v927_v19 = vrot.slane %v925_v11, 7  ;;  %v1492_v22 = vrot.slane %v1490_v10, 5  ;;  %v780_v31 = vpop.f32.mrb[21].mxu0 }
 0x181   : > { %v868_v20 = vpack.c.bf16 %v846_v14, %v845_v7  ;;  %v1496_v26 = vshll.u32 %v9021_v8, 16  ;;  %v920_v27 = vrot.slane %v918_v15, 7  ;;  %v9027_v29 = vadd.f32 %v7583_v21, %v8911_v25  ;;  %v9032_v36 = vpop.f32.mrb[22].mxu0  ;;  %v1467_v60 = vld [vmem:[#allocation2 + $0x8] sm:$0x1] }
 0x182   : > { %v867_v28 = vpack.c.bf16 %v844_v17, %v843_v13  ;;  %v1500_v30 = vshrl.u32 %v9021_v8, 16  ;;  %v930_v32 = vor.u32 %v928_v12, %v927_v19  ;;  %v1045_v33 = vsel %vm8923_vm6, %v927_v19, 0  ;;  %v9036_v41 = vpop.f32.mrb[23].mxu0  ;;  %v1436_v3 = vld [vmem:[#allocation2 + $0xc] sm:$0xf] }
 0x183   : > { %v939_v34 = vshrl.u32 %v868_v20, 16  ;;  %v942_v35 = vshll.u32 %v868_v20, 16  ;;  %v6816_v37 = vcombine.low %v1045_v33, %v1045_v33  ;;  %v923_v38 = vor.u32 %v921_v16, %v920_v27  ;;  %v1437_v10 = vld [vmem:[#allocation2 + $0x10] sm:$0xf]  ;;  %v1468_v20 = vld [vmem:[#allocation2 + $0x14] sm:$0x1] }
 0x184   : > { %v1044_v39 = vsel %vm8923_vm6, %v920_v27, 0  ;;  %v932_v40 = vshrl.u32 %v867_v28, 16  ;;  %v1029_v42 = vsel %vm8923_vm6, 0, %v930_v32  ;;  %v935_v45 = vshll.u32 %v867_v28, 16  ;;  %v1438_v33 = vld [vmem:[#allocation2 + $0x18] sm:$0xf] }
 0x185   : > { %v6813_v43 = vcombine.low %v1044_v39, %v1044_v39  ;;  %v941_v44 = vrot.slane %v939_v34, 7  ;;  %v6814_v46 = vcombine.low %v1029_v42, %v1029_v42  ;;  %v6815_v47 = vcombine.high %v1029_v42, %v1029_v42  ;;  %1256 = vst.msk [vmem:[#allocation2 + $0x68] sm:$0x1] %vm1234_vm5, %v6816_v37  ;;  %v5523_v17 = vld [vmem:[#allocation2 + $0x24] sm:$0xe] }
 0x186   : > { %v1028_v48 = vsel %vm8923_vm6, 0, %v923_v38  ;;  %v934_v49 = vrot.slane %v932_v40, 7  ;;  %v849_v59 = vmax.f32 %v9027_v29, 0.0  ;;  %v1493_v1 = vor.u32 %v1492_v22, %v9023_v18 }
 0x187   : > { %v6811_v51 = vcombine.low %v1028_v48, %v1028_v48  ;;  %v6812_v52 = vcombine.high %v1028_v48, %v1028_v48  ;;  %1253 = vst.msk [vmem:[#allocation2 + $0x5c] sm:$0x1] %vm1234_vm5, %v6813_v43  ;;  %v944_v53 = vor.u32 %v942_v35, %v941_v44  ;;  %v1047_v55 = vsel %vm8923_vm6, %v941_v44, 0  ;;  %v9056_v4 = vpop.f32.mrb[24].mxu0  ;;  %v1439_v43 = vld [vmem:[#allocation2 + $0x1c] sm:$0xf] }
 0x188   : > { %1254 = vst.msk [vmem:[#allocation2 + $0x60] sm:$0xf] %vm1231_vm4, %v6814_v46  ;;  %1255 = vst.msk [vmem:[#allocation2 + $0x64] sm:$0xf] %vm1231_vm4, %v6815_v47  ;;  %v6822_v56 = vcombine.low %v1047_v55, %v1047_v55  ;;  %v937_v57 = vor.u32 %v935_v45, %v934_v49  ;;  %v1046_v58 = vsel %vm8923_vm6, %v934_v49, 0  ;;  %v1498_v2 = vrot.slane %v1496_v26, 5 }
 0x189   : > { %1251 = vst.msk [vmem:[#allocation2 + $0x54] sm:$0xf] %vm1231_vm4, %v6811_v51  ;;  %1252 = vst.msk [vmem:[#allocation2 + $0x58] sm:$0xf] %vm1231_vm4, %v6812_v52  ;;  %v1031_v62 = vsel %vm8923_vm6, 0, %v944_v53  ;;  %v6819_v24 = vcombine.low %v1046_v58, %v1046_v58  ;;  %v1502_v9 = vrot.slane %v1500_v30, 4  ;;  %v9075_v19 = vadd.f32 %v8911_v25, %v780_v31 }
 0x18a   : > { %v6820_v6 = vcombine.low %v1031_v62, %v1031_v62  ;;  %v6821_v7 = vcombine.high %v1031_v62, %v1031_v62  ;;  %1262 = vst.msk [vmem:[#allocation2 + $0x80] sm:$0x1] %vm1234_vm5, %v6822_v56  ;;  %v1030_v8 = vsel %vm8923_vm6, 0, %v937_v57  ;;  %v9061_v11 = vpop.f32.mrb[25].mxu0  ;;  %v1494_v14 = vrot.slane %v1493_v1, 4 }
 0x18b   : > { %v6817_v12 = vcombine.low %v1030_v8, %v1030_v8  ;;  %v6818_v13 = vcombine.high %v1030_v8, %v1030_v8  ;;  %1259 = vst.msk [vmem:[#allocation2 + $0x74] sm:$0x1] %vm1234_vm5, %v6819_v24  ;;  %v1506_v15 = vshll.u32 %v1467_v60, 16  ;;  %v9064_v16 = vpop.f32.mrb[26].mxu0  ;;  %v1503_v18 = vor.u32 %v1502_v9, %v1498_v2  ;;  %v1440_v60 = vld [vmem:[#allocation2 + $0x24] sm:$0xf] }
 0x18c   : > { %1260 = vst.msk [vmem:[#allocation2 + $0x78] sm:$0xf] %vm1231_vm4, %v6820_v6  ;;  %1261 = vst.msk [vmem:[#allocation2 + $0x7c] sm:$0xf] %vm1231_vm4, %v6821_v7  ;;  %v1511_v21 = vshrl.u32 %v1436_v3, 16  ;;  %v1514_v22 = vshll.u32 %v1436_v3, 16  ;;  %v1499_v27 = vsel %vm9070_vm10, %v1494_v14, %v1498_v2  ;;  %v792_v42 = vadd.f32 %v9032_v36, %v8911_v25 }
 0x18d   : > { %v9077_v26 = vpop.f32.mrb[27].mxu0  ;;  %1257 = vst.msk [vmem:[#allocation2 + $0x6c] sm:$0xf] %vm1231_vm4, %v6817_v12  ;;  %1258 = vst.msk [vmem:[#allocation2 + $0x70] sm:$0xf] %vm1231_vm4, %v6818_v13  ;;  %v1508_v28 = vrot.slane %v1506_v15, 5  ;;  %v784_v9 = vadd.f32 %v8911_v25, %v9036_v41  ;;  %v9111_v41 = vadd.f32 %v8911_v25, %v9061_v11 }
 0x18e   : > { %v1520_v30 = vshll.u32 %v1437_v10, 16  ;;  %v1524_v32 = vshrl.u32 %v1437_v10, 16  ;;  %v1504_v34 = vrot.slane %v1503_v18, 4  ;;  %v847_v31 = vmax.f32 %v9075_v19, 0.0 }
 0x18f   : > { %v1513_v35 = vrot.slane %v1511_v21, 4  ;;  %v1516_v37 = vrot.slane %v1514_v22, 5  ;;  %v1530_v40 = vshll.u32 %v1468_v20, 16  ;;  %v1535_v46 = vshrl.u32 %v1438_v33, 16  ;;  %v9088_v53 = vpop.f32.mrb[28].mxu0 }
 0x190   : > { %v1522_v38 = vrot.slane %v1520_v30, 5  ;;  %v1526_v39 = vrot.slane %v1524_v32, 4  ;;  %v1509_v44 = vsel %vm9070_vm10, %v1504_v34, %v1508_v28  ;;  %v1538_v47 = vshll.u32 %v1438_v33, 16  ;;  %v9090_v62 = vpop.f32.mrb[29].mxu0  ;;  %v1441_v32 = vld [vmem:[#allocation2 + $0x28] sm:$0xf] }
 0x191   : > { %v1517_v45 = vor.u32 %v1516_v37, %v1513_v35  ;;  %v6854_v48 = vcombine.low %v1499_v27, %v1509_v44  ;;  %v1532_v51 = vrot.slane %v1530_v40, 5  ;;  %v850_v52 = vmax.f32 %v792_v42, 0.0  ;;  %v9097_v3 = vpop.f32.mrb[30].mxu0  ;;  %v1470_v40 = vld [vmem:[#allocation2 + $0x2c] sm:$0x1] }
 0x192   : > { %v1527_v49 = vor.u32 %v1526_v39, %v1522_v38  ;;  %v1537_v56 = vrot.slane %v1535_v46, 4  ;;  %v1540_v57 = vrot.slane %v1538_v47, 5  ;;  %v1544_v58 = vshll.u32 %v1439_v43, 16  ;;  %v9103_v10 = vpop.f32.mrb[31].mxu0  ;;  %v1442_v46 = vld [vmem:[#allocation2 + $0x30] sm:$0xf] }
 0x193   : > { %v1518_v55 = vrot.slane %v1517_v45, 4  ;;  %7601 = vmatprep.mubr.msk.bf16.mxu0 %vm1920_vm9, %v6854_v48  ;;  %v870_v24 = vpack.c.bf16 %v850_v52, %v849_v59  ;;  %v1548_v1 = vshrl.u32 %v1439_v43, 16  ;;  %v1556_v2 = vrot.slane %v1554_v5, 5  ;;  %v8305_v19 = vld [vmem:[#allocation2 + $0x78] sm:$0xff]  }
 0x194   : > { %v1528_v36 = vrot.slane %v1527_v49, 4  ;;  %v1541_v7 = vor.u32 %v1540_v57, %v1537_v56  ;;  %v1546_v8 = vrot.slane %v1544_v58, 5  ;;  %v8304_v63 = vld [vmem:[#allocation2 + $0x6c] sm:$0xff]   ;;  %v848_v15 = vmax.f32 %v784_v9, 0.0  ;;  %v1471_v9 = vld [vmem:[#allocation2 + $0x38] sm:$0x1] }
 0x195   : > { %v1523_v6 = vsel %vm9070_vm10, %v1518_v55, %v1522_v38  ;;  %v953_v59 = vshrl.u32 %v870_v24, 16  ;;  %v956_v12 = vshll.u32 %v870_v24, 16  ;;  %v1550_v13 = vrot.slane %v1548_v1, 4  ;;  %7719 = vmatprep.mubr.msk.bf16.mxu1 %vm1920_vm9, %v8304_v63 }
 0x196   : > { %v1533_v29 = vsel %vm9070_vm10, %v1528_v36, %v1532_v51  ;;  %v1542_v14 = vrot.slane %v1541_v7, 4  ;;  %v805_v18 = vadd.f32 %v9056_v4, %v8911_v25  ;;  %v1559_v22 = vshrl.u32 %v1440_v60, 16  ;;  %7720 = vmatmul.mubr.msk.bf16.vlgmr.msra.gmra.mrb[4].mxu1 %vm1920_vm9, %v8305_v19 }
 0x197   : > { %v6855_v5 = vcombine.low %v1523_v6, %v1533_v29  ;;  %v955_v20 = vrot.slane %v953_v59, 7  ;;  %v1551_v21 = vor.u32 %v1550_v13, %v1546_v8  ;;  %v869_v28 = vpack.c.bf16 %v848_v15, %v847_v31  ;;  %7736 = vmatpush3.bf16.msra.mxu1 %v8968_v54  ;;  %v1443_v6 = vld [vmem:[#allocation2 + $0x34] sm:$0xf] }
 0x198   : > { %v1547_v27 = vsel %vm9070_vm10, %v1542_v14, %v1546_v8  ;;  %v853_v30 = vmax.f32 %v805_v18, 0.0  ;;  %v1562_v33 = vshll.u32 %v1440_v60, 16  ;;  %v851_v35 = vmax.f32 %v9111_v41, 0.0  ;;  %8203 = vmatprep.subr.msk.bf16.mxu1 %vm1969_vm1, %v8960_v50 }
 0x199   : > { %7602 = vmatmul.mubr.msk.bf16.vlgmr.msra.gmra.mrb[32].mxu0 %vm1920_vm9, %v6855_v5  ;;  %v958_v4 = vor.u32 %v956_v12, %v955_v20  ;;  %v1049_v34 = vsel %vm8923_vm6, %v955_v20, 0  ;;  %v1552_v11 = vrot.slane %v1551_v21, 4  ;;  %v946_v38 = vshrl.u32 %v869_v28, 16 }
 0x19a   : > { %v6828_v37 = vcombine.low %v1049_v34, %v1049_v34  ;;  %v949_v39 = vshll.u32 %v869_v28, 16  ;;  %v1561_v42 = vrot.slane %v1559_v22, 4  ;;  %v1564_v44 = vrot.slane %v1562_v33, 5  ;;  %v1444_v33 = vld [vmem:[#allocation2 + $0x3c] sm:$0xf] }
 0x19b   : > { %v1033_v31 = vsel %vm8923_vm6, 0, %v958_v4  ;;  %v1557_v43 = vsel %vm9070_vm10, %v1552_v11, %v1556_v2  ;;  %v1568_v45 = vshll.u32 %v1441_v32, 16  ;;  %v948_v49 = vrot.slane %v946_v38, 7 }
 0x19c   : > { %v6826_v47 = vcombine.low %v1033_v31, %v1033_v31  ;;  %v6827_v48 = vcombine.high %v1033_v31, %v1033_v31  ;;  %1268 = vst.msk [vmem:[#allocation2 + $0x98] sm:$0x1] %vm1234_vm5, %v6828_v37  ;;  %v6856_v54 = vcombine.low %v1547_v27, %v1557_v43  ;;  %v1565_v51 = vor.u32 %v1564_v44, %v1561_v42 }
 0x19d   : > { %v1570_v52 = vrot.slane %v1568_v45, 5  ;;  %v1572_v55 = vshrl.u32 %v1441_v32, 16  ;;  %v1578_v56 = vshll.u32 %v1470_v40, 16  ;;  %v951_v50 = vor.u32 %v949_v39, %v948_v49 }
 0x19e   : > { %1266 = vst.msk [vmem:[#allocation2 + $0x90] sm:$0xf] %vm1231_vm4, %v6826_v47  ;;  %1267 = vst.msk [vmem:[#allocation2 + $0x94] sm:$0xf] %vm1231_vm4, %v6827_v48  ;;  %7605 = vmatprep.mubr.msk.bf16.mxu0 %vm1920_vm9, %v6856_v54  ;;  %v1048_v57 = vsel %vm8923_vm6, %v948_v49, 0  ;;  %v808_v58 = vadd.f32 %v9064_v16, %v8911_v25  ;;  %v1583_v60 = vshrl.u32 %v1442_v46, 16  ;;  %v800_v21 = vadd.f32 %v8911_v25, %v9077_v26 }
 0x19f   : > { %v6825_v36 = vcombine.low %v1048_v57, %v1048_v57  ;;  %v1566_v24 = vrot.slane %v1565_v51, 4  ;;  %v1574_v1 = vrot.slane %v1572_v55, 4  ;;  %v1580_v2 = vrot.slane %v1578_v56, 5  ;;  %v1445_v47 = vld [vmem:[#allocation2 + $0x40] sm:$0xf] }
 0x1a0   : > { %v1032_v7 = vsel %vm8923_vm6, 0, %v951_v50  ;;  %v854_v8 = vmax.f32 %v808_v58, 0.0  ;;  %v1585_v29 = vrot.slane %v1583_v60, 4  ;;  %v1586_v59 = vshll.u32 %v1442_v46, 16  ;;  %v1472_v51 = vld [vmem:[#allocation2 + $0x44] sm:$0x1] }
 0x1a1   : > { %v6823_v12 = vcombine.low %v1032_v7, %v1032_v7  ;;  %v6824_v13 = vcombine.high %v1032_v7, %v1032_v7  ;;  %1265 = vst.msk [vmem:[#allocation2 + $0x8c] sm:$0x1] %vm1234_vm5, %v6825_v36  ;;  %v1571_v16 = vsel %vm9070_vm10, %v1566_v24, %v1570_v52  ;;  %v1575_v63 = vor.u32 %v1574_v1, %v1570_v52  ;;  %v1446_v7 = vld [vmem:[#allocation2 + $0x48] sm:$0xf] }
 0x1a2   : > { %v872_v5 = vpack.c.bf16 %v854_v8, %v853_v30  ;;  %v1588_v14 = vrot.slane %v1586_v59, 5  ;;  %v1592_v15 = vshll.u32 %v1443_v6, 16  ;;  %v1596_v18 = vshrl.u32 %v1443_v6, 16 }
 0x1a3   : > { %1263 = vst.msk [vmem:[#allocation2 + $0x84] sm:$0xf] %vm1231_vm4, %v6823_v12  ;;  %1264 = vst.msk [vmem:[#allocation2 + $0x88] sm:$0xf] %vm1231_vm4, %v6824_v13  ;;  %v1576_v19 = vrot.slane %v1575_v63, 4  ;;  %v1602_v20 = vshll.u32 %v1471_v9, 16  ;;  %v9147_v22 = vadd.f32 %v9088_v53, %v8911_v25  ;;  %v9156_v31 = vadd.f32 %v8911_v25, %v9090_v62 }
 0x1a4   : > { %v967_v27 = vshrl.u32 %v872_v5, 16  ;;  %v970_v28 = vshll.u32 %v872_v5, 16  ;;  %v1589_v32 = vor.u32 %v1588_v14, %v1585_v29  ;;  %v1594_v30 = vrot.slane %v1592_v15, 5  ;;  %v9177_v14 = vld [vmem:[#allocation2 + $0x4c] sm:$0xf] }
 0x1a5   : > { %v1581_v4 = vsel %vm9070_vm10, %v1576_v19, %v1580_v2  ;;  %v1598_v34 = vrot.slane %v1596_v18, 4  ;;  %v1604_v11 = vrot.slane %v1602_v20, 5  ;;  %v852_v37 = vmax.f32 %v800_v21, 0.0  ;;  %v8307_v8 = vld [vmem:[#allocation2 + $0x90] sm:$0xff]  }
 0x1a6   : > { %v6857_v38 = vcombine.low %v1571_v16, %v1581_v4  ;;  %v969_v39 = vrot.slane %v967_v27, 7  ;;  %v1590_v40 = vrot.slane %v1589_v32, 4  ;;  %v857_v26 = vmax.f32 %v9147_v22, 0.0  ;;  %v1473_v20 = vld [vmem:[#allocation2 + $0x50] sm:$0x1] }
 0x1a7   : > { %v1599_v42 = vor.u32 %v1598_v34, %v1594_v30  ;;  %v871_v53 = vpack.c.bf16 %v852_v37, %v851_v35  ;;  %v1607_v43 = vshrl.u32 %v1444_v33, 16  ;;  %v1610_v48 = vshll.u32 %v1444_v33, 16 }
 0x1a8   : > { %7606 = vmatmul.mubr.msk.bf16.gmra.mrb[36].mxu0 %vm1920_vm9, %v6857_v38  ;;  %v972_v44 = vor.u32 %v970_v28, %v969_v39  ;;  %v1051_v45 = vsel %vm8923_vm6, %v969_v39, 0  ;;  %v1595_v46 = vsel %vm9070_vm10, %v1590_v40, %v1594_v30  ;;  %v855_v52 = vmax.f32 %v9156_v31, 0.0  ;;  %v1448_v39 = vld [vmem:[#allocation2 + $0x54] sm:$0xf] }
 0x1a9   : > { %v6834_v54 = vcombine.low %v1051_v45, %v1051_v45  ;;  %v1600_v49 = vrot.slane %v1599_v42, 4  ;;  %v960_v41 = vshrl.u32 %v871_v53, 16  ;;  %v963_v35 = vshll.u32 %v871_v53, 16 }
 0x1aa   : > { %v1035_v62 = vsel %vm8923_vm6, 0, %v972_v44  ;;  %v1609_v55 = vrot.slane %v1607_v43, 4  ;;  %v1612_v56 = vrot.slane %v1610_v48, 5  ;;  %v8306_v36 = vld [vmem:[#allocation2 + $0x84] sm:$0xff]   ;;  %v1616_v2 = vshll.u32 %v1445_v47, 16 }
 0x1ab   : > { %v6832_v50 = vcombine.low %v1035_v62, %v1035_v62  ;;  %v6833_v57 = vcombine.high %v1035_v62, %v1035_v62  ;;  %1274 = vst.msk [vmem:[#allocation2 + $0xb0] sm:$0x1] %vm1234_vm5, %v6834_v54  ;;  %v1605_v58 = vsel %vm9070_vm10, %v1600_v49, %v1604_v11  ;;  %v962_v60 = vrot.slane %v960_v41, 7  ;;  %7723 = vmatprep.mubr.msk.bf16.mxu1 %vm1920_vm9, %v8306_v36  ;;  %v1449_v43 = vld [vmem:[#allocation2 + $0x58] sm:$0xf] }
 0x1ac   : > { %v6858_v24 = vcombine.low %v1595_v46, %v1605_v58  ;;  %v1613_v1 = vor.u32 %v1612_v56, %v1609_v55  ;;  %v1620_v6 = vshrl.u32 %v1445_v47, 16  ;;  %v1626_v59 = vshll.u32 %v1472_v51, 16  ;;  %7724 = vmatmul.mubr.msk.bf16.gmra.mrb[8].mxu1 %vm1920_vm9, %v8307_v8 }
 0x1ad   : > { %1272 = vst.msk [vmem:[#allocation2 + $0xa8] sm:$0xf] %vm1231_vm4, %v6832_v50  ;;  %1273 = vst.msk [vmem:[#allocation2 + $0xac] sm:$0xf] %vm1231_vm4, %v6833_v57  ;;  %v965_v9 = vor.u32 %v963_v35, %v962_v60  ;;  %v1050_v29 = vsel %vm8923_vm6, %v962_v60, 0  ;;  %v824_v12 = vadd.f32 %v9097_v3, %v8911_v25  ;;  %v1618_v63 = vrot.slane %v1616_v2, 5 }
 0x1ae   : > { %7609 = vmatprep.mubr.msk.bf16.mxu0 %vm1920_vm9, %v6858_v24  ;;  %v6831_v13 = vcombine.low %v1050_v29, %v1050_v29  ;;  %v1614_v16 = vrot.slane %v1613_v1, 4  ;;  %v1622_v5 = vrot.slane %v1620_v6, 4  ;;  %v1628_v18 = vrot.slane %v1626_v59, 5  ;;  %v1474_v50 = vld [vmem:[#allocation2 + $0x5c] sm:$0x1] }
 0x1af   : > { %v1034_v15 = vsel %vm8923_vm6, 0, %v965_v9  ;;  %v858_v19 = vmax.f32 %v824_v12, 0.0  ;;  %v1631_v21 = vshrl.u32 %v1446_v7, 16  ;;  %v1634_v33 = vshll.u32 %v1446_v7, 16  ;;  %v9198_v1 = vld [vmem:[#allocation2 + $0x60] sm:$0xf] }
 0x1b0   : > { %v6829_v3 = vcombine.low %v1034_v15, %v1034_v15  ;;  %v6830_v22 = vcombine.high %v1034_v15, %v1034_v15  ;;  %1271 = vst.msk [vmem:[#allocation2 + $0xa4] sm:$0x1] %vm1234_vm5, %v6831_v13  ;;  %v1619_v27 = vsel %vm9070_vm10, %v1614_v16, %v1618_v63  ;;  %v1623_v28 = vor.u32 %v1622_v5, %v1618_v63  ;;  %v9207_v15 = vld [vmem:[#allocation2 + $0x64] sm:$0xf] }
 0x1b1   : > { %v874_v32 = vpack.c.bf16 %v858_v19, %v857_v26  ;;  %v1633_v30 = vrot.slane %v1631_v21, 4  ;;  %v1640_v4 = vshll.u32 %v9177_v14, 16  ;;  %v1644_v11 = vshrl.u32 %v9177_v14, 16 }
 0x1b2   : > { %1269 = vst.msk [vmem:[#allocation2 + $0x9c] sm:$0xf] %vm1231_vm4, %v6829_v3  ;;  %1270 = vst.msk [vmem:[#allocation2 + $0xa0] sm:$0xf] %vm1231_vm4, %v6830_v22  ;;  %v1624_v34 = vrot.slane %v1623_v28, 4  ;;  %v1650_v37 = vshll.u32 %v1473_v20, 16  ;;  %v816_v38 = vadd.f32 %v8911_v25, %v9103_v10 }
 0x1b3   : > { %v981_v40 = vshrl.u32 %v874_v32, 16  ;;  %v984_v42 = vshll.u32 %v874_v32, 16  ;;  %v1636_v53 = vrot.slane %v1634_v33, 5  ;;  %v1642_v26 = vrot.slane %v1640_v4, 5  ;;  %v1475_v20 = vld [vmem:[#allocation2 + $0x68] sm:$0x1] }
 0x1b4   : > { %v1629_v44 = vsel %vm9070_vm10, %v1624_v34, %v1628_v18  ;;  %v1646_v45 = vrot.slane %v1644_v11, 4  ;;  %v1652_v46 = vrot.slane %v1650_v37, 5  ;;  %v856_v47 = vmax.f32 %v816_v38, 0.0  ;;  %v8309_v12 = vld [vmem:[#allocation2 + $0xa8] sm:$0xff]   ;;  %v9223_v37 = vld [vmem:[#allocation2 + $0x70] sm:$0xf] }
 0x1b5   : > { %v6859_v48 = vcombine.low %v1619_v27, %v1629_v44  ;;  %v983_v54 = vrot.slane %v981_v40, 7  ;;  %v1637_v49 = vor.u32 %v1636_v53, %v1633_v30  ;;  %v1655_v41 = vshrl.u32 %v1448_v39, 16  ;;  %v9218_v30 = vld [vmem:[#allocation2 + $0x6c] sm:$0xf]  ;;  %v1476_v44 = vld [vmem:[#allocation2 + $0x74] sm:$0x1] }
 0x1b6   : > { %v1647_v35 = vor.u32 %v1646_v45, %v1642_v26  ;;  %v873_v25 = vpack.c.bf16 %v856_v47, %v855_v52  ;;  %v1658_v10 = vshll.u32 %v1448_v39, 16  ;;  %v1664_v51 = vshll.u32 %v1449_v43, 16 }
 0x1b7   : > { %7610 = vmatmul.mubr.msk.bf16.gmra.mrb[40].mxu0 %vm1920_vm9, %v6859_v48  ;;  %v986_v62 = vor.u32 %v984_v42, %v983_v54  ;;  %v1053_v55 = vsel %vm8923_vm6, %v983_v54, 0  ;;  %v1638_v56 = vrot.slane %v1637_v49, 4  ;;  %v1657_v57 = vrot.slane %v1655_v41, 4  ;;  %v9234_v54 = vld [vmem:[#allocation2 + $0x78] sm:$0xf] }
 0x1b8   : > { %v6840_v58 = vcombine.low %v1053_v55, %v1053_v55  ;;  %v1648_v60 = vrot.slane %v1647_v35, 4  ;;  %v974_v36 = vshrl.u32 %v873_v25, 16  ;;  %v977_v24 = vshll.u32 %v873_v25, 16 }
 0x1b9   : > { %v1037_v31 = vsel %vm8923_vm6, 0, %v986_v62  ;;  %v1643_v52 = vsel %vm9070_vm10, %v1638_v56, %v1642_v26  ;;  %v1660_v2 = vrot.slane %v1658_v10, 5  ;;  %v1666_v6 = vrot.slane %v1664_v51, 5  ;;  %v8308_v7 = vld [vmem:[#allocation2 + $0x9c] sm:$0xff]  }
 0x1ba   : > { %v6838_v8 = vcombine.low %v1037_v31, %v1037_v31  ;;  %v6839_v9 = vcombine.high %v1037_v31, %v1037_v31  ;;  %1280 = vst.msk [vmem:[#allocation2 + $0xc8] sm:$0x1] %vm1234_vm5, %v6840_v58  ;;  %v1653_v29 = vsel %vm9070_vm10, %v1648_v60, %v1652_v46  ;;  %v976_v59 = vrot.slane %v974_v36, 7  ;;  %7727 = vmatprep.mubr.msk.bf16.mxu1 %vm1920_vm9, %v8308_v7  ;;  %v9237_v10 = vld [vmem:[#allocation2 + $0x7c] sm:$0xf] }
 0x1bb   : > { %v6860_v13 = vcombine.low %v1643_v52, %v1653_v29  ;;  %v1661_v16 = vor.u32 %v1660_v2, %v1657_v57  ;;  %v1668_v63 = vshrl.u32 %v1449_v43, 16  ;;  %v1674_v5 = vshll.u32 %v1474_v50, 16  ;;  %7728 = vmatmul.mubr.msk.bf16.gmra.mrb[12].mxu1 %vm1920_vm9, %v8309_v12  ;;  %v1477_v31 = vld [vmem:[#allocation2 + $0x80] sm:$0x1]  ;;  %v1456_v29 = vld [vmem:[#allocation2 + $0x84] sm:$0xf] }
 0x1bc   : > { %1278 = vst.msk [vmem:[#allocation2 + $0xc0] sm:$0xf] %vm1231_vm4, %v6838_v8  ;;  %1279 = vst.msk [vmem:[#allocation2 + $0xc4] sm:$0xf] %vm1231_vm4, %v6839_v9  ;;  %v979_v18 = vor.u32 %v977_v24, %v976_v59  ;;  %v1052_v19 = vsel %vm8923_vm6, %v976_v59, 0  ;;  %v1679_v21 = vshrl.u32 %v9198_v1, 16 }
 0x1bd   : > { %v1682_v3 = vshll.u32 %v9198_v1, 16  ;;  %7613 = vmatprep.mubr.msk.bf16.mxu0 %vm1920_vm9, %v6860_v13  ;;  %v6837_v22 = vcombine.low %v1052_v19, %v1052_v19  ;;  %v1662_v27 = vrot.slane %v1661_v16, 4  ;;  %v1670_v28 = vrot.slane %v1668_v63, 4  ;;  %v9248_v63 = vld [vmem:[#allocation2 + $0x88] sm:$0xf] }
 0x1be   : > { %v1676_v32 = vrot.slane %v1674_v5, 5  ;;  %v1036_v33 = vsel %vm8923_vm6, 0, %v979_v18  ;;  %v1681_v4 = vrot.slane %v1679_v21, 4  ;;  %v1688_v11 = vshll.u32 %v9207_v15, 16 }
 0x1bf   : > { %v1684_v34 = vrot.slane %v1682_v3, 5  ;;  %v6835_v38 = vcombine.low %v1036_v33, %v1036_v33  ;;  %v6836_v39 = vcombine.high %v1036_v33, %v1036_v33  ;;  %1277 = vst.msk [vmem:[#allocation2 + $0xbc] sm:$0x1] %vm1234_vm5, %v6837_v22  ;;  %v1667_v40 = vsel %vm9070_vm10, %v1662_v27, %v1666_v6 }
 0x1c0   : > { %v1671_v42 = vor.u32 %v1670_v28, %v1666_v6  ;;  %v1690_v26 = vrot.slane %v1688_v11, 5  ;;  %v1692_v43 = vshrl.u32 %v9207_v15, 16  ;;  %v1698_v61 = vshll.u32 %v1475_v20, 16 }
 0x1c1   : > { %v1685_v53 = vor.u32 %v1684_v34, %v1681_v4  ;;  %1275 = vst.msk [vmem:[#allocation2 + $0xb4] sm:$0xf] %vm1231_vm4, %v6835_v38  ;;  %1276 = vst.msk [vmem:[#allocation2 + $0xb8] sm:$0xf] %vm1231_vm4, %v6836_v39  ;;  %v1703_v46 = vshrl.u32 %v9218_v30, 16  ;;  %v1706_v47 = vshll.u32 %v9218_v30, 16 }
 0x1c2   : > { %v1672_v45 = vrot.slane %v1671_v42, 4  ;;  %v1712_v48 = vshll.u32 %v9223_v37, 16  ;;  %v1694_v41 = vrot.slane %v1692_v43, 4  ;;  %v1700_v35 = vrot.slane %v1698_v61, 5  ;;  %v1478_v34 = vld [vmem:[#allocation2 + $0x8c] sm:$0x1] }
 0x1c3   : > { %v1686_v49 = vrot.slane %v1685_v53, 4  ;;  %v1716_v25 = vshrl.u32 %v9223_v37, 16  ;;  %v1705_v62 = vrot.slane %v1703_v46, 4  ;;  %v1708_v55 = vrot.slane %v1706_v47, 5  ;;  %v9256_v39 = vld [vmem:[#allocation2 + $0x90] sm:$0xf] }
 0x1c4   : > { %v1677_v51 = vsel %vm9070_vm10, %v1672_v45, %v1676_v32  ;;  %v1714_v56 = vrot.slane %v1712_v48, 5  ;;  %v1695_v58 = vor.u32 %v1694_v41, %v1690_v26  ;;  %v1722_v24 = vshll.u32 %v1476_v44, 16  ;;  %v8311_v32 = vld [vmem:[#allocation2 + $0xc0] sm:$0xff]   ;;  %v9263_v46 = vld [vmem:[#allocation2 + $0x94] sm:$0xf] }
 0x1c5   : > { %v6861_v50 = vcombine.low %v1667_v40, %v1677_v51  ;;  %v1691_v57 = vsel %vm9070_vm10, %v1686_v49, %v1690_v26  ;;  %v1718_v60 = vrot.slane %v1716_v25, 4  ;;  %v1709_v36 = vor.u32 %v1708_v55, %v1705_v62  ;;  %v1479_v62 = vld [vmem:[#allocation2 + $0x98] sm:$0x1] }
 0x1c6   : > { %v1727_v52 = vshrl.u32 %v9234_v54, 16  ;;  %v1730_v2 = vshll.u32 %v9234_v54, 16  ;;  %v1696_v6 = vrot.slane %v1695_v58, 4  ;;  %v1736_v8 = vshll.u32 %v9237_v10, 16 }
 0x1c7   : > { %7614 = vmatmul.mubr.msk.bf16.gmra.mrb[44].mxu0 %vm1920_vm9, %v6861_v50  ;;  %v1719_v7 = vor.u32 %v1718_v60, %v1714_v56  ;;  %v1740_v9 = vshrl.u32 %v9237_v10, 16  ;;  %v1710_v59 = vrot.slane %v1709_v36, 4  ;;  %v1724_v12 = vrot.slane %v1722_v24, 5 }
 0x1c8   : > { %v1729_v13 = vrot.slane %v1727_v52, 4  ;;  %v1732_v16 = vrot.slane %v1730_v2, 5  ;;  %v1701_v5 = vsel %vm9070_vm10, %v1696_v6, %v1700_v35  ;;  %v1738_v19 = vrot.slane %v1736_v8, 5  ;;  %v8310_v21 = vld [vmem:[#allocation2 + $0xb4] sm:$0xff]   ;;  %v9274_v2 = vld [vmem:[#allocation2 + $0x10] sm:$0xf] }
 0x1c9   : > { %v1720_v18 = vrot.slane %v1719_v7, 4  ;;  %v1742_v20 = vrot.slane %v1740_v9, 4  ;;  %v6862_v3 = vcombine.low %v1691_v57, %v1701_v5  ;;  %v1715_v22 = vsel %vm9070_vm10, %v1710_v59, %v1714_v56  ;;  %7731 = vmatprep.mubr.msk.bf16.mxu1 %vm1920_vm9, %v8310_v21  ;;  %v3241_v56 = vld [vmem:[#allocation2 + $0xc] sm:$0xf]  ;;  %v9282_v21 = vld [vmem:[#allocation2 + $0x9c] sm:$0xf] }
 0x1ca   : > { %v1733_v27 = vor.u32 %v1732_v16, %v1729_v13  ;;  %v1746_v28 = vshll.u32 %v1477_v31, 16  ;;  %v1751_v11 = vshrl.u32 %v1456_v29, 16  ;;  %v1754_v38 = vshll.u32 %v1456_v29, 16  ;;  %7732 = vmatmul.mubr.msk.bf16.gmra.mrb[16].mxu1 %vm1920_vm9, %v8311_v32  ;;  %v9279_v16 = vld [vmem:[#allocation2 + $0x14] sm:$0x1] }
 0x1cb   : > { %v1725_v33 = vsel %vm9070_vm10, %v1720_v18, %v1724_v12  ;;  %v1743_v4 = vor.u32 %v1742_v20, %v1738_v19  ;;  %7617 = vmatprep.mubr.msk.bf16.mxu0 %vm1920_vm9, %v6862_v3  ;;  %v1760_v26 = vshll.u32 %v9248_v63, 16  ;;  %v1764_v45 = vshrl.u32 %v9248_v63, 16  ;;  %v9287_v32 = vld [vmem:[#allocation2 + $0xa0] sm:$0xf] }
 0x1cc   : > { %v6863_v40 = vcombine.low %v1715_v22, %v1725_v33  ;;  %v1734_v42 = vrot.slane %v1733_v27, 4  ;;  %v1748_v53 = vrot.slane %v1746_v28, 5  ;;  %v1753_v61 = vrot.slane %v1751_v11, 4 }
 0x1cd   : > { %v1744_v43 = vrot.slane %v1743_v4, 4  ;;  %v1756_v44 = vrot.slane %v1754_v38, 5  ;;  %v1762_v48 = vrot.slane %v1760_v26, 5  ;;  %v1770_v49 = vshll.u32 %v1478_v34, 16  ;;  %v9293_v26 = vld [vmem:[#allocation2 + $0xa8] sm:$0xf] }
 0x1ce   : > { %v1739_v47 = vsel %vm9070_vm10, %v1734_v42, %v1738_v19  ;;  %v1775_v41 = vshrl.u32 %v9256_v39, 16  ;;  %v1766_v51 = vrot.slane %v1764_v45, 4  ;;  %v1778_v55 = vshll.u32 %v9256_v39, 16 }
 0x1cf   : > { %7618 = vmatmul.mubr.msk.bf16.gmra.mrb[48].mxu0 %vm1920_vm9, %v6863_v40  ;;  %v1749_v35 = vsel %vm9070_vm10, %v1744_v43, %v1748_v53  ;;  %v1757_v25 = vor.u32 %v1756_v44, %v1753_v61  ;;  %v1772_v57 = vrot.slane %v1770_v49, 5  ;;  %v1784_v60 = vshll.u32 %v9263_v46, 16  ;;  %v1480_v44 = vld [vmem:[#allocation2 + $0xa4] sm:$0x1] }
 0x1d0   : > { %v6864_v50 = vcombine.low %v1739_v47, %v1749_v35  ;;  %v1777_v58 = vrot.slane %v1775_v41, 4  ;;  %v1767_v24 = vor.u32 %v1766_v51, %v1762_v48  ;;  %v1780_v31 = vrot.slane %v1778_v55, 5 }
 0x1d1   : > { %v1758_v36 = vrot.slane %v1757_v25, 4  ;;  %v1788_v52 = vshrl.u32 %v9263_v46, 16  ;;  %v1786_v6 = vrot.slane %v1784_v60, 5  ;;  %v1794_v7 = vshll.u32 %v1479_v62, 16  ;;  %v9301_v25 = vld [vmem:[#allocation2 + $0xac] sm:$0xf] }
 0x1d2   : > { %7621 = vmatprep.mubr.msk.bf16.mxu0 %vm1920_vm9, %v6864_v50  ;;  %v3290_v8 = vshrl.u32 %v3241_v56, 16  ;;  %v3293_v9 = vshll.u32 %v3241_v56, 16  ;;  %v1768_v59 = vrot.slane %v1767_v24, 4  ;;  %v1781_v12 = vor.u32 %v1780_v31, %v1777_v58  ;;  %v1481_v50 = vld [vmem:[#allocation2 + $0xb0] sm:$0x1] }
 0x1d3   : > { %v1763_v29 = vsel %vm9070_vm10, %v1758_v36, %v1762_v48  ;;  %v1790_v13 = vrot.slane %v1788_v52, 4  ;;  %v1796_v5 = vrot.slane %v1794_v7, 5  ;;  %v3299_v20 = vshll.u32 %v9274_v2, 16  ;;  %v9306_v31 = vld [vmem:[#allocation2 + $0x1c] sm:$0xf] }
 0x1d4   : > { %v3292_v18 = vrot.slane %v3290_v8, 4  ;;  %v3295_v19 = vrot.slane %v3293_v9, 5  ;;  %v1773_v3 = vsel %vm9070_vm10, %v1768_v59, %v1772_v57  ;;  %v1782_v22 = vrot.slane %v1781_v12, 4  ;;  %v3244_v57 = vld [vmem:[#allocation2 + $0x18] sm:$0xf] }
 0x1d5   : > { %v1791_v27 = vor.u32 %v1790_v13, %v1786_v6  ;;  %v3303_v28 = vshrl.u32 %v9274_v2, 16  ;;  %v6865_v33 = vcombine.low %v1763_v29, %v1773_v3  ;;  %v3301_v34 = vrot.slane %v3299_v20, 5 }
 0x1d6   : > { %v3296_v4 = vor.u32 %v3295_v19, %v3292_v18  ;;  %v3309_v11 = vshll.u32 %v9279_v16, 16  ;;  %v1787_v38 = vsel %vm9070_vm10, %v1782_v22, %v1786_v6  ;;  %v1799_v53 = vshrl.u32 %v9282_v21, 16 }
 0x1d7   : > { %v1792_v40 = vrot.slane %v1791_v27, 4  ;;  %v3305_v42 = vrot.slane %v3303_v28, 4  ;;  %7622 = vmatmul.mubr.msk.bf16.gmra.mrb[52].mxu0 %vm1920_vm9, %v6865_v33  ;;  %v1802_v45 = vshll.u32 %v9282_v21, 16  ;;  %v1808_v47 = vshll.u32 %v9287_v32, 16 }
 0x1d8   : > { %v3297_v43 = vrot.slane %v3296_v4, 4  ;;  %v3311_v61 = vrot.slane %v3309_v11, 5  ;;  %v1801_v41 = vrot.slane %v1799_v53, 4  ;;  %v1812_v35 = vshrl.u32 %v9287_v32, 16  ;;  %v9317_v4 = vld [vmem:[#allocation2 + $0x20] sm:$0x1] }
 0x1d9   : > { %v1797_v48 = vsel %vm9070_vm10, %v1792_v40, %v1796_v5  ;;  %v3306_v49 = vor.u32 %v3305_v42, %v3301_v34  ;;  %v1804_v55 = vrot.slane %v1802_v45, 5  ;;  %v1810_v56 = vrot.slane %v1808_v47, 5 }
 0x1da   : > { %v6866_v51 = vcombine.low %v1787_v38, %v1797_v48  ;;  %v3302_v62 = vsel %vm9070_vm10, %v3297_v43, %v3301_v34  ;;  %v1814_v60 = vrot.slane %v1812_v35, 4  ;;  %v1818_v36 = vshll.u32 %v1480_v44, 16  ;;  %v3247_v38 = vld [vmem:[#allocation2 + $0x24] sm:$0xf] }
 0x1db   : > { %v3307_v58 = vrot.slane %v3306_v49, 4  ;;  %v1823_v24 = vshrl.u32 %v9293_v26, 16  ;;  %v1805_v52 = vor.u32 %v1804_v55, %v1801_v41  ;;  %v1826_v6 = vshll.u32 %v9293_v26, 16  ;;  %v9324_v49 = vld [vmem:[#allocation2 + $0x2c] sm:$0x1] }
 0x1dc   : > { %7625 = vmatprep.mubr.msk.bf16.mxu0 %vm1920_vm9, %v6866_v51  ;;  %v1832_v7 = vshll.u32 %v9301_v25, 16  ;;  %v1836_v8 = vshrl.u32 %v9301_v25, 16  ;;  %v1815_v29 = vor.u32 %v1814_v60, %v1810_v56  ;;  %v1820_v59 = vrot.slane %v1818_v36, 5  ;;  %v9326_v41 = vld [vmem:[#allocation2 + $0xb4] sm:$0xf] }
 0x1dd   : > { %v3312_v9 = vsel %vm9070_vm10, %v3307_v58, %v3311_v61  ;;  %v1825_v12 = vrot.slane %v1823_v24, 4  ;;  %v1806_v5 = vrot.slane %v1805_v52, 4  ;;  %v1828_v18 = vrot.slane %v1826_v6, 5  ;;  %v9322_v61 = vld [vmem:[#allocation2 + $0x28] sm:$0xf] }
 0x1de   : > { %v7001_v13 = vcombine.low %v3302_v62, %v3312_v9  ;;  %v1834_v19 = vrot.slane %v1832_v7, 5  ;;  %v1816_v20 = vrot.slane %v1815_v29, 4  ;;  %v1838_v3 = vrot.slane %v1836_v8, 4 }
 0x1df   : > { %v1842_v22 = vshll.u32 %v1481_v50, 16  ;;  %v3314_v27 = vshrl.u32 %v3244_v57, 16  ;;  %v1811_v28 = vsel %vm9070_vm10, %v1806_v5, %v1810_v56  ;;  %v1829_v33 = vor.u32 %v1828_v18, %v1825_v12  ;;  %v9330_v56 = vld [vmem:[#allocation2 + $0xb8] sm:$0xf] }
 0x1e0   : > { %7737 = vmatprep.mubr.msk.bf16.mxu1 %vm1920_vm9, %v7001_v13  ;;  %v3317_v34 = vshll.u32 %v3244_v57, 16  ;;  %v3323_v11 = vshll.u32 %v9306_v31, 16  ;;  %v1821_v40 = vsel %vm9070_vm10, %v1816_v20, %v1820_v59  ;;  %v1839_v42 = vor.u32 %v1838_v3, %v1834_v19  ;;  %v1482_v20 = vld [vmem:[#allocation2 + $0xbc] sm:$0x1] }
 0x1e1   : > { %v1844_v53 = vrot.slane %v1842_v22, 5  ;;  %v3316_v43 = vrot.slane %v3314_v27, 4  ;;  %v6867_v44 = vcombine.low %v1811_v28, %v1821_v40  ;;  %v1830_v45 = vrot.slane %v1829_v33, 4  ;;  %v3250_v27 = vld [vmem:[#allocation2 + $0x30] sm:$0xf] }
 0x1e2   : > { %v3319_v47 = vrot.slane %v3317_v34, 5  ;;  %v3325_v48 = vrot.slane %v3323_v11, 5  ;;  %v1840_v35 = vrot.slane %v1839_v42, 4  ;;  %v3327_v51 = vshrl.u32 %v9306_v31, 16  ;;  %v9351_v40 = vld [vmem:[%s10735_s5 + $0x4] sm:$0x3] }
 0x1e3   : > { %v3333_v62 = vshll.u32 %v9317_v4, 16  ;;  %v3338_v55 = vshrl.u32 %v3247_v38, 16  ;;  %7626 = vmatmul.mubr.msk.bf16.gmra.mrb[56].mxu0 %vm1920_vm9, %v6867_v44  ;;  %v1835_v50 = vsel %vm9070_vm10, %v1830_v45, %v1834_v19  ;;  %v3341_v58 = vshll.u32 %v3247_v38, 16  ;;  %v9346_v38 = vld [vmem:[#allocation2 + $0x34] sm:$0xf] }
 0x1e4   : > { %v3320_v57 = vor.u32 %v3319_v47, %v3316_v43  ;;  %v3347_v60 = vshll.u32 %v9322_v61, 16  ;;  %v1845_v36 = vsel %vm9070_vm10, %v1840_v35, %v1844_v53  ;;  %v3329_v24 = vrot.slane %v3327_v51, 4  ;;  %v9354_v45 = vld [vmem:[#allocation2 + $0x38] sm:$0x1]  ;;  %v8345_v51 = vld [vmem:[%s10735_s5] sm:$0x3] }
 0x1e5   : > { %v3335_v52 = vrot.slane %v3333_v62, 5  ;;  %v3340_v6 = vrot.slane %v3338_v55, 4  ;;  %v6868_v7 = vcombine.low %v1835_v50, %v1845_v36  ;;  %v3343_v9 = vrot.slane %v3341_v58, 5  ;;  %v9365_v55 = vld [vmem:[%s10735_s5 + $0xc] sm:$0x3] }
 0x1e6   : > { %v3321_v8 = vrot.slane %v3320_v57, 4  ;;  %v3349_v29 = vrot.slane %v3347_v60, 5  ;;  %v3330_v59 = vor.u32 %v3329_v24, %v3325_v48  ;;  %v3351_v12 = vshrl.u32 %v9322_v61, 16  ;;  %v3253_v36 = vld [vmem:[#allocation2 + $0x3c] sm:$0xf] }
 0x1e7   : > { %v3357_v13 = vshll.u32 %v9324_v49, 16  ;;  %v1847_v5 = vshrl.u32 %v9326_v41, 16  ;;  %7629 = vmatprep.mubr.msk.bf16.mxu0 %vm1920_vm9, %v6868_v7  ;;  %v3344_v19 = vor.u32 %v3343_v9, %v3340_v6  ;;  %v1850_v3 = vshll.u32 %v9326_v41, 16 }
 0x1e8   : > { %v3326_v18 = vsel %vm9070_vm10, %v3321_v8, %v3325_v48  ;;  %v1856_v22 = vshll.u32 %v9330_v56, 16  ;;  %v3331_v28 = vrot.slane %v3330_v59, 4  ;;  %v3353_v33 = vrot.slane %v3351_v12, 4  ;;  %v9369_v8 = vld [vmem:[#allocation2 + $0x40] sm:$0xf] }
 0x1e9   : > { %v3359_v34 = vrot.slane %v3357_v13, 5  ;;  %v1849_v11 = vrot.slane %v1847_v5, 4  ;;  %v3345_v42 = vrot.slane %v3344_v19, 4  ;;  %v1852_v53 = vrot.slane %v1850_v3, 5 }
 0x1ea   : > { %v1858_v43 = vrot.slane %v1856_v22, 5  ;;  %v1860_v44 = vshrl.u32 %v9330_v56, 16  ;;  %v3336_v47 = vsel %vm9070_vm10, %v3331_v28, %v3335_v52  ;;  %v3354_v48 = vor.u32 %v3353_v33, %v3349_v29 }
 0x1eb   : > { %v1866_v35 = vshll.u32 %v1482_v20, 16  ;;  %v2263_v62 = vsel %vm1969_vm1, %v8345_v51, 0  ;;  %v7002_v50 = vcombine.low %v3326_v18, %v3336_v47  ;;  %v3350_v57 = vsel %vm9070_vm10, %v3345_v42, %v3349_v29  ;;  %v3256_v47 = vld [vmem:[#allocation2 + $0x48] sm:$0xf] }
 0x1ec   : > { %v1853_v58 = vor.u32 %v1852_v53, %v1849_v11  ;;  %v1862_v60 = vrot.slane %v1860_v44, 4  ;;  %7634 = vmatpush3.bf16.msra.mxu0 %v2263_v62  ;;  %v3355_v24 = vrot.slane %v3354_v48, 4  ;;  %v3362_v6 = vshrl.u32 %v3250_v27, 16  ;;  %v9391_v48 = vld [vmem:[#allocation2 + $0x4c] sm:$0xf] }
 0x1ed   : > { %v1868_v52 = vrot.slane %v1866_v35, 5  ;;  %v3365_v7 = vshll.u32 %v3250_v27, 16  ;;  %8199 = vmatprep.subr.msk.bf16.mxu0 %vm1969_vm1, %v9351_v40  ;;  %7738 = vmatmul.mubr.msk.bf16.vlgmr.msra.gmra.mrb[20].mxu1 %vm1920_vm9, %v7002_v50  ;;  %v3371_v12 = vshll.u32 %v9346_v38, 16  ;;  %v3375_v29 = vshrl.u32 %v9346_v38, 16 }
 0x1ee   : > { %v1854_v9 = vrot.slane %v1853_v58, 4  ;;  %v1863_v59 = vor.u32 %v1862_v60, %v1858_v43  ;;  %7770 = vmatpush3.bf16.msra.mxu1 %v8978_v0  ;;  %v3360_v13 = vsel %vm9070_vm10, %v3355_v24, %v3359_v34  ;;  %v3364_v5 = vrot.slane %v3362_v6, 4  ;;  %v9384_v0 = vld [vmem:[#allocation2 + $0x44] sm:$0x1]  ;;  %v9394_v6 = vld [vmem:[#allocation2 + $0x50] sm:$0x1] }
 0x1ef   : > { %v3367_v18 = vrot.slane %v3365_v7, 5  ;;  %v3381_v19 = vshll.u32 %v9354_v45, 16  ;;  %v7003_v20 = vcombine.low %v3350_v57, %v3360_v13  ;;  %v3373_v27 = vrot.slane %v3371_v12, 5  ;;  %8204 = vmatprep.subr.msk.bf16.mxu1 %vm1969_vm1, %v9365_v55  ;;  %v8346_v7 = vld [vmem:[#allocation2] sm:$0xf] }
 0x1f0   : > { %v1859_v3 = vsel %vm9070_vm10, %v1854_v9, %v1858_v43  ;;  %v1864_v22 = vrot.slane %v1863_v59, 4  ;;  %v3377_v33 = vrot.slane %v3375_v29, 4  ;;  %v3386_v42 = vshrl.u32 %v3253_v36, 16  ;;  %v9399_v9 = vld [vmem:[#allocation2 + $0x4] sm:$0xf] }
 0x1f1   : > { %v3368_v28 = vor.u32 %v3367_v18, %v3364_v5  ;;  %v3383_v11 = vrot.slane %v3381_v19, 5  ;;  %7741 = vmatprep.mubr.msk.bf16.mxu1 %vm1920_vm9, %v7003_v20  ;;  %v3389_v53 = vshll.u32 %v3253_v36, 16  ;;  %v3395_v44 = vshll.u32 %v9369_v8, 16  ;;  %v8348_v12 = vld [vmem:[#allocation2 + $0xc] sm:$0xf] }
 0x1f2   : > { %v1869_v34 = vsel %vm9070_vm10, %v1864_v22, %v1868_v52  ;;  %v3399_v43 = vshrl.u32 %v9369_v8, 16  ;;  %v3378_v62 = vor.u32 %v3377_v33, %v3373_v27  ;;  %v3388_v50 = vrot.slane %v3386_v42, 4  ;;  %v9402_v29 = vld [vmem:[#allocation2 + $0x10] sm:$0xf]  ;;  %v3259_v5 = vld [vmem:[#allocation2 + $0x54] sm:$0xf] }
 0x1f3   : > { %v6869_v35 = vcombine.low %v1859_v3, %v1869_v34  ;;  %v3369_v51 = vrot.slane %v3368_v28, 4  ;;  %v3391_v57 = vrot.slane %v3389_v53, 5  ;;  %v3397_v58 = vrot.slane %v3395_v44, 5  ;;  %v8350_v3 = vld [vmem:[#allocation2 + $0x18] sm:$0xf] }
 0x1f4   : > { %v3401_v60 = vrot.slane %v3399_v43, 4  ;;  %v3405_v24 = vshll.u32 %v9384_v0, 16  ;;  %v3379_v52 = vrot.slane %v3378_v62, 4  ;;  %v6886_v59 = vcombine.low %v8346_v7, %v9399_v9  ;;  %v9405_v22 = vld [vmem:[#allocation2 + $0x1c] sm:$0xf] }
 0x1f5   : > { %7630 = vmatmul.mubr.msk.bf16.gmra.mrb[60].mxu0 %vm1920_vm9, %v6869_v35  ;;  %v3374_v36 = vsel %vm9070_vm10, %v3369_v51, %v3373_v27  ;;  %v6887_v13 = vcombine.low %v8348_v12, %v9402_v29  ;;  %v3392_v18 = vor.u32 %v3391_v57, %v3388_v50  ;;  %v6888_v27 = vcombine.low %v8350_v3, %v9405_v22  ;;  %v9412_v53 = vld [vmem:[#allocation2 + $0x58] sm:$0xf]  ;;  %v9415_v62 = vld [vmem:[#allocation2 + $0x5c] sm:$0x1]  ;;  %v3262_v7 = vld [vmem:[#allocation2 + $0x60] sm:$0xf] }
 0x1f6   : > { %v3402_v19 = vor.u32 %v3401_v60, %v3397_v58  ;;  %v3407_v20 = vrot.slane %v3405_v24, 5  ;;  %v3384_v28 = vsel %vm9070_vm10, %v3379_v52, %v3383_v11  ;;  %7635 = vmatprep.mubr.msk.bf16.mxu0 %vm1920_vm9, %v6886_v59  ;;  %v3410_v33 = vshrl.u32 %v3256_v47, 16  ;;  %v9423_v3 = vld [vmem:[#allocation2 + $0x64] sm:$0xf] }
 0x1f7   : > { %v3413_v42 = vshll.u32 %v3256_v47, 16  ;;  %v3419_v34 = vshll.u32 %v9391_v48, 16  ;;  %v7004_v44 = vcombine.low %v3374_v36, %v3384_v28  ;;  %v3393_v43 = vrot.slane %v3392_v18, 4 }
 0x1f8   : > { %v3403_v35 = vrot.slane %v3402_v19, 4  ;;  %v3423_v51 = vshrl.u32 %v9391_v48, 16  ;;  %v3412_v50 = vrot.slane %v3410_v33, 4  ;;  %v3429_v11 = vshll.u32 %v9394_v6, 16 }
 0x1f9   : > { %v3415_v57 = vrot.slane %v3413_v42, 5  ;;  %v3421_v60 = vrot.slane %v3419_v34, 5  ;;  %7742 = vmatmul.mubr.msk.bf16.gmra.mrb[24].mxu1 %vm1920_vm9, %v7004_v44  ;;  %v3398_v47 = vsel %vm9070_vm10, %v3393_v43, %v3397_v58  ;;  %v3434_v52 = vshrl.u32 %v3259_v5, 16  ;;  %v8352_v43 = vld [vmem:[#allocation2 + $0x24] sm:$0xf] }
 0x1fa   : > { %v3408_v24 = vsel %vm9070_vm10, %v3403_v35, %v3407_v20  ;;  %v3425_v36 = vrot.slane %v3423_v51, 4  ;;  %v3431_v18 = vrot.slane %v3429_v11, 5  ;;  %v3437_v19 = vshll.u32 %v3259_v5, 16  ;;  %v9430_v35 = vld [vmem:[#allocation2 + $0x28] sm:$0xf] }
 0x1fb   : > { %v7005_v59 = vcombine.low %v3398_v47, %v3408_v24  ;;  %v3416_v12 = vor.u32 %v3415_v57, %v3412_v50  ;;  %v3436_v33 = vrot.slane %v3434_v52, 4  ;;  %v3443_v42 = vshll.u32 %v9412_v53, 16  ;;  %10812 = vst [vmem:[#allocation23_spill] sm:$0xff] %v9430_v35  ;;  %v8354_v11 = vld [vmem:[#allocation2 + $0x30] sm:$0xf] }
 0x1fc   : > { %v3426_v28 = vor.u32 %v3425_v36, %v3421_v60  ;;  %v3447_v34 = vshrl.u32 %v9412_v53, 16  ;;  %v3439_v20 = vrot.slane %v3437_v19, 5  ;;  %v3453_v44 = vshll.u32 %v9415_v62, 16  ;;  %v9434_v47 = vld [vmem:[#allocation2 + $0x34] sm:$0xf] }
 0x1fd   : > { %7745 = vmatprep.mubr.msk.bf16.mxu1 %vm1920_vm9, %v7005_v59  ;;  %7636 = vmatmul.mubr.msk.bf16.vlgmr.msra.gmra.mrb[32].mxu0 %vm1920_vm9, %v6887_v13  ;;  %v3417_v58 = vrot.slane %v3416_v12, 4  ;;  %v6889_v5 = vcombine.low %v8352_v43, %v9430_v35  ;;  %v3445_v50 = vrot.slane %v3443_v42, 5  ;;  %10813 = vst [vmem:[#allocation24_spill] sm:$0xff] %v9434_v47  ;;  %v6890_v24 = vcombine.low %v8354_v11, %v9434_v47  ;;  %v9439_v59 = vld [vmem:[#allocation2 + $0x68] sm:$0x1] }
 0x1fe   : > { %7639 = vmatprep.mubr.msk.bf16.mxu0 %vm1920_vm9, %v6888_v27  ;;  %v3427_v51 = vrot.slane %v3426_v28, 4  ;;  %v3449_v57 = vrot.slane %v3447_v34, 4  ;;  %v3440_v36 = vor.u32 %v3439_v20, %v3436_v33  ;;  %v3455_v52 = vrot.slane %v3453_v44, 5  ;;  %10814 = vst [vmem:[#allocation25_spill] sm:$0xff] %v9439_v59  ;;  %v3265_v34 = vld [vmem:[#allocation2 + $0x6c] sm:$0xf] }
 0x1ff   : > { %v3422_v13 = vsel %vm9070_vm10, %v3417_v58, %v3421_v60  ;;  %v3458_v12 = vshrl.u32 %v3262_v7, 16  ;;  %v3461_v28 = vshll.u32 %v3262_v7, 16  ;;  %v3467_v42 = vshll.u32 %v9423_v3, 16  ;;  %v9445_v47 = vld [vmem:[#allocation2 + $0x70] sm:$0xf] }
 0x200   : > { %v3432_v19 = vsel %vm9070_vm10, %v3427_v51, %v3431_v18  ;;  %v3450_v27 = vor.u32 %v3449_v57, %v3445_v50  ;;  %v3441_v23 = vrot.slane %v3440_v36, 4  ;;  %v3471_v11 = vshrl.u32 %v9423_v3, 16  ;;  %10815 = vst [vmem:[#allocation26_spill] sm:$0xff] %v9445_v47  ;;  %v9451_v44 = vld [vmem:[#allocation2 + $0x74] sm:$0x1] }
 0x201   : > { %v7006_v43 = vcombine.low %v3422_v13, %v3432_v19  ;;  %v3460_v35 = vrot.slane %v3458_v12, 4  ;;  %v3463_v33 = vrot.slane %v3461_v28, 5  ;;  %v3469_v58 = vrot.slane %v3467_v42, 5  ;;  %10816 = vst [vmem:[#allocation27_spill] sm:$0xff] %v9451_v44 }
 0x202   : > { %v3451_v60 = vrot.slane %v3450_v27, 4  ;;  %v3477_v20 = vshll.u32 %v9439_v59, 16  ;;  %v3446_v7 = vsel %vm9070_vm10, %v3441_v23, %v3445_v50  ;;  %v3473_v18 = vrot.slane %v3471_v11, 4  ;;  %v3268_v59 = vld [vmem:[#allocation2 + $0x78] sm:$0xf] }
 0x203   : > { %7746 = vmatmul.mubr.msk.bf16.gmra.mrb[28].mxu1 %vm1920_vm9, %v7006_v43  ;;  %v3482_v51 = vshrl.u32 %v3265_v34, 16  ;;  %v3485_v57 = vshll.u32 %v3265_v34, 16  ;;  %v3464_v36 = vor.u32 %v3463_v33, %v3460_v35  ;;  %v3491_v19 = vshll.u32 %v9445_v47, 16  ;;  %v8356_v33 = vld [vmem:[#allocation2 + $0x3c] sm:$0xf] }
 0x204   : > { %v3456_v13 = vsel %vm9070_vm10, %v3451_v60, %v3455_v52  ;;  %v3479_v12 = vrot.slane %v3477_v20, 5  ;;  %v3474_v28 = vor.u32 %v3473_v18, %v3469_v58  ;;  %v3495_v34 = vshrl.u32 %v9445_v47, 16  ;;  %v9460_v52 = vld [vmem:[#allocation2 + $0x7c] sm:$0xf]  ;;  %v9490_v47 = vld [vmem:[#allocation2 + $0x58] sm:$0xf] }
 0x205   : > { %v7007_v27 = vcombine.low %v3446_v7, %v3456_v13  ;;  %7640 = vmatmul.mubr.msk.bf16.gmra.mrb[36].mxu0 %vm1920_vm9, %v6889_v5  ;;  %v3484_v42 = vrot.slane %v3482_v51, 4  ;;  %v3487_v43 = vrot.slane %v3485_v57, 5  ;;  %v3465_v23 = vrot.slane %v3464_v36, 4  ;;  %10817 = vst [vmem:[#allocation28_spill] sm:$0xff] %v9460_v52  ;;  %v9463_v5 = vld [vmem:[#allocation2 + $0x40] sm:$0xf] }
 0x206   : > { %7643 = vmatprep.mubr.msk.bf16.mxu0 %vm1920_vm9, %v6890_v24  ;;  %v3493_v50 = vrot.slane %v3491_v19, 5  ;;  %v3501_v11 = vshll.u32 %v9451_v44, 16  ;;  %v3475_v35 = vrot.slane %v3474_v28, 4  ;;  %10818 = vst [vmem:[#allocation29_spill] sm:$0xff] %v9463_v5  ;;  %v6891_v20 = vcombine.low %v8356_v33, %v9463_v5  ;;  %v8358_v7 = vld [vmem:[#allocation2 + $0x48] sm:$0xf] }
 0x207   : > { %7749 = vmatprep.mubr.msk.bf16.mxu1 %vm1920_vm9, %v7007_v27  ;;  %v3488_v60 = vor.u32 %v3487_v43, %v3484_v42  ;;  %v6892_v24 = vcombine.low %v8358_v7, %v9177_v14  ;;  %v3470_v18 = vsel %vm9070_vm10, %v3465_v23, %v3469_v58  ;;  %v3497_v51 = vrot.slane %v3495_v34, 4  ;;  %v9469_v13 = vld [vmem:[#allocation2 + $0x80] sm:$0x1]  ;;  %v3271_v43 = vld [vmem:[#allocation2 + $0x84] sm:$0xf] }
 0x208   : > { %v3503_v57 = vrot.slane %v3501_v11, 5  ;;  %10819 = vst [vmem:[#allocation30_spill] sm:$0xff] %v9469_v13  ;;  %v3506_v36 = vshrl.u32 %v3268_v59, 16  ;;  %v3480_v19 = vsel %vm9070_vm10, %v3475_v35, %v3479_v12  ;;  %v3509_v28 = vshll.u32 %v3268_v59, 16  ;;  %v9475_v7 = vld [vmem:[#allocation2 + $0x88] sm:$0xf] }
 0x209   : > { %v3489_v27 = vrot.slane %v3488_v60, 4  ;;  %v3515_v42 = vshll.u32 %v9460_v52, 16  ;;  %v7008_v33 = vcombine.low %v3470_v18, %v3480_v19  ;;  %v3498_v5 = vor.u32 %v3497_v51, %v3493_v50  ;;  %10820 = vst [vmem:[#allocation31_spill] sm:$0xff] %v9475_v7 }
 0x20a   : > { %v3508_v44 = vrot.slane %v3506_v36, 4  ;;  %v3519_v14 = vshrl.u32 %v9460_v52, 16  ;;  %v3511_v23 = vrot.slane %v3509_v28, 5  ;;  %v3525_v11 = vshll.u32 %v9469_v13, 16  ;;  %v9482_v36 = vld [vmem:[#allocation2 + $0x8c] sm:$0x1] }
 0x20b   : > { %v3494_v58 = vsel %vm9070_vm10, %v3489_v27, %v3493_v50  ;;  %v3517_v34 = vrot.slane %v3515_v42, 5  ;;  %7750 = vmatmul.mubr.msk.bf16.gmra.mrb[32].mxu1 %vm1920_vm9, %v7008_v33  ;;  %v3499_v59 = vrot.slane %v3498_v5, 4  ;;  %v3530_v35 = vshrl.u32 %v3271_v43, 16  ;;  %v3274_v33 = vld [vmem:[#allocation2 + $0x90] sm:$0xf] }
 0x20c   : > { %v3521_v12 = vrot.slane %v3519_v14, 4  ;;  %v3533_v60 = vshll.u32 %v3271_v43, 16  ;;  %v3512_v18 = vor.u32 %v3511_v23, %v3508_v44  ;;  %v3527_v51 = vrot.slane %v3525_v11, 5  ;;  %v8359_v52 = vld [vmem:[#allocation2 + $0x54] sm:$0xf] }
 0x20d   : > { %7644 = vmatmul.mubr.msk.bf16.gmra.mrb[40].mxu0 %vm1920_vm9, %v6891_v20  ;;  %v3539_v19 = vshll.u32 %v9475_v7, 16  ;;  %v3543_v50 = vshrl.u32 %v9475_v7, 16  ;;  %v3504_v27 = vsel %vm9070_vm10, %v3499_v59, %v3503_v57  ;;  %v3532_v5 = vrot.slane %v3530_v35, 4  ;;  %v9493_v57 = vld [vmem:[#allocation2 + $0x94] sm:$0xf] }
 0x20e   : > { %7647 = vmatprep.mubr.msk.bf16.mxu0 %vm1920_vm9, %v6892_v24  ;;  %v3522_v28 = vor.u32 %v3521_v12, %v3517_v34  ;;  %v3535_v42 = vrot.slane %v3533_v60, 5  ;;  %v7009_v43 = vcombine.low %v3494_v58, %v3504_v27  ;;  %v3513_v14 = vrot.slane %v3512_v18, 4  ;;  %v9500_v12 = vld [vmem:[#allocation2 + $0x98] sm:$0x1] }
 0x20f   : > { %v3541_v20 = vrot.slane %v3539_v19, 5  ;;  %v3545_v44 = vrot.slane %v3543_v50, 4  ;;  %v3549_v13 = vshll.u32 %v9482_v36, 16  ;;  %v6893_v7 = vcombine.low %v8359_v52, %v9490_v47  ;;  %v3277_v50 = vld [vmem:[#allocation2 + $0x9c] sm:$0xf] }
 0x210   : > { %v3523_v23 = vrot.slane %v3522_v28, 4  ;;  %v3536_v11 = vor.u32 %v3535_v42, %v3532_v5  ;;  %7753 = vmatprep.mubr.msk.bf16.mxu1 %vm1920_vm9, %v7009_v43  ;;  %v3518_v24 = vsel %vm9070_vm10, %v3513_v14, %v3517_v34  ;;  %v6894_v59 = vcombine.low %v9198_v1, %v9207_v15  ;;  %v9509_v14 = vld [vmem:[#allocation2 + $0xa0] sm:$0xf] }
 0x211   : > { %v3546_v58 = vor.u32 %v3545_v44, %v3541_v20  ;;  %v3554_v35 = vshrl.u32 %v3274_v33, 16  ;;  %v3551_v19 = vrot.slane %v3549_v13, 5  ;;  %v3557_v52 = vshll.u32 %v3274_v33, 16  ;;  %v9515_v33 = vld [vmem:[#allocation2 + $0xa4] sm:$0x1] }
 0x212   : > { %v3528_v60 = vsel %vm9070_vm10, %v3523_v23, %v3527_v51  ;;  %v3537_v18 = vrot.slane %v3536_v11, 4  ;;  %v3563_v42 = vshll.u32 %v9493_v57, 16  ;;  %v3567_v1 = vshrl.u32 %v9493_v57, 16 }
 0x213   : > { %v7010_v27 = vcombine.low %v3518_v24, %v3528_v60  ;;  %v3547_v28 = vrot.slane %v3546_v58, 4  ;;  %v3556_v5 = vrot.slane %v3554_v35, 4  ;;  %v3559_v43 = vrot.slane %v3557_v52, 5 }
 0x214   : > { %v3542_v34 = vsel %vm9070_vm10, %v3537_v18, %v3541_v20  ;;  %v3573_v15 = vshll.u32 %v9500_v12, 16  ;;  %v3565_v51 = vrot.slane %v3563_v42, 5  ;;  %v3578_v44 = vshrl.u32 %v3277_v50, 16 }
 0x215   : > { %7754 = vmatmul.mubr.msk.bf16.gmra.mrb[4].mxu1 %vm1920_vm9, %v7010_v27  ;;  %v3552_v13 = vsel %vm9070_vm10, %v3547_v28, %v3551_v19  ;;  %7648 = vmatmul.mubr.msk.bf16.gmra.mrb[44].mxu0 %vm1920_vm9, %v6893_v7  ;;  %v3581_v23 = vshll.u32 %v3277_v50, 16  ;;  %v3560_v11 = vor.u32 %v3559_v43, %v3556_v5  ;;  %v3569_v24 = vrot.slane %v3567_v1, 4  ;;  %v3280_v19 = vld [vmem:[#allocation2 + $0xa8] sm:$0xf]  ;;  %v9528_v1 = vld [vmem:[#allocation2 + $0xb0] sm:$0x1] }
 0x216   : > { %v7011_v20 = vcombine.low %v3542_v34, %v3552_v13  ;;  %7651 = vmatprep.mubr.msk.bf16.mxu0 %vm1920_vm9, %v6894_v59  ;;  %v3575_v58 = vrot.slane %v3573_v15, 5  ;;  %v3580_v35 = vrot.slane %v3578_v44, 4  ;;  %v3587_v18 = vshll.u32 %v9509_v14, 16  ;;  %v9524_v59 = vld [vmem:[#allocation2 + $0xac] sm:$0xf]  ;;  %10821 = vst [vmem:[#allocation32_spill] sm:$0xff] %v9528_v1 }
 0x217   : > { %v3583_v60 = vrot.slane %v3581_v23, 5  ;;  %v3591_v52 = vshrl.u32 %v9509_v14, 16  ;;  %v3561_v7 = vrot.slane %v3560_v11, 4  ;;  %v3570_v27 = vor.u32 %v3569_v24, %v3565_v51 }
 0x218   : > { %7757 = vmatprep.mubr.msk.bf16.mxu1 %vm1920_vm9, %v7011_v20  ;;  %v3597_v28 = vshll.u32 %v9515_v33, 16  ;;  %v6895_v50 = vcombine.low %v9218_v30, %v9223_v37  ;;  %v3589_v42 = vrot.slane %v3587_v18, 5  ;;  %v6896_v43 = vcombine.low %v9234_v54, %v9237_v10  ;;  %v3283_v37 = vld [vmem:[#allocation2 + $0xb4] sm:$0xf]  ;;  %v9537_v18 = vld [vmem:[#allocation2 + $0xb8] sm:$0xf] }
 0x219   : > { %v3584_v5 = vor.u32 %v3583_v60, %v3580_v35  ;;  %v3593_v34 = vrot.slane %v3591_v52, 4  ;;  %v3566_v15 = vsel %vm9070_vm10, %v3561_v7, %v3565_v51  ;;  %v3571_v13 = vrot.slane %v3570_v27, 4 }
 0x21a   : > { %v3599_v44 = vrot.slane %v3597_v28, 5  ;;  %v3602_v23 = vshrl.u32 %v3280_v19, 16  ;;  %v3605_v24 = vshll.u32 %v3280_v19, 16  ;;  %v3611_v30 = vshll.u32 %v9524_v59, 16 }
 0x21b   : > { %v3585_v20 = vrot.slane %v3584_v5, 4  ;;  %v3594_v11 = vor.u32 %v3593_v34, %v3589_v42  ;;  %v3576_v35 = vsel %vm9070_vm10, %v3571_v13, %v3575_v58  ;;  %v3615_v54 = vshrl.u32 %v9524_v59, 16  ;;  %v9543_v5 = vld [vmem:[#allocation2 + $0xbc] sm:$0x1] }
 0x21c   : > { %v3604_v60 = vrot.slane %v3602_v23, 4  ;;  %v3621_v10 = vshll.u32 %v9528_v1, 16  ;;  %v7012_v51 = vcombine.low %v3566_v15, %v3576_v35  ;;  %v3607_v19 = vrot.slane %v3605_v24, 5  ;;  %v3286_v24 = vld [vmem:[#allocation2 + $0xc0] sm:$0xf] }
 0x21d   : > { %v3590_v52 = vsel %vm9070_vm10, %v3585_v20, %v3589_v42  ;;  %v3595_v7 = vrot.slane %v3594_v11, 4  ;;  %7652 = vmatmul.mubr.msk.bf16.gmra.mrb[48].mxu0 %vm1920_vm9, %v6895_v50  ;;  %v3613_v27 = vrot.slane %v3611_v30, 5  ;;  %v3617_v28 = vrot.slane %v3615_v54, 4  ;;  %v9551_v1 = vld [vmem:[#allocation2 + $0xc4] sm:$0xf] }
 0x21e   : > { %7655 = vmatprep.mubr.msk.bf16.mxu0 %vm1920_vm9, %v6896_v43  ;;  %v3623_v58 = vrot.slane %v3621_v10, 5  ;;  %v3626_v34 = vshrl.u32 %v3283_v37, 16  ;;  %7758 = vmatmul.mubr.msk.bf16.gmra.mrb[8].mxu1 %vm1920_vm9, %v7012_v51  ;;  %v3608_v13 = vor.u32 %v3607_v19, %v3604_v60  ;;  %v3629_v23 = vshll.u32 %v3283_v37, 16  ;;  %v8361_v37 = vld [vmem:[#allocation2 + $0x84] sm:$0xf] }
 0x21f   : > { %v3600_v15 = vsel %vm9070_vm10, %v3595_v7, %v3599_v44  ;;  %v3635_v42 = vshll.u32 %v9537_v18, 16  ;;  %v3618_v50 = vor.u32 %v3617_v28, %v3613_v27  ;;  %v3639_v43 = vshrl.u32 %v9537_v18, 16 }
 0x220   : > { %v7013_v20 = vcombine.low %v3590_v52, %v3600_v15  ;;  %v3628_v11 = vrot.slane %v3626_v34, 4  ;;  %v3609_v30 = vrot.slane %v3608_v13, 4  ;;  %v3631_v35 = vrot.slane %v3629_v23, 5  ;;  %v9559_v34 = vld [vmem:[#allocation2 + $0xc8] sm:$0x1] }
 0x221   : > { %v3637_v54 = vrot.slane %v3635_v42, 5  ;;  %v3645_v10 = vshll.u32 %v9543_v5, 16  ;;  %v3619_v44 = vrot.slane %v3618_v50, 4  ;;  %v3641_v60 = vrot.slane %v3639_v43, 4 }
 0x222   : > { %7761 = vmatprep.mubr.msk.bf16.mxu1 %vm1920_vm9, %v7013_v20  ;;  %v6897_v51 = vcombine.low %v8361_v37, %v9248_v63  ;;  %v6898_v52 = vcombine.low %v9256_v39, %v9263_v46  ;;  %v3614_v7 = vsel %vm9070_vm10, %v3609_v30, %v3613_v27  ;;  %v3632_v19 = vor.u32 %v3631_v35, %v3628_v11  ;;  %v3967_v27 = vld [vmem:[#allocation2 + $0xc] sm:$0xe] }
 0x223   : > { %v3647_v28 = vrot.slane %v3645_v10, 5  ;;  %v3650_v15 = vshrl.u32 %v3286_v24, 16  ;;  %v3624_v13 = vsel %vm9070_vm10, %v3619_v44, %v3623_v58  ;;  %v3642_v23 = vor.u32 %v3641_v60, %v3637_v54 }
 0x224   : > { %v3653_v42 = vshll.u32 %v3286_v24, 16  ;;  %v3659_v20 = vshll.u32 %v9551_v1, 16  ;;  %v7014_v50 = vcombine.low %v3614_v7, %v3624_v13  ;;  %v3633_v63 = vrot.slane %v3632_v19, 4  ;;  %v3968_v19 = vld [vmem:[#allocation2 + $0x18] sm:$0xe] }
 0x225   : > { %7656 = vmatmul.mubr.msk.bf16.gmra.mrb[52].mxu0 %vm1920_vm9, %v6897_v51  ;;  %v3652_v39 = vrot.slane %v3650_v15, 4  ;;  %v3663_v46 = vshrl.u32 %v9551_v1, 16  ;;  %v3643_v11 = vrot.slane %v3642_v23, 4  ;;  %v3669_v35 = vshll.u32 %v9559_v34, 16 }
 0x226   : > { %7659 = vmatprep.mubr.msk.bf16.mxu0 %vm1920_vm9, %v6898_v52  ;;  %v3655_v43 = vrot.slane %v3653_v42, 5  ;;  %v3661_v30 = vrot.slane %v3659_v20, 5  ;;  %7762 = vmatmul.mubr.msk.bf16.gmra.mrb[12].mxu1 %vm1920_vm9, %v7014_v50  ;;  %v3638_v58 = vsel %vm9070_vm10, %v3633_v63, %v3637_v54  ;;  %v7033_v60 = vrot.slane %v3967_v27, 9  ;;  %v3969_v50 = vld [vmem:[#allocation2 + $0x24] sm:$0xe] }
 0x227   : > { %v3665_v24 = vrot.slane %v3663_v46, 4  ;;  %v3648_v10 = vsel %vm9070_vm10, %v3643_v11, %v3647_v28  ;;  %v4033_v7 = vrot.slane %v9274_v2, 5  ;;  %v3671_v13 = vrot.slane %v3669_v35, 5  ;;  %v2426_v46 = vld [vmem:[#allocation2] sm:$0xe] }
 0x228   : > { %v3656_v44 = vor.u32 %v3655_v43, %v3652_v39  ;;  %v7015_v37 = vcombine.low %v3638_v58, %v3648_v10  ;;  %v4036_v54 = vrot.slane %v9279_v16, 5  ;;  %v6899_v28 = vcombine.low %v9282_v21, %v9287_v32  ;;  %v3970_v10 = vld [vmem:[#allocation2 + $0x30] sm:$0xe] }
 0x229   : > { %v3666_v51 = vor.u32 %v3665_v24, %v3661_v30  ;;  %v4035_v42 = vrot.slane %v4033_v7, 4  ;;  %v4040_v20 = vrot.slane %v9306_v31, 5  ;;  %v4034_v2 = vsel %vm9573_vm13, %v7033_v60, %v4033_v7 }
 0x22a   : > { %v3657_v15 = vrot.slane %v3656_v44, 4  ;;  %7765 = vmatprep.mubr.msk.bf16.mxu1 %vm1920_vm9, %v7015_v37  ;;  %v6900_v39 = vcombine.low %v9293_v26, %v9301_v25  ;;  %v7034_v16 = vrot.slane %v3968_v19, 9  ;;  %v4043_v31 = vrot.slane %v9317_v4, 5 }
 0x22b   : > { %v3667_v23 = vrot.slane %v3666_v51, 4  ;;  %v4037_v21 = vsel %vm9573_vm13, %v4035_v42, %v4036_v54  ;;  %v4042_v32 = vrot.slane %v4040_v20, 4  ;;  %v4601_v43 = vsel %vm1969_vm1, %v9365_v55, 0  ;;  %v8362_v55 = vld [vmem:[#allocation2 + $0x8] sm:$0x1] }
 0x22c   : > { %v3662_v63 = vsel %vm9070_vm10, %v3657_v15, %v3661_v30  ;;  %v7035_v26 = vrot.slane %v3969_v50, 9  ;;  %v4047_v25 = vrot.slane %v9322_v61, 5  ;;  %v7050_v30 = vcombine.low %v4034_v2, %v4037_v21  ;;  %v3971_v51 = vld [vmem:[#allocation2 + $0x3c] sm:$0xe]  ;;  %v2427_v15 = vld [vmem:[#allocation2 + $0xc] sm:$0xe] }
 0x22d   : > { %v3672_v27 = vsel %vm9070_vm10, %v3667_v23, %v3671_v13  ;;  %7660 = vmatmul.mubr.msk.bf16.gmra.mrb[56].mxu0 %vm1920_vm9, %v6899_v28  ;;  %v4044_v35 = vsel %vm9573_vm13, %v4042_v32, %v4043_v31  ;;  %v6918_v58 = vrot.slane %v2426_v46, 9  ;;  %v2479_v24 = vrot.slane %v9399_v9, 5  ;;  %v3972_v31 = vld [vmem:[#allocation2 + $0x48] sm:$0xe] }
 0x22e   : > { %v7016_v11 = vcombine.low %v3662_v63, %v3672_v27  ;;  %7663 = vmatprep.mubr.msk.bf16.mxu0 %vm1920_vm9, %v6900_v39  ;;  %v4041_v4 = vsel %vm9573_vm13, %v7034_v16, %v4040_v20  ;;  %v4049_v44 = vrot.slane %v4047_v25, 4  ;;  %v4050_v60 = vrot.slane %v9324_v49, 5  ;;  %v2428_v20 = vld [vmem:[#allocation2 + $0x18] sm:$0xe] }
 0x22f   : > { %v2482_v37 = vrot.slane %v8362_v55, 5  ;;  %v6901_v61 = vcombine.low %v9326_v41, %v9330_v56  ;;  %v2480_v9 = vsel %vm9573_vm13, %v6918_v58, %v2479_v24  ;;  %v2481_v7 = vrot.slane %v2479_v24, 4 }
 0x230   : > { %7766 = vmatmul.mubr.msk.bf16.gmra.mrb[16].mxu1 %vm1920_vm9, %v7016_v11  ;;  %v2688_v19 = vsel %vm1969_vm1, %v9351_v40, 0  ;;  %v7051_v13 = vcombine.low %v4041_v4, %v4044_v35  ;;  %v4051_v49 = vsel %vm9573_vm13, %v4049_v44, %v4050_v60  ;;  %v7036_v54 = vrot.slane %v3970_v10, 9  ;;  %v8363_v40 = vld [vmem:[%s10735_s5 + $0x6] sm:$0x3]  ;;  %v3973_v11 = vld [vmem:[#allocation2 + $0x54] sm:$0xe] }
 0x231   : > { %7771 = vmatprep.mubr.msk.bf16.mxu1 %vm1920_vm9, %v7050_v30  ;;  %7668 = vmatpush3.bf16.msra.mxu0 %v2688_v19  ;;  %v4054_v23 = vrot.slane %v9346_v38, 5  ;;  %v4048_v42 = vsel %vm9573_vm13, %v7035_v26, %v4047_v25  ;;  %v2483_v41 = vsel %vm9573_vm13, %v2481_v7, %v2482_v37  ;;  %v7037_v56 = vrot.slane %v3971_v51, 9  ;;  %v8364_v25 = vld [vmem:[#allocation2 + $0x14] sm:$0x1]  ;;  %v9642_v35 = vld [vmem:[%s10735_s5 + $0xe] sm:$0x3] }
 0x232   : > { %v4061_v28 = vrot.slane %v9369_v8, 5  ;;  %8200 = vmatprep.subr.msk.bf16.mxu0 %vm1969_vm1, %v8363_v40  ;;  %v6935_v50 = vcombine.low %v2480_v9, %v2483_v41  ;;  %v4057_v38 = vrot.slane %v9354_v45, 5  ;;  %v6919_v2 = vrot.slane %v2427_v15, 9  ;;  %v8365_v10 = vld [vmem:[#allocation2 + $0x20] sm:$0x1] }
 0x233   : > { %v4056_v63 = vrot.slane %v4054_v23, 4  ;;  %v7052_v39 = vcombine.low %v4048_v42, %v4051_v49  ;;  %v4064_v46 = vrot.slane %v9384_v0, 5  ;;  %v2486_v8 = vrot.slane %v9402_v29, 5  ;;  %v2429_v51 = vld [vmem:[#allocation2 + $0x24] sm:$0xe] }
 0x234   : > { %v4063_v16 = vrot.slane %v4061_v28, 4  ;;  %v4055_v27 = vsel %vm9573_vm13, %v7036_v54, %v4054_v23  ;;  %v6920_v32 = vrot.slane %v2428_v20, 9  ;;  %v2493_v45 = vrot.slane %v9405_v22, 5  ;;  %v10824_v41 = vld [vmem:[#allocation23_spill] sm:$0xff] }
 0x235   : > { %7664 = vmatmul.mubr.msk.bf16.gmra.mrb[60].mxu0 %vm1920_vm9, %v6901_v61  ;;  %v4058_v21 = vsel %vm9573_vm13, %v4056_v63, %v4057_v38  ;;  %v4062_v26 = vsel %vm9573_vm13, %v7037_v56, %v4061_v28  ;;  %v2488_v29 = vrot.slane %v2486_v8, 4  ;;  %v2489_v30 = vrot.slane %v8364_v25, 5  ;;  %v3974_v28 = vld [vmem:[#allocation2 + $0x60] sm:$0xe]  ;;  %v3975_v63 = vld [vmem:[#allocation2 + $0x6c] sm:$0xe] }
 0x236   : > { %7669 = vmatprep.mubr.msk.bf16.mxu0 %vm1920_vm9, %v6935_v50  ;;  %v4065_v0 = vsel %vm9573_vm13, %v4063_v16, %v4064_v46  ;;  %v7053_v58 = vcombine.low %v4055_v27, %v4058_v21  ;;  %v2487_v22 = vsel %vm9573_vm13, %v6919_v2, %v2486_v8  ;;  %v2495_v24 = vrot.slane %v2493_v45, 4  ;;  %v10825_v50 = vld [vmem:[#allocation24_spill] sm:$0xff]  ;;  %v10826_v46 = vld [vmem:[#allocation22_spill] sm:$0xff] }
 0x237   : > { %v2496_v4 = vrot.slane %v8365_v10, 5  ;;  %v2490_v44 = vsel %vm9573_vm13, %v2488_v29, %v2489_v30  ;;  %v7038_v60 = vrot.slane %v3972_v31, 9  ;;  %v4068_v55 = vrot.slane %v9391_v48, 5  ;;  %v8367_v21 = vld [vmem:[#allocation2 + $0x38] sm:$0x1] }
 0x238   : > { %7772 = vmatmul.mubr.msk.bf16.vlgmr.msra.gmra.mrb[20].mxu1 %vm1920_vm9, %v7051_v13  ;;  %v7039_v37 = vrot.slane %v3973_v11, 9  ;;  %v7054_v61 = vcombine.low %v4062_v26, %v4065_v0  ;;  %v2494_v9 = vsel %vm9573_vm13, %v6920_v32, %v2493_v45  ;;  %v4075_v19 = vrot.slane %v9412_v53, 5  ;;  %v2431_v29 = vld [vmem:[#allocation2 + $0x3c] sm:$0xe] }
 0x239   : > { %7804 = vmatpush3.bf16.msra.mxu1 %v4601_v43  ;;  %7775 = vmatprep.mubr.msk.bf16.mxu1 %vm1920_vm9, %v7052_v39  ;;  %v2497_v7 = vsel %vm9573_vm13, %v2495_v24, %v2496_v4  ;;  %v2430_v43 = vld [vmem:[#allocation2 + $0x30] sm:$0xe]  ;;  %v6936_v15 = vcombine.low %v2487_v22, %v2490_v44  ;;  %v4070_v13 = vrot.slane %v4068_v55, 4  ;;  %v4071_v49 = vrot.slane %v9394_v6, 5  ;;  %v8366_v39 = vld [vmem:[#allocation2 + $0x2c] sm:$0x1] }
 0x23a   : > { %8205 = vmatprep.subr.msk.bf16.mxu1 %vm1969_vm1, %v9642_v35  ;;  %v4078_v48 = vrot.slane %v9415_v62, 5  ;;  %v6937_v54 = vcombine.low %v2494_v9, %v2497_v7  ;;  %v4077_v23 = vrot.slane %v4075_v19, 4  ;;  %v6921_v42 = vrot.slane %v2429_v51, 9  ;;  %v10827_v22 = vld [vmem:[#allocation25_spill] sm:$0xff]  ;;  %v10828_v24 = vld [vmem:[#allocation26_spill] sm:$0xff] }
 0x23b   : > { %v2500_v56 = vrot.slane %v10824_v41, 5  ;;  %v4069_v53 = vsel %vm9573_vm13, %v7038_v60, %v4068_v55  ;;  %v9666_v20 = vsel %vm9573_vm13, %v7039_v37, %v4075_v19  ;;  %v6922_v40 = vrot.slane %v2430_v43, 9  ;;  %v10829_v55 = vld [vmem:[#allocation27_spill] sm:$0xff]  ;;  %v10830_v7 = vld [vmem:[#allocation29_spill] sm:$0xff] }
 0x23c   : > { %v2507_v6 = vrot.slane %v10825_v50, 5  ;;  %v4072_v62 = vsel %vm9573_vm13, %v4070_v13, %v4071_v49  ;;  %v4079_v38 = vsel %vm9573_vm13, %v4077_v23, %v4078_v48  ;;  %v2503_v16 = vrot.slane %v8366_v39, 5  ;;  %v8368_v13 = vld [vmem:[#allocation2 + $0x44] sm:$0x1]  ;;  %v8369_v48 = vld [vmem:[#allocation2 + $0x4c] sm:$0xf] }
 0x23d   : > { %7670 = vmatmul.mubr.msk.bf16.vlgmr.msra.gmra.mrb[32].mxu0 %vm1920_vm9, %v6936_v15  ;;  %v2502_v2 = vrot.slane %v2500_v56, 4  ;;  %v7056_v8 = vcombine.low %v9666_v20, %v4079_v38  ;;  %v2510_v32 = vrot.slane %v8367_v21, 5  ;;  %v7040_v45 = vrot.slane %v3974_v28, 9  ;;  %v3976_v23 = vld [vmem:[#allocation2 + $0x78] sm:$0xe]  ;;  %v10832_v21 = vld [vmem:[#allocation31_spill] sm:$0xff] }
 0x23e   : > { %7673 = vmatprep.mubr.msk.bf16.mxu0 %vm1920_vm9, %v6937_v54  ;;  %7702 = vmatpush3.bf16.msra.mxu0 %v10826_v46  ;;  %v2509_v27 = vrot.slane %v2507_v6, 4  ;;  %v2501_v31 = vsel %vm9573_vm13, %v6921_v42, %v2500_v56  ;;  %v4082_v26 = vrot.slane %v9423_v3, 5  ;;  %v7041_v0 = vrot.slane %v3975_v63, 9  ;;  %v2432_v3 = vld [vmem:[#allocation2 + $0x48] sm:$0xe] }
 0x23f   : > { %v2504_v11 = vsel %vm9573_vm13, %v2502_v2, %v2503_v16  ;;  %v2508_v25 = vsel %vm9573_vm13, %v6922_v40, %v2507_v6  ;;  %v4089_v10 = vrot.slane %v10828_v24, 5  ;;  %v4092_v37 = vrot.slane %v10829_v55, 5  ;;  %v3977_v20 = vld [vmem:[#allocation2 + $0x84] sm:$0xe]  ;;  %v8370_v63 = vld [vmem:[#allocation2 + $0x50] sm:$0x1] }
 0x240   : > { %7776 = vmatmul.mubr.msk.bf16.gmra.mrb[24].mxu1 %vm1920_vm9, %v7053_v58  ;;  %v2511_v30 = vsel %vm9573_vm13, %v2509_v27, %v2510_v32  ;;  %v4085_v58 = vrot.slane %v10827_v22, 5  ;;  %v6938_v4 = vcombine.low %v2501_v31, %v2504_v11  ;;  %v4084_v60 = vrot.slane %v4082_v26, 4  ;;  %v10831_v16 = vld [vmem:[#allocation28_spill] sm:$0xff]  ;;  %v3978_v55 = vld [vmem:[#allocation2 + $0x90] sm:$0xe] }
 0x241   : > { %7779 = vmatprep.mubr.msk.bf16.mxu1 %vm1920_vm9, %v7054_v61  ;;  %v6939_v44 = vcombine.low %v2508_v25, %v2511_v30  ;;  %v9692_v51 = vsel %vm9573_vm13, %v7040_v45, %v4082_v26  ;;  %v4091_v61 = vrot.slane %v4089_v10, 4  ;;  %v6923_v9 = vrot.slane %v2431_v29, 9  ;;  %v2433_v45 = vld [vmem:[#allocation2 + $0x54] sm:$0xe] }
 0x242   : > { %v2514_v19 = vrot.slane %v10830_v7, 5  ;;  %v9697_v43 = vsel %vm9573_vm13, %v4084_v60, %v4085_v58  ;;  %v9701_v15 = vsel %vm9573_vm13, %v7041_v0, %v4089_v10  ;;  %v2517_v49 = vrot.slane %v8368_v13, 5  ;;  %v10833_v0 = vld [vmem:[#allocation30_spill] sm:$0xff] }
 0x243   : > { %v2521_v54 = vrot.slane %v8369_v48, 5  ;;  %v7057_v42 = vcombine.low %v9692_v51, %v9697_v43  ;;  %v4093_v41 = vsel %vm9573_vm13, %v4091_v61, %v4092_v37  ;;  %v6924_v28 = vrot.slane %v2432_v3, 9  ;;  %v3979_v51 = vld [vmem:[#allocation2 + $0x9c] sm:$0xe]  ;;  %v8372_v7 = vld [vmem:[#allocation2 + $0x5c] sm:$0x1] }
 0x244   : > { %v2516_v56 = vrot.slane %v2514_v19, 4  ;;  %v7055_v40 = vcombine.low %v4069_v53, %v4072_v62  ;;  %v7058_v50 = vcombine.low %v9701_v15, %v4093_v41  ;;  %v2524_v38 = vrot.slane %v8370_v63, 5 }
 0x245   : > { %7674 = vmatmul.mubr.msk.bf16.gmra.mrb[36].mxu0 %vm1920_vm9, %v6938_v4  ;;  %v2523_v6 = vrot.slane %v2521_v54, 4  ;;  %v7042_v39 = vrot.slane %v3976_v23, 9  ;;  %v4096_v46 = vrot.slane %v10831_v16, 5  ;;  %v2515_v27 = vsel %vm9573_vm13, %v6923_v9, %v2514_v19  ;;  %v2434_v4 = vld [vmem:[#allocation2 + $0x60] sm:$0xe] }
 0x246   : > { %7677 = vmatprep.mubr.msk.bf16.mxu0 %vm1920_vm9, %v6939_v44  ;;  %v2518_v2 = vsel %vm9573_vm13, %v2516_v56, %v2517_v49  ;;  %v7043_v62 = vrot.slane %v3977_v20, 9  ;;  %v4103_v32 = vrot.slane %v10832_v21, 5  ;;  %v2522_v11 = vsel %vm9573_vm13, %v6924_v28, %v2521_v54  ;;  %v8371_v44 = vld [vmem:[#allocation2 + $0x64] sm:$0xf]  ;;  %v8373_v49 = vld [vmem:[#allocation2 + $0x68] sm:$0x1] }
 0x247   : > { %v2525_v53 = vsel %vm9573_vm13, %v2523_v6, %v2524_v38  ;;  %v6940_v31 = vcombine.low %v2515_v27, %v2518_v2  ;;  %v4098_v26 = vrot.slane %v4096_v46, 4  ;;  %v4099_v29 = vrot.slane %v10833_v0, 5 }
 0x248   : > { %7780 = vmatmul.mubr.msk.bf16.gmra.mrb[28].mxu1 %vm1920_vm9, %v7055_v40  ;;  %v6941_v25 = vcombine.low %v2522_v11, %v2525_v53  ;;  %v4105_v30 = vrot.slane %v4103_v32, 4  ;;  %v4106_v22 = vrot.slane %v9482_v36, 5  ;;  %v2528_v58 = vrot.slane %v9490_v47, 5  ;;  %v2435_v53 = vld [vmem:[#allocation2 + $0x6c] sm:$0xe] }
 0x249   : > { %7783 = vmatprep.mubr.msk.bf16.mxu1 %vm1920_vm9, %v7056_v8  ;;  %v9727_v24 = vsel %vm9573_vm13, %v7042_v39, %v4096_v46  ;;  %v9731_v8 = vsel %vm9573_vm13, %v4098_v26, %v4099_v29  ;;  %v6925_v10 = vrot.slane %v2433_v45, 9  ;;  %v2535_v60 = vrot.slane %v8371_v44, 5  ;;  %v3980_v39 = vld [vmem:[#allocation2 + $0xa8] sm:$0xe] }
 0x24a   : > { %v7059_v37 = vcombine.low %v9727_v24, %v9731_v8  ;;  %v9737_v36 = vsel %vm9573_vm13, %v7043_v62, %v4103_v32  ;;  %v9741_v47 = vsel %vm9573_vm13, %v4105_v30, %v4106_v22  ;;  %v2530_v3 = vrot.slane %v2528_v58, 4  ;;  %v3981_v62 = vld [vmem:[#allocation2 + $0xb4] sm:$0xe]  ;;  %v8377_v8 = vld [vmem:[#allocation2 + $0x80] sm:$0x1]  ;;  %v10834_v44 = vld [vmem:[#allocation32_spill] sm:$0xff] }
 0x24b   : > { %v7060_v61 = vcombine.low %v9737_v36, %v9741_v47  ;;  %v2537_v9 = vrot.slane %v2535_v60, 4  ;;  %v2531_v19 = vrot.slane %v8372_v7, 5  ;;  %v6926_v43 = vrot.slane %v2434_v4, 9  ;;  %v8378_v47 = vld [vmem:[#allocation2 + $0x88] sm:$0xf] }
 0x24c   : > { %v7044_v15 = vrot.slane %v3978_v55, 9  ;;  %v4110_v13 = vrot.slane %v9493_v57, 5  ;;  %v2538_v48 = vrot.slane %v8373_v49, 5  ;;  %v7045_v54 = vrot.slane %v3979_v51, 9 }
 0x24d   : > { %7678 = vmatmul.mubr.msk.bf16.gmra.mrb[40].mxu0 %vm1920_vm9, %v6940_v31  ;;  %v4117_v23 = vrot.slane %v9509_v14, 5  ;;  %v2529_v41 = vsel %vm9573_vm13, %v6925_v10, %v2528_v58  ;;  %v2532_v56 = vsel %vm9573_vm13, %v2530_v3, %v2531_v19  ;;  %v4113_v20 = vrot.slane %v9500_v12, 5  ;;  %v8374_v14 = vld [vmem:[#allocation2 + $0x70] sm:$0xf]  ;;  %v2436_v31 = vld [vmem:[#allocation2 + $0x78] sm:$0xe] }
 0x24e   : > { %7681 = vmatprep.mubr.msk.bf16.mxu0 %vm1920_vm9, %v6941_v25  ;;  %v4112_v28 = vrot.slane %v4110_v13, 4  ;;  %v2539_v57 = vsel %vm9573_vm13, %v2537_v9, %v2538_v48  ;;  %v4120_v6 = vrot.slane %v9515_v33, 5  ;;  %v2542_v63 = vrot.slane %v8374_v14, 5  ;;  %v8376_v25 = vld [vmem:[#allocation2 + $0x74] sm:$0x1] }
 0x24f   : > { %v4119_v40 = vrot.slane %v4117_v23, 4  ;;  %v9763_v38 = vsel %vm9573_vm13, %v7044_v15, %v4110_v13  ;;  %v6942_v16 = vcombine.low %v2529_v41, %v2532_v56  ;;  %v9773_v46 = vsel %vm9573_vm13, %v7045_v54, %v4117_v23  ;;  %v3982_v19 = vld [vmem:[#allocation2 + $0xc0] sm:$0xe]  ;;  %v2437_v54 = vld [vmem:[#allocation2 + $0x84] sm:$0xe] }
 0x250   : > { %7784 = vmatmul.mubr.msk.bf16.gmra.mrb[32].mxu1 %vm1920_vm9, %v7057_v42  ;;  %v2536_v42 = vsel %vm9573_vm13, %v6926_v43, %v2535_v60  ;;  %v9767_v12 = vsel %vm9573_vm13, %v4112_v28, %v4113_v20  ;;  %v2544_v45 = vrot.slane %v2542_v63, 4  ;;  %v7046_v26 = vrot.slane %v3980_v39, 9  ;;  %v2438_v56 = vld [vmem:[#allocation2 + $0x90] sm:$0xe] }
 0x251   : > { %7787 = vmatprep.mubr.msk.bf16.mxu1 %vm1920_vm9, %v7058_v50  ;;  %v8375_v50 = vld [vmem:[#allocation2 + $0x7c] sm:$0xf]  ;;  %v7061_v33 = vcombine.low %v9763_v38, %v9767_v12  ;;  %v9777_v27 = vsel %vm9573_vm13, %v4119_v40, %v4120_v6  ;;  %v6943_v21 = vcombine.low %v2536_v42, %v2539_v57  ;;  %v4124_v0 = vrot.slane %v9524_v59, 5  ;;  %v8380_v6 = vld [vmem:[#allocation2 + $0x8c] sm:$0x1] }
 0x252   : > { %v2549_v2 = vrot.slane %v8375_v50, 5  ;;  %v7062_v32 = vcombine.low %v9773_v46, %v9777_v27  ;;  %v6927_v29 = vrot.slane %v2435_v53, 9  ;;  %v2545_v30 = vrot.slane %v8376_v25, 5  ;;  %v8381_v12 = vld [vmem:[#allocation2 + $0x98] sm:$0x1] }
 0x253   : > { %v7047_v22 = vrot.slane %v3981_v62, 9  ;;  %v4131_v58 = vrot.slane %v9537_v18, 5  ;;  %v6928_v24 = vrot.slane %v2436_v31, 9  ;;  %v2552_v10 = vrot.slane %v8377_v8, 5  ;;  %v8383_v53 = vld [vmem:[#allocation2 + $0xac] sm:$0xf] }
 0x254   : > { %v2551_v11 = vrot.slane %v2549_v2, 4  ;;  %v4126_v4 = vrot.slane %v4124_v0, 4  ;;  %v4127_v60 = vrot.slane %v10834_v44, 5  ;;  %v2546_v55 = vsel %vm9573_vm13, %v2544_v45, %v2545_v30  ;;  %v2439_v31 = vld [vmem:[#allocation2 + $0x9c] sm:$0xe] }
 0x255   : > { %7682 = vmatmul.mubr.msk.bf16.gmra.mrb[44].mxu0 %vm1920_vm9, %v6942_v16  ;;  %v4133_v59 = vrot.slane %v4131_v58, 4  ;;  %v4134_v36 = vrot.slane %v9543_v5, 5  ;;  %v2556_v3 = vrot.slane %v8378_v47, 5  ;;  %v4125_v51 = vsel %vm9573_vm13, %v7046_v26, %v4124_v0  ;;  %v8382_v16 = vld [vmem:[#allocation2 + $0xa0] sm:$0xf] }
 0x256   : > { %7685 = vmatprep.mubr.msk.bf16.mxu0 %vm1920_vm9, %v6943_v21  ;;  %v2553_v18 = vsel %vm9573_vm13, %v2551_v11, %v2552_v10  ;;  %v4128_v9 = vsel %vm9573_vm13, %v4126_v4, %v4127_v60  ;;  %v2543_v43 = vsel %vm9573_vm13, %v6927_v29, %v2542_v63  ;;  %v4132_v15 = vsel %vm9573_vm13, %v7047_v22, %v4131_v58  ;;  %v2440_v0 = vld [vmem:[#allocation2 + $0xa8] sm:$0xe]  ;;  %v8384_v25 = vld [vmem:[#allocation2 + $0xa4] sm:$0x1]  ;;  %v8385_v58 = vld [vmem:[#allocation2 + $0xb0] sm:$0x1] }
 0x257   : > { %v7063_v5 = vcombine.low %v4125_v51, %v4128_v9  ;;  %v6944_v13 = vcombine.low %v2543_v43, %v2546_v55  ;;  %v2550_v49 = vsel %vm9573_vm13, %v6928_v24, %v2549_v2  ;;  %v2558_v41 = vrot.slane %v2556_v3, 4  ;;  %v8386_v10 = vld [vmem:[#allocation2 + $0xb8] sm:$0xf]  ;;  %v8387_v51 = vld [vmem:[#allocation2 + $0xbc] sm:$0x1] }
 0x258   : > { %7788 = vmatmul.mubr.msk.bf16.gmra.mrb[4].mxu1 %vm1920_vm9, %v7059_v37  ;;  %v8379_v37 = vld [vmem:[#allocation2 + $0x94] sm:$0xf]  ;;  %v6945_v23 = vcombine.low %v2550_v49, %v2553_v18  ;;  %v7048_v28 = vrot.slane %v3982_v19, 9  ;;  %v4138_v20 = vrot.slane %v9551_v1, 5  ;;  %v6929_v40 = vrot.slane %v2437_v54, 9 }
 0x259   : > { %7791 = vmatprep.mubr.msk.bf16.mxu1 %vm1920_vm9, %v7060_v61  ;;  %v2563_v7 = vrot.slane %v8379_v37, 5  ;;  %v4135_v61 = vsel %vm9573_vm13, %v4133_v59, %v4134_v36  ;;  %v2559_v14 = vrot.slane %v8380_v6, 5  ;;  %v4141_v42 = vrot.slane %v9559_v34, 5  ;;  %v2441_v36 = vld [vmem:[#allocation2 + $0xb4] sm:$0xe]  ;;  %v8321_v37 = vld [vmem:[#allocation2 + $0x18] sm:$0xff]  }
 0x25a   : > { %v7064_v48 = vcombine.low %v4132_v15, %v4135_v61  ;;  %v4140_v63 = vrot.slane %v4138_v20, 4  ;;  %v6930_v38 = vrot.slane %v2438_v56, 9  ;;  %v2566_v50 = vrot.slane %v8381_v12, 5  ;;  %v8322_v15 = vld [vmem:[#allocation2 + $0x24] sm:$0xff]   ;;  %v9850_v49 = vld [vmem:[%s10735_s5 + $0x10] sm:$0x3] }
 0x25b   : > { %v2565_v57 = vrot.slane %v2563_v7, 4  ;;  %v2560_v2 = vsel %vm9573_vm13, %v2558_v41, %v2559_v14  ;;  %v4139_v1 = vsel %vm9573_vm13, %v7048_v28, %v4138_v20  ;;  %v2570_v46 = vrot.slane %v8382_v16, 5  ;;  %v9854_v54 = vld [vmem:[#allocation2 + $0x1c] sm:$0xf]  ;;  %v8328_v56 = vld [vmem:[#allocation2 + $0x24] sm:$0xff]  }
 0x25c   : > { %v4142_v39 = vsel %vm9573_vm13, %v4140_v63, %v4141_v42  ;;  %v2577_v62 = vrot.slane %v8383_v53, 5  ;;  %v2564_v45 = vsel %vm9573_vm13, %v6930_v38, %v2563_v7  ;;  %v6931_v29 = vrot.slane %v2439_v31, 9  ;;  %v8326_v6 = vld [vmem:[#allocation2 + $0x48] sm:$0xff]  }
 0x25d   : > { %7686 = vmatmul.mubr.msk.bf16.gmra.mrb[48].mxu0 %vm1920_vm9, %v6944_v13  ;;  %v2567_v34 = vsel %vm9573_vm13, %v2565_v57, %v2566_v50  ;;  %v7065_v27 = vcombine.low %v4139_v1, %v4142_v39  ;;  %v2572_v26 = vrot.slane %v2570_v46, 4  ;;  %v2573_v30 = vrot.slane %v8384_v25, 5  ;;  %v8323_v13 = vld [vmem:[#allocation2 + $0x30] sm:$0xff]   ;;  %v4799_v57 = vld [vmem:[#allocation2 + $0x24] sm:$0xf] }
 0x25e   : > { %7689 = vmatprep.mubr.msk.bf16.mxu0 %vm1920_vm9, %v6945_v23  ;;  %v6947_v11 = vcombine.low %v2564_v45, %v2567_v34  ;;  %v6932_v22 = vrot.slane %v2440_v0, 9  ;;  %v2580_v24 = vrot.slane %v8385_v58, 5  ;;  %v2584_v4 = vrot.slane %v8386_v10, 5  ;;  %v9863_v12 = vld [vmem:[#allocation2 + $0x28] sm:$0xf]  ;;  %v8331_v1 = vld [vmem:[#allocation2 + $0x30] sm:$0xff]  }
 0x25f   : > { %v2574_v8 = vsel %vm9573_vm13, %v2572_v26, %v2573_v30  ;;  %v2571_v60 = vsel %vm9573_vm13, %v6931_v29, %v2570_v46  ;;  %v6933_v18 = vrot.slane %v2441_v36, 9  ;;  %v2587_v9 = vrot.slane %v8387_v51, 5  ;;  %v9866_v39 = vld [vmem:[#allocation2 + $0x20] sm:$0x1]  ;;  %v8329_v45 = vld [vmem:[#allocation2 + $0x54] sm:$0xff]  }
 0x260   : > { %7792 = vmatmul.mubr.msk.bf16.gmra.mrb[8].mxu1 %vm1920_vm9, %v7061_v33  ;;  %v2557_v33 = vsel %vm9573_vm13, %v6929_v40, %v2556_v3  ;;  %v6948_v55 = vcombine.low %v2571_v60, %v2574_v8  ;;  %v2578_v59 = vsel %vm9573_vm13, %v6932_v22, %v2577_v62  ;;  %v2586_v3 = vrot.slane %v2584_v4, 4  ;;  %v8325_v40 = vld [vmem:[#allocation2 + $0x3c] sm:$0xff]   ;;  %v9878_v30 = vld [vmem:[#allocation2 + $0x2c] sm:$0x1]  ;;  %v8336_v36 = vld [vmem:[#allocation2 + $0x54] sm:$0xff]  }
 0x261   : > { %7795 = vmatprep.mubr.msk.bf16.mxu1 %vm1920_vm9, %v7062_v32  ;;  %v6946_v21 = vcombine.low %v2557_v33, %v2560_v2  ;;  %v2579_v32 = vrot.slane %v2577_v62, 4  ;;  %v2585_v19 = vsel %vm9573_vm13, %v6933_v18, %v2584_v4  ;;  %v5327_v61 = vsel %vm1969_vm1, %v9642_v35, 0  ;;  %v8327_v35 = vld [vmem:[#allocation2 + $0x18] sm:$0xff]   ;;  %v8330_v26 = vld [vmem:[#allocation2 + $0x60] sm:$0xff]  }
 0x262   : > { %v2588_v7 = vsel %vm9573_vm13, %v2586_v3, %v2587_v9  ;;  %v4854_v28 = vshll.u32 %v9854_v54, 16  ;;  %v4858_v20 = vshrl.u32 %v9854_v54, 16  ;;  %v4869_v50 = vshrl.u32 %v4799_v57, 16  ;;  %v9892_v9 = vld [vmem:[#allocation2 + $0x38] sm:$0x1] }
 0x263   : > { %v2581_v44 = vsel %vm9573_vm13, %v2579_v32, %v2580_v24  ;;  %v6950_v43 = vcombine.low %v2585_v19, %v2588_v7  ;;  %v4872_v2 = vshll.u32 %v4799_v57, 16  ;;  %v4878_v46 = vshll.u32 %v9863_v12, 16  ;;  %v4805_v19 = vld [vmem:[#allocation2 + $0x3c] sm:$0xf] }
 0x264   : > { %v6949_v47 = vcombine.low %v2578_v59, %v2581_v44  ;;  %v4856_v42 = vrot.slane %v4854_v28, 5  ;;  %v4860_v38 = vrot.slane %v4858_v20, 4  ;;  %v4882_v34 = vshrl.u32 %v9863_v12, 16  ;;  %v8335_v44 = vld [vmem:[#allocation2 + $0x48] sm:$0xff]  }
 0x265   : > { %7690 = vmatmul.mubr.msk.bf16.gmra.mrb[52].mxu0 %vm1920_vm9, %v6946_v21  ;;  %v4871_v62 = vrot.slane %v4869_v50, 4  ;;  %v4874_v33 = vrot.slane %v4872_v2, 5  ;;  %v4802_v21 = vld [vmem:[#allocation2 + $0x30] sm:$0xf]  ;;  %v4864_v31 = vshll.u32 %v9866_v39, 16  ;;  %v9875_v32 = vrot.slane %v4878_v46, 5 }
 0x266   : > { %7693 = vmatprep.mubr.msk.bf16.mxu0 %vm1920_vm9, %v6947_v11  ;;  %v4861_v53 = vor.u32 %v4860_v38, %v4856_v42  ;;  %v9873_v11 = vld [vmem:[#allocation2 + $0x34] sm:$0xf]  ;;  %v4884_v29 = vrot.slane %v4882_v34, 4  ;;  %v4893_v58 = vshrl.u32 %v4802_v21, 16  ;;  %v4896_v24 = vshll.u32 %v4802_v21, 16 }
 0x267   : > { %v4875_v22 = vor.u32 %v4874_v33, %v4871_v62  ;;  %v4902_v8 = vshll.u32 %v9873_v11, 16  ;;  %v4906_v10 = vshrl.u32 %v9873_v11, 16  ;;  %v4866_v4 = vrot.slane %v4864_v31, 5  ;;  %v8337_v62 = vld [vmem:[#allocation2 + $0x84] sm:$0xff]  }
 0x268   : > { %7796 = vmatmul.mubr.msk.bf16.gmra.mrb[12].mxu1 %vm1920_vm9, %v7063_v5  ;;  %v8324_v5 = vld [vmem:[#allocation2 + $0xc] sm:$0xff]   ;;  %v4862_v25 = vrot.slane %v4861_v53, 4  ;;  %v4888_v59 = vshll.u32 %v9878_v30, 16  ;;  %v4895_v18 = vrot.slane %v4893_v58, 4  ;;  %v4898_v51 = vrot.slane %v4896_v24, 5 }
 0x269   : > { %7799 = vmatprep.mubr.msk.bf16.mxu1 %vm1920_vm9, %v7064_v48  ;;  %v4796_v48 = vld [vmem:[#allocation2 + $0x18] sm:$0xf]  ;;  %v9889_v3 = vrot.slane %v4875_v22, 4  ;;  %v4908_v7 = vrot.slane %v4906_v10, 4  ;;  %v4912_v20 = vshll.u32 %v9892_v9, 16  ;;  %v4917_v57 = vshrl.u32 %v4805_v19, 16 }
 0x26a   : > { %v4845_v23 = vshrl.u32 %v4796_v48, 16  ;;  %v4848_v41 = vshll.u32 %v4796_v48, 16  ;;  %v4899_v28 = vor.u32 %v4898_v51, %v4895_v18  ;;  %v9928_v58 = vld [vmem:[#allocation2 + $0x64] sm:$0xf] }
 0x26b   : > { %v4919_v31 = vrot.slane %v4917_v57, 4  ;;  %v9930_v24 = vld [vmem:[#allocation2 + $0x44] sm:$0x1] }
 0x26c   : > { %v4847_v14 = vrot.slane %v4845_v23, 4  ;;  %v4850_v63 = vrot.slane %v4848_v41, 5  ;;  %v9903_v23 = vsel %vm1969_vm1, %v9850_v49, 0  ;;  %v9905_v41 = vld [vmem:[#allocation2 + $0x4c] sm:$0xf]  ;;  %v4900_v21 = vrot.slane %v4899_v28, 4 }
 0x26d   : > { %7694 = vmatmul.mubr.msk.bf16.gmra.mrb[56].mxu0 %vm1920_vm9, %v6948_v55  ;;  %v4885_v55 = vor.u32 %v4884_v29, %v9875_v32  ;;  %v4950_v2 = vshll.u32 %v9905_v41, 16 }
 0x26e   : > { %7697 = vmatprep.mubr.msk.bf16.mxu0 %vm1920_vm9, %v6949_v47  ;;  %v4851_v16 = vor.u32 %v4850_v63, %v4847_v14  ;;  %v4867_v47 = vsel %vm9070_vm10, %v4862_v25, %v4866_v4  ;;  %v4920_v14 = vshll.u32 %v4805_v19, 16  ;;  %v5002_v19 = vshrl.u32 %v9928_v58, 16 }
 0x26f   : > { %v4886_v48 = vrot.slane %v4885_v55, 4  ;;  %v9932_v4 = vrot.slane %v4950_v2, 5 }
 0x270   : > { %7800 = vmatmul.mubr.msk.bf16.gmra.mrb[16].mxu1 %vm1920_vm9, %v7065_v27  ;;  %v8332_v27 = vld [vmem:[#allocation2 + $0x3c] sm:$0xff]   ;;  %v4852_v0 = vrot.slane %v4851_v16, 4  ;;  %v4922_v29 = vrot.slane %v4920_v14, 5 }
 0x271   : > { %7805 = vmatprep.mubr.msk.bf16.mxu1 %vm1920_vm9, %v8321_v37  ;;  %v9894_v37 = vrot.slane %v4902_v8, 5  ;;  %v8339_v16 = vld [vmem:[#allocation2 + $0x60] sm:$0xff]  }
 0x272   : > { %v4857_v60 = vsel %vm9070_vm10, %v4852_v0, %v4856_v42  ;;  %v8338_v0 = vld [vmem:[#allocation2 + $0x90] sm:$0xff]  }
 0x275   : > { %7698 = vmatmul.mubr.msk.bf16.gmra.mrb[60].mxu0 %vm1920_vm9, %v6950_v43  ;;  %v8333_v43 = vld [vmem:[#allocation2 + $0x6c] sm:$0xff]  }
 0x276   : > { %7703 = vmatprep.mubr.msk.bf16.mxu0 %vm1920_vm9, %v8324_v5  ;;  %v9897_v5 = vld [vmem:[#allocation2 + $0x40] sm:$0xf] }
 0x277   : > { %v4926_v63 = vshll.u32 %v9897_v5, 16  ;;  %v4930_v42 = vshrl.u32 %v9897_v5, 16 }
 0x278   : > { %7806 = vmatmul.mubr.msk.bf16.vlgmr.msra.gmra.mrb[20].mxu1 %vm1920_vm9, %v8322_v15  ;;  %v4808_v15 = vld [vmem:[#allocation2 + $0x48] sm:$0xf] }
 0x279   : > { %7838 = vmatpush3.bf16.msra.mxu1 %v5327_v61  ;;  %7809 = vmatprep.mubr.msk.bf16.mxu1 %vm1920_vm9, %v8323_v13  ;;  %v8334_v61 = vld [vmem:[#allocation2 + $0x78] sm:$0xff]   ;;  %v9899_v13 = vcombine.low %v4857_v60, %v4867_v47  ;;  %v4941_v38 = vshrl.u32 %v4808_v15, 16  ;;  %v4944_v50 = vshll.u32 %v4808_v15, 16  ;;  %v9926_v25 = vrot.slane %v4926_v63, 5  ;;  %v9934_v60 = vld [vmem:[#allocation2 + $0x50] sm:$0x1] }
 0x27a   : > { %8206 = vmatprep.subr.msk.bf16.mxu1 %vm1969_vm1, %v9850_v49  ;;  %v4909_v49 = vor.u32 %v4908_v7, %v9894_v37  ;;  %v4932_v22 = vrot.slane %v4930_v42, 4  ;;  %v4998_v7 = vshll.u32 %v9928_v58, 16  ;;  %v4905_v15 = vsel %vm9070_vm10, %v4900_v21, %v9894_v37  ;;  %v8340_v42 = vld [vmem:[#allocation2 + $0x9c] sm:$0xff]  }
 0x27b   : > { %v4943_v8 = vrot.slane %v4941_v38, 4  ;;  %v4946_v10 = vrot.slane %v4944_v50, 5  ;;  %v4960_v57 = vshll.u32 %v9934_v60, 16 }
 0x27c   : > { %v4933_v28 = vor.u32 %v4932_v22, %v9926_v25  ;;  %v9959_v2 = vrot.slane %v4998_v7, 5 }
 0x27d   : > { %7704 = vmatmul.mubr.msk.bf16.vlgmr.msra.gmra.mrb[32].mxu0 %vm1920_vm9, %v8327_v35  ;;  %v4890_v35 = vrot.slane %v4888_v59, 5 }
 0x27e   : > { %7707 = vmatprep.mubr.msk.bf16.mxu0 %vm1920_vm9, %v8328_v56  ;;  %v4881_v56 = vsel %vm9070_vm10, %v9889_v3, %v9875_v32  ;;  %v4910_v32 = vrot.slane %v4909_v49, 4  ;;  %v9939_v3 = vld [vmem:[#allocation2 + $0x5c] sm:$0x1]  ;;  %v9954_v49 = vld [vmem:[#allocation2 + $0x70] sm:$0xf] }
 0x27f   : > { %v4891_v33 = vsel %vm9070_vm10, %v4886_v48, %v4890_v35  ;;  %v4936_v48 = vshll.u32 %v9930_v24, 16  ;;  %v4923_v35 = vor.u32 %v4922_v29, %v4919_v31  ;;  %v4984_v37 = vshll.u32 %v9939_v3, 16 }
 0x280   : > { %7810 = vmatmul.mubr.msk.bf16.gmra.mrb[24].mxu1 %vm1920_vm9, %v8325_v40  ;;  %v4811_v40 = vld [vmem:[#allocation2 + $0x54] sm:$0xf]  ;;  %v4962_v29 = vrot.slane %v4960_v57, 5 }
 0x281   : > { %7813 = vmatprep.mubr.msk.bf16.mxu1 %vm1920_vm9, %v8326_v6  ;;  %v9913_v6 = vld [vmem:[#allocation2 + $0x58] sm:$0xf]  ;;  %v4965_v46 = vshrl.u32 %v4811_v40, 16  ;;  %v4968_v34 = vshll.u32 %v4811_v40, 16  ;;  %v4817_v40 = vld [vmem:[#allocation2 + $0x6c] sm:$0xf] }
 0x282   : > { %v4978_v53 = vshrl.u32 %v9913_v6, 16  ;;  %v4924_v21 = vrot.slane %v4923_v35, 4  ;;  %v4938_v31 = vrot.slane %v4936_v48, 5 }
 0x283   : > { %v4967_v55 = vrot.slane %v4965_v46, 4  ;;  %v4970_v59 = vrot.slane %v4968_v34, 5  ;;  %v5013_v46 = vshrl.u32 %v4817_v40, 16  ;;  %v5016_v34 = vshll.u32 %v4817_v40, 16 }
 0x284   : > { %v4980_v47 = vrot.slane %v4978_v53, 4  ;;  %v5026_v53 = vshrl.u32 %v9954_v49, 16 }
 0x285   : > { %7708 = vmatmul.mubr.msk.bf16.gmra.mrb[36].mxu0 %vm1920_vm9, %v8331_v1  ;;  %v4954_v1 = vshrl.u32 %v9905_v41, 16  ;;  %v4971_v14 = vor.u32 %v4970_v59, %v4967_v55 }
 0x286   : > { %7711 = vmatprep.mubr.msk.bf16.mxu0 %vm1920_vm9, %v8332_v27  ;;  %v4974_v27 = vshll.u32 %v9913_v6, 16  ;;  %v5028_v7 = vrot.slane %v5026_v53, 4 }
 0x287   : > { %v4972_v22 = vrot.slane %v4971_v14, 4 }
 0x288   : > { %7814 = vmatmul.mubr.msk.bf16.gmra.mrb[28].mxu1 %vm1920_vm9, %v8329_v45  ;;  %v4914_v45 = vrot.slane %v4912_v20, 5  ;;  %v4947_v20 = vor.u32 %v4946_v10, %v4943_v8  ;;  %v9967_v8 = vld [vmem:[#allocation2 + $0x7c] sm:$0xf] }
 0x289   : > { %7817 = vmatprep.mubr.msk.bf16.mxu1 %vm1920_vm9, %v8330_v26  ;;  %v4814_v26 = vld [vmem:[#allocation2 + $0x60] sm:$0xf]  ;;  %v5046_v35 = vshll.u32 %v9967_v8, 16  ;;  %v5050_v40 = vshrl.u32 %v9967_v8, 16 }
 0x28a   : > { %v4989_v18 = vshrl.u32 %v4814_v26, 16  ;;  %v4992_v51 = vshll.u32 %v4814_v26, 16  ;;  %v4820_v26 = vld [vmem:[#allocation2 + $0x78] sm:$0xf] }
 0x28b   : > { %v5040_v48 = vshll.u32 %v4820_v26, 16 }
 0x28c   : > { %v4991_v38 = vrot.slane %v4989_v18, 4  ;;  %v4994_v50 = vrot.slane %v4992_v51, 5  ;;  %v5018_v18 = vrot.slane %v5016_v34, 5 }
 0x28d   : > { %7712 = vmatmul.mubr.msk.bf16.gmra.mrb[40].mxu0 %vm1920_vm9, %v8335_v44  ;;  %v4956_v44 = vrot.slane %v4954_v1, 4  ;;  %v5004_v1 = vrot.slane %v5002_v19, 4 }
 0x28e   : > { %7715 = vmatprep.mubr.msk.bf16.mxu0 %vm1920_vm9, %v8336_v36  ;;  %v9936_v36 = vrot.slane %v4974_v27, 5  ;;  %v5022_v27 = vshll.u32 %v9954_v49, 16  ;;  %v4995_v55 = vor.u32 %v4994_v50, %v4991_v38  ;;  %v8342_v38 = vld [vmem:[#allocation2 + $0xb4] sm:$0xff]   ;;  %v8343_v50 = vld [vmem:[#allocation2 + $0xc0] sm:$0xff]  }
 0x28f   : > { %v5005_v59 = vor.u32 %v5004_v1, %v9959_v2 }
 0x290   : > { %7818 = vmatmul.mubr.msk.bf16.gmra.mrb[32].mxu1 %vm1920_vm9, %v8333_v43  ;;  %v9944_v43 = vcombine.low %v4881_v56, %v4891_v33  ;;  %v4957_v56 = vor.u32 %v4956_v44, %v9932_v4  ;;  %v4981_v63 = vor.u32 %v4980_v47, %v9936_v36  ;;  %v4986_v44 = vrot.slane %v4984_v37, 5  ;;  %v4823_v37 = vld [vmem:[#allocation2 + $0x84] sm:$0xf] }
 0x291   : > { %7821 = vmatprep.mubr.msk.bf16.mxu1 %vm1920_vm9, %v8334_v61  ;;  %v4915_v61 = vsel %vm9070_vm10, %v4910_v32, %v4914_v45  ;;  %v4934_v45 = vrot.slane %v4933_v28, 4  ;;  %v5015_v47 = vrot.slane %v5013_v46, 4  ;;  %v9972_v51 = vrot.slane %v5022_v27, 5 }
 0x292   : > { %v9965_v33 = vcombine.low %v4905_v15, %v4915_v61  ;;  %v4958_v32 = vrot.slane %v4957_v56, 4  ;;  %v4982_v10 = vrot.slane %v4981_v63, 4  ;;  %v9975_v15 = vld [vmem:[#allocation2 + $0x74] sm:$0x1]  ;;  %v5037_v61 = vshrl.u32 %v4820_v26, 16 }
 0x293   : > { %v4929_v28 = vsel %vm9070_vm10, %v4924_v21, %v9926_v25  ;;  %v4977_v14 = vsel %vm9070_vm10, %v4972_v22, %v9936_v36  ;;  %v9994_v25 = vrot.slane %v4995_v55, 4  ;;  %v5019_v1 = vor.u32 %v5018_v18, %v5015_v47  ;;  %v10004_v36 = vld [vmem:[#allocation2 + $0x80] sm:$0x1]  ;;  %v10026_v55 = vld [vmem:[#allocation2 + $0x90] sm:$0xf] }
 0x294   : > { %v4963_v56 = vsel %vm9070_vm10, %v4958_v32, %v4962_v29  ;;  %v4987_v63 = vsel %vm9070_vm10, %v4982_v10, %v4986_v44  ;;  %v5029_v46 = vor.u32 %v5028_v7, %v9972_v51  ;;  %v5032_v34 = vshll.u32 %v9975_v15, 16  ;;  %v5524_v32 = vld [vmem:[#allocation2 + $0x30] sm:$0xe] }
 0x295   : > { %7716 = vmatmul.mubr.msk.bf16.gmra.mrb[44].mxu0 %vm1920_vm9, %v8339_v16  ;;  %v9961_v16 = vld [vmem:[#allocation2 + $0x68] sm:$0x1]  ;;  %v10006_v53 = vrot.slane %v5037_v61, 4  ;;  %v10010_v21 = vrot.slane %v5046_v35, 5  ;;  %v5064_v26 = vshll.u32 %v4823_v37, 16  ;;  %v10020_v10 = vcombine.low %v4977_v14, %v4987_v63 }
 0x296   : > { %v5008_v19 = vshll.u32 %v9961_v16, 16  ;;  %v10033_v47 = vrot.slane %v5019_v1, 4  ;;  %v10035_v18 = vrot.slane %v5029_v46, 4  ;;  %v10037_v7 = vrot.slane %v5032_v34, 5  ;;  %v5527_v63 = vld [vmem:[#allocation2 + $0x54] sm:$0xe] }
 0x297   : > { %v7150_v35 = vrot.slane %v5524_v32, 9  ;;  %v5609_v34 = vrot.slane %v9897_v5, 5  ;;  %v8344_v32 = vld [vmem:[#allocation2 + $0xcc] sm:$0xff]   ;;  %v5623_v5 = vrot.slane %v9913_v6, 5  ;;  %v10126_v46 = vld [vmem:[#allocation2 + $0xa0] sm:$0xf] }
 0x298   : > { %7822 = vmatmul.mubr.msk.bf16.gmra.mrb[4].mxu1 %vm1920_vm9, %v8337_v62  ;;  %v8341_v62 = vld [vmem:[#allocation2 + $0xa8] sm:$0xff]   ;;  %v10002_v27 = vrot.slane %v5008_v19, 5  ;;  %v5525_v19 = vld [vmem:[#allocation2 + $0x3c] sm:$0xe]  ;;  %v10128_v61 = vld [vmem:[#allocation2 + $0xa4] sm:$0x1] }
 0x299   : > { %7825 = vmatprep.mubr.msk.bf16.mxu1 %vm1920_vm9, %v8338_v0  ;;  %v4948_v0 = vrot.slane %v4947_v20, 4  ;;  %v4939_v20 = vsel %vm9070_vm10, %v4934_v45, %v4938_v31  ;;  %v10012_v45 = vrot.slane %v5050_v40, 4  ;;  %v5061_v31 = vshrl.u32 %v4823_v37, 16  ;;  %v10164_v37 = vld [vmem:[#allocation2 + $0xb8] sm:$0xf] }
 0x29a   : > { %v10016_v29 = vcombine.low %v4929_v28, %v4939_v20  ;;  %v5602_v28 = vrot.slane %v9873_v11, 5  ;;  %v5526_v20 = vld [vmem:[#allocation2 + $0x48] sm:$0xe]  ;;  %v7151_v1 = vrot.slane %v5525_v19, 9  ;;  %v7153_v19 = vrot.slane %v5527_v63, 9 }
 0x29b   : > { %v4953_v57 = vsel %vm9070_vm10, %v4948_v0, %v9932_v4  ;;  %v9998_v4 = vrot.slane %v5005_v59, 4  ;;  %v10045_v40 = vrot.slane %v5061_v31, 4  ;;  %v7152_v31 = vrot.slane %v5526_v20, 9  ;;  %v5529_v63 = vld [vmem:[#allocation2 + $0x6c] sm:$0xe] }
 0x29c   : > { %v10018_v22 = vcombine.low %v4953_v57, %v4963_v56  ;;  %v10047_v56 = vrot.slane %v5064_v26, 5  ;;  %v10056_v11 = vsel %vm9573_vm13, %v7150_v35, %v5602_v28  ;;  %v5528_v26 = vld [vmem:[#allocation2 + $0x60] sm:$0xe]  ;;  %v5611_v57 = vrot.slane %v5609_v34, 4 }
 0x29d   : > { %v5619_v35 = vrot.slane %v9934_v60, 5  ;;  %v7154_v20 = vrot.slane %v5528_v26, 9  ;;  %v5625_v6 = vrot.slane %v5623_v5, 4 }
 0x2a0   : > { %7826 = vmatmul.mubr.msk.bf16.gmra.mrb[8].mxu1 %vm1920_vm9, %v8340_v42  ;;  %v9996_v42 = vld [vmem:[#allocation2 + $0x88] sm:$0xf] }
 0x2a1   : > { %7829 = vmatprep.mubr.msk.bf16.mxu1 %vm1920_vm9, %v8341_v62  ;;  %v10008_v62 = vrot.slane %v5040_v48, 5  ;;  %v5070_v0 = vshll.u32 %v9996_v42, 16  ;;  %v5612_v48 = vrot.slane %v9930_v24, 5 }
 0x2a3   : > { %v10049_v14 = vrot.slane %v5070_v0, 5  ;;  %v10082_v60 = vsel %vm9573_vm13, %v5611_v57, %v5612_v48  ;;  %v5633_v48 = vrot.slane %v9961_v16, 5  ;;  %v5531_v57 = vld [vmem:[#allocation2 + $0x84] sm:$0xe]  ;;  %v5637_v16 = vrot.slane %v9954_v49, 5 }
 0x2a4   : > { %v5647_v49 = vrot.slane %v10004_v36, 5 }
 0x2a8   : > { %7830 = vmatmul.mubr.msk.bf16.gmra.mrb[12].mxu1 %vm1920_vm9, %v8342_v38  ;;  %v5604_v38 = vrot.slane %v5602_v28, 4  ;;  %v10072_v28 = vsel %vm9573_vm13, %v7151_v1, %v5609_v34  ;;  %v5530_v1 = vld [vmem:[#allocation2 + $0x78] sm:$0xe]  ;;  %v7157_v34 = vrot.slane %v5531_v57, 9 }
 0x2a9   : > { %7833 = vmatprep.mubr.msk.bf16.mxu1 %vm1920_vm9, %v8343_v50  ;;  %v5605_v50 = vrot.slane %v9892_v9, 5  ;;  %v5616_v9 = vrot.slane %v9905_v41, 5 }
 0x2ab   : > { %v10061_v0 = vsel %vm9573_vm13, %v5604_v38, %v5605_v50  ;;  %v10076_v24 = vsel %vm9573_vm13, %v7152_v31, %v5616_v9  ;;  %v5618_v41 = vrot.slane %v5616_v9, 4  ;;  %v5626_v38 = vrot.slane %v9939_v3, 5  ;;  %v10103_v9 = vld [vmem:[#allocation2 + $0x8c] sm:$0x1]  ;;  %v10112_v3 = vld [vmem:[#allocation2 + $0x94] sm:$0xf] }
 0x2ac   : > { %v5630_v50 = vrot.slane %v9928_v58, 5  ;;  %v5654_v59 = vrot.slane %v10103_v9, 5 }
 0x2ad   : > { %v10090_v31 = vsel %vm9573_vm13, %v5618_v41, %v5619_v35  ;;  %v10101_v58 = vsel %vm9573_vm13, %v5625_v6, %v5626_v38  ;;  %v5532_v41 = vld [vmem:[#allocation2 + $0x90] sm:$0xe]  ;;  %v5644_v38 = vrot.slane %v9967_v8, 5  ;;  %v10120_v35 = vld [vmem:[#allocation2 + $0x98] sm:$0x1] }
 0x2ae   : > { %10836 = vst [vmem:[#allocation24_spill] sm:$0xff] %v10101_v58  ;;  %v5632_v26 = vrot.slane %v5630_v50, 4  ;;  %v7158_v57 = vrot.slane %v5532_v41, 9 }
 0x2b0   : > { %7834 = vmatmul.mubr.msk.bf16.gmra.mrb[16].mxu1 %vm1920_vm9, %v8344_v32  ;;  %v7155_v32 = vrot.slane %v5529_v63, 9  ;;  %v10116_v6 = vsel %vm9573_vm13, %v5632_v26, %v5633_v48  ;;  %v5640_v63 = vrot.slane %v9975_v15, 5  ;;  %v5646_v48 = vrot.slane %v5644_v38, 4  ;;  %v5533_v26 = vld [vmem:[#allocation2 + $0x9c] sm:$0xe] }
 0x2b1   : > { %7839 = vmatprep.mubr.msk.bf16.mxu1 %vm1920_vm9, %v9899_v13  ;;  %v10094_v13 = vsel %vm9573_vm13, %v7153_v19, %v5623_v5  ;;  %v10109_v19 = vsel %vm9573_vm13, %v7154_v20, %v5630_v50  ;;  %v7156_v5 = vrot.slane %v5530_v1, 9  ;;  %10838 = vst [vmem:[#allocation25_spill] sm:$0xff] %v10116_v6  ;;  %v5639_v50 = vrot.slane %v5637_v16, 4 }
 0x2b2   : > { %10835 = vst [vmem:[#allocation23_spill] sm:$0xff] %v10094_v13  ;;  %10837 = vst [vmem:[#allocation22_spill] sm:$0xff] %v10109_v19  ;;  %v5651_v1 = vrot.slane %v9996_v42, 5  ;;  %v10132_v15 = vsel %vm9573_vm13, %v7155_v32, %v5637_v16  ;;  %v5658_v32 = vrot.slane %v10112_v3, 5  ;;  %v5534_v16 = vld [vmem:[#allocation2 + $0xa8] sm:$0xe]  ;;  %v10155_v41 = vsel %vm9573_vm13, %v5646_v48, %v5647_v49 }
 0x2b3   : > { %10839 = vst [vmem:[#allocation26_spill] sm:$0xff] %v10132_v15  ;;  %v10136_v8 = vsel %vm9573_vm13, %v7156_v5, %v5644_v38  ;;  %v10142_v20 = vsel %vm9573_vm13, %v5639_v50, %v5640_v63  ;;  %v10149_v5 = vld [vmem:[#allocation2 + $0xac] sm:$0xf]  ;;  %10842 = vst [vmem:[#allocation28_spill] sm:$0xff] %v10155_v41  ;;  %v5661_v38 = vrot.slane %v10120_v35, 5  ;;  %v7159_v48 = vrot.slane %v5533_v26, 9 }
 0x2b4   : > { %10840 = vst [vmem:[#allocation27_spill] sm:$0xff] %v10136_v8  ;;  %10841 = vst [vmem:[#allocation29_spill] sm:$0xff] %v10142_v20  ;;  %v5653_v44 = vrot.slane %v5651_v1, 4  ;;  %v10159_v63 = vsel %vm9573_vm13, %v7157_v34, %v5651_v1  ;;  %v5535_v50 = vld [vmem:[#allocation2 + $0xb4] sm:$0xe]  ;;  %v5660_v49 = vrot.slane %v5658_v32, 4  ;;  %v10180_v15 = vsel %vm9573_vm13, %v7158_v57, %v5658_v32 }
 0x2b5   : > { %10843 = vst [vmem:[#allocation31_spill] sm:$0xff] %v10159_v63  ;;  %v10172_v20 = vld [vmem:[#allocation2 + $0xbc] sm:$0x1]  ;;  %v10174_v34 = vld [vmem:[#allocation2 + $0xc4] sm:$0xf]  ;;  %10845 = vst [vmem:[#allocation32_spill] sm:$0xff] %v10180_v15 }
 0x2b6   : > { %v5665_v6 = vrot.slane %v10126_v46, 5  ;;  %v5672_v26 = vrot.slane %v10149_v5, 5  ;;  %v7161_v41 = vrot.slane %v5535_v50, 9  ;;  %v5536_v8 = vld [vmem:[#allocation2 + $0xc0] sm:$0xe]  ;;  %v5679_v32 = vrot.slane %v10164_v37, 5 }
 0x2b7   : > { %v5537_v63 = vld [vmem:[#allocation2 + $0xcc] sm:$0xe]  ;;  %v5682_v19 = vrot.slane %v10172_v20, 5  ;;  %v10204_v1 = vld [vmem:[#allocation2 + $0xd4] sm:$0x1]  ;;  %v7162_v58 = vrot.slane %v5536_v8, 9 }
 0x2b8   : > { %7840 = vmatmul.mubr.msk.bf16.vlgmr.msra.gmra.mrb[20].mxu1 %vm1920_vm9, %v9944_v43  ;;  %v10170_v43 = vsel %vm9573_vm13, %v5653_v44, %v5654_v59  ;;  %v10185_v44 = vsel %vm9573_vm13, %v5660_v49, %v5661_v38  ;;  %v5668_v59 = vrot.slane %v10128_v61, 5  ;;  %v10197_v38 = vsel %vm9573_vm13, %v7159_v48, %v5665_v6  ;;  %v10225_v8 = vld [vmem:[#allocation2 + $0xd0] sm:$0xf] }
 0x2b9   : > { %7872 = vmatpush3.bf16.msra.mxu1 %v9903_v23  ;;  %7843 = vmatprep.mubr.msk.bf16.mxu1 %vm1920_vm9, %v9965_v33  ;;  %v10162_v23 = vld [vmem:[#allocation2 + $0xb0] sm:$0x1]  ;;  %10844 = vst [vmem:[#allocation30_spill] sm:$0xff] %v10170_v43  ;;  %v7160_v33 = vrot.slane %v5534_v16, 9  ;;  %10846 = vst [vmem:[#allocation33_spill] sm:$0xff] %v10185_v44  ;;  %v5667_v43 = vrot.slane %v5665_v6, 4  ;;  %v10221_v48 = vsel %vm9573_vm13, %v7161_v41, %v5679_v32 }
 0x2ba   : > { %v5675_v57 = vrot.slane %v10162_v23, 5  ;;  %v10193_v16 = vld [vmem:[#allocation2 + $0xc8] sm:$0x1]  ;;  %v5674_v50 = vrot.slane %v5672_v26, 4  ;;  %v5681_v15 = vrot.slane %v5679_v32, 4  ;;  %v5686_v13 = vrot.slane %v10174_v34, 5 }
 0x2bb   : > { %v10201_v49 = vsel %vm9573_vm13, %v7160_v33, %v5672_v26  ;;  %v10208_v44 = vsel %vm9573_vm13, %v5667_v43, %v5668_v59  ;;  %10848 = vst [vmem:[#allocation35_spill] sm:$0xff] %v10221_v48  ;;  %v7163_v43 = vrot.slane %v5537_v63, 9  ;;  %v5693_v63 = vrot.slane %v10225_v8, 5  ;;  %v10862_v52 = vld [vmem:[#allocation23_spill] sm:$0xff] }
 0x2bc   : > { %v10217_v33 = vsel %vm9573_vm13, %v5674_v50, %v5675_v57  ;;  %v10231_v59 = vsel %vm9573_vm13, %v5681_v15, %v5682_v19  ;;  %v5688_v26 = vrot.slane %v5686_v13, 4  ;;  %v5689_v57 = vrot.slane %v10193_v16, 5 }
 0x2bd   : > { %10847 = vst [vmem:[#allocation34_spill] sm:$0xff] %v10217_v33  ;;  %10849 = vst [vmem:[#allocation36_spill] sm:$0xff] %v10231_v59  ;;  %v5088_v50 = vshll.u32 %v10026_v55, 16  ;;  %v5094_v32 = vshll.u32 %v10112_v3, 16  ;;  %v10243_v19 = vsel %vm9573_vm13, %v7162_v58, %v5686_v13  ;;  %v10850_v6 = vshrl.u32 %v9996_v42, 16 }
 0x2be   : > { %v10247_v15 = vsel %vm9573_vm13, %v5688_v26, %v5689_v57  ;;  %v10255_v59 = vsel %vm9573_vm13, %v7163_v43, %v5693_v63  ;;  %v5695_v48 = vrot.slane %v5693_v63, 4  ;;  %v10852_v13 = vsel %vm9070_vm10, %v9998_v4, %v10002_v27  ;;  %v4829_v27 = vld [vmem:[#allocation2 + $0x9c] sm:$0xf] }
 0x2bf   : > { %v5076_v33 = vrot.slane %v10850_v6, 4  ;;  %10851 = vst [vmem:[#allocation37_spill] sm:$0xff] %v10255_v59  ;;  %v5025_v58 = vsel %vm9070_vm10, %v10033_v47, %v9972_v51  ;;  %v5035_v6 = vsel %vm9070_vm10, %v10035_v18, %v10037_v7  ;;  %v10854_v43 = vor.u32 %v10008_v62, %v10006_v53  ;;  %v4832_v47 = vld [vmem:[#allocation2 + $0xa8] sm:$0xf]  ;;  %v4835_v59 = vld [vmem:[#allocation2 + $0xb4] sm:$0xf] }
 0x2c0   : > { %7844 = vmatmul.mubr.msk.bf16.gmra.mrb[24].mxu1 %vm1920_vm9, %v10016_v29  ;;  %v5098_v29 = vshrl.u32 %v10112_v3, 16  ;;  %v10853_v3 = vsel %vm9070_vm10, %v9994_v25, %v9959_v2  ;;  %v10855_v26 = vor.u32 %v10012_v45, %v10010_v21  ;;  %v5067_v25 = vor.u32 %v10047_v56, %v10045_v40 }
 0x2c1   : > { %7847 = vmatprep.mubr.msk.bf16.mxu1 %vm1920_vm9, %v10018_v22  ;;  %v5696_v22 = vrot.slane %v10204_v1, 5  ;;  %v7122_v42 = vcombine.low %v10853_v3, %v10852_v13  ;;  %v5044_v4 = vrot.slane %v10854_v43, 4  ;;  %v10856_v57 = vshrl.u32 %v10026_v55, 16 }
 0x2c2   : > { %v5054_v2 = vrot.slane %v10855_v26, 4  ;;  %v5090_v18 = vrot.slane %v5088_v50, 5  ;;  %v10289_v7 = vrot.slane %v5094_v32, 5  ;;  %v5100_v53 = vrot.slane %v5098_v29, 4 }
 0x2c3   : > { %v5087_v51 = vrot.slane %v10856_v57, 4  ;;  %v10287_v63 = vsel %vm9573_vm13, %v5695_v48, %v5696_v22  ;;  %v10858_v45 = vshll.u32 %v10004_v36, 16  ;;  %v5077_v55 = vor.u32 %v5076_v33, %v10049_v14 }
 0x2c4   : > { %10857 = vst [vmem:[#allocation38_spill] sm:$0xff] %v10287_v63  ;;  %v5109_v56 = vshrl.u32 %v4829_v27, 16  ;;  %v5112_v13 = vshll.u32 %v4829_v27, 16  ;;  %v5118_v48 = vshll.u32 %v10126_v46, 16  ;;  %v5122_v50 = vshrl.u32 %v10126_v46, 16 }
 0x2c5   : > { %v5058_v40 = vrot.slane %v10858_v45, 5  ;;  %v5133_v29 = vshrl.u32 %v4832_v47, 16  ;;  %v5136_v22 = vshll.u32 %v4832_v47, 16  ;;  %v5049_v32 = vsel %vm9070_vm10, %v5044_v4, %v10010_v21 }
 0x2c6   : > { %v5142_v36 = vshll.u32 %v10149_v5, 16  ;;  %v5146_v33 = vshrl.u32 %v10149_v5, 16  ;;  %v5091_v43 = vor.u32 %v5090_v18, %v5087_v51  ;;  %v5101_v27 = vor.u32 %v5100_v53, %v10289_v7 }
 0x2c7   : > { %v5059_v3 = vsel %vm9070_vm10, %v5054_v2, %v5058_v40  ;;  %v5078_v46 = vrot.slane %v5077_v55, 4  ;;  %v5104_v26 = vshll.u32 %v10120_v35, 16  ;;  %v5111_v57 = vrot.slane %v5109_v56, 4 }
 0x2c8   : > { %7848 = vmatmul.mubr.msk.bf16.gmra.mrb[28].mxu1 %vm1920_vm9, %v10020_v10  ;;  %v5080_v10 = vshll.u32 %v10103_v9, 16  ;;  %v5114_v47 = vrot.slane %v5112_v13, 5  ;;  %v10311_v45 = vrot.slane %v5118_v48, 5  ;;  %v5124_v21 = vrot.slane %v5122_v50, 4  ;;  %v4838_v13 = vld [vmem:[#allocation2 + $0xc0] sm:$0xf] }
 0x2c9   : > { %7851 = vmatprep.mubr.msk.bf16.mxu1 %vm1920_vm9, %v7122_v42  ;;  %v5068_v42 = vrot.slane %v5067_v25, 4  ;;  %v5135_v9 = vrot.slane %v5133_v29, 4  ;;  %v5138_v4 = vrot.slane %v5136_v22, 5  ;;  %v7123_v62 = vcombine.low %v5025_v58, %v5035_v6 }
 0x2ca   : > { %v5082_v41 = vrot.slane %v5080_v10, 5  ;;  %v5144_v5 = vrot.slane %v5142_v36, 5  ;;  %v5148_v63 = vrot.slane %v5146_v33, 4  ;;  %v7124_v2 = vcombine.low %v5049_v32, %v5059_v3 }
 0x2cb   : > { %v5092_v25 = vrot.slane %v5091_v43, 4  ;;  %v5102_v51 = vrot.slane %v5101_v27, 4  ;;  %v5073_v35 = vsel %vm9070_vm10, %v5068_v42, %v10049_v14  ;;  %v5106_v53 = vrot.slane %v5104_v26, 5 }
 0x2cc   : > { %v5083_v18 = vsel %vm9070_vm10, %v5078_v46, %v5082_v41  ;;  %v5128_v40 = vshll.u32 %v10128_v61, 16  ;;  %v5115_v58 = vor.u32 %v5114_v47, %v5111_v57  ;;  %v5125_v6 = vor.u32 %v5124_v21, %v10311_v45 }
 0x2cd   : > { %v5139_v55 = vor.u32 %v5138_v4, %v5135_v9  ;;  %v5157_v56 = vshrl.u32 %v4835_v59, 16  ;;  %v5149_v48 = vor.u32 %v5148_v63, %v5144_v5  ;;  %v5166_v50 = vshll.u32 %v10164_v37, 16  ;;  %v4841_v4 = vld [vmem:[#allocation2 + $0xcc] sm:$0xf] }
 0x2ce   : > { %v5170_v14 = vshrl.u32 %v10164_v37, 16  ;;  %v7125_v29 = vcombine.low %v5073_v35, %v5083_v18  ;;  %v5097_v41 = vsel %vm9070_vm10, %v5092_v25, %v10289_v7  ;;  %v5107_v61 = vsel %vm9070_vm10, %v5102_v51, %v5106_v53 }
 0x2cf   : > { %v5152_v22 = vshll.u32 %v10162_v23, 16  ;;  %v5181_v32 = vshrl.u32 %v4838_v13, 16  ;;  %v5184_v10 = vshll.u32 %v4838_v13, 16  ;;  %v5190_v36 = vshll.u32 %v10174_v34, 16 }
 0x2d0   : > { %7852 = vmatmul.mubr.msk.bf16.gmra.mrb[32].mxu1 %vm1920_vm9, %v7123_v62  ;;  %v5160_v62 = vshll.u32 %v4835_v59, 16  ;;  %v5194_v59 = vshrl.u32 %v10174_v34, 16  ;;  %v5116_v63 = vrot.slane %v5115_v58, 4  ;;  %v5126_v33 = vrot.slane %v5125_v6, 4 }
 0x2d1   : > { %7855 = vmatprep.mubr.msk.bf16.mxu1 %vm1920_vm9, %v7124_v2  ;;  %v5140_v3 = vrot.slane %v5139_v55, 4  ;;  %v5159_v37 = vrot.slane %v5157_v56, 4  ;;  %v5150_v42 = vrot.slane %v5149_v48, 4  ;;  %v5168_v27 = vrot.slane %v5166_v50, 5 }
 0x2d2   : > { %v5162_v43 = vrot.slane %v5160_v62, 5  ;;  %v5172_v46 = vrot.slane %v5170_v14, 4  ;;  %v7126_v7 = vcombine.low %v5097_v41, %v5107_v61  ;;  %v5130_v26 = vrot.slane %v5128_v40, 5 }
 0x2d3   : > { %v5154_v57 = vrot.slane %v5152_v22, 5  ;;  %v5183_v23 = vrot.slane %v5181_v32, 4  ;;  %v5186_v47 = vrot.slane %v5184_v10, 5  ;;  %v5192_v21 = vrot.slane %v5190_v36, 5 }
 0x2d4   : > { %v5196_v9 = vrot.slane %v5194_v59, 4  ;;  %v5121_v34 = vsel %vm9070_vm10, %v5116_v63, %v10311_v45  ;;  %v5131_v2 = vsel %vm9070_vm10, %v5126_v33, %v5130_v26  ;;  %v5145_v25 = vsel %vm9070_vm10, %v5140_v3, %v5144_v5  ;;  %v5522_v26 = vld [vmem:[#allocation2 + $0x18] sm:$0xe] }
 0x2d5   : > { %v5155_v51 = vsel %vm9070_vm10, %v5150_v42, %v5154_v57  ;;  %v5163_v35 = vor.u32 %v5162_v43, %v5159_v37  ;;  %v5173_v18 = vor.u32 %v5172_v46, %v5168_v27  ;;  %v5205_v53 = vshrl.u32 %v4841_v4, 16 }
 0x2d6   : > { %v5208_v40 = vshll.u32 %v4841_v4, 16  ;;  %v5214_v58 = vshll.u32 %v10225_v8, 16  ;;  %v5218_v6 = vshrl.u32 %v10225_v8, 16  ;;  %v5187_v55 = vor.u32 %v5186_v47, %v5183_v23 }
 0x2d7   : > { %v5197_v56 = vor.u32 %v5196_v9, %v5192_v21  ;;  %v7127_v45 = vcombine.low %v5121_v34, %v5131_v2  ;;  %v5176_v13 = vshll.u32 %v10172_v20, 16  ;;  %v7128_v48 = vcombine.low %v5145_v25, %v5155_v51  ;;  %v6079_v9 = vld [vmem:[%s10737_s7] sm:$0x3] }
 0x2d8   : > { %7856 = vmatmul.mubr.msk.bf16.gmra.mrb[4].mxu1 %vm1920_vm9, %v7125_v29  ;;  %v5164_v62 = vrot.slane %v5163_v35, 4  ;;  %v5174_v50 = vrot.slane %v5173_v18, 4  ;;  %v5200_v5 = vshll.u32 %v10193_v16, 16  ;;  %v5207_v14 = vrot.slane %v5205_v53, 4  ;;  %8207 = vmatprep.subr.msk.bf16.mxu0 %vm1969_vm1, %v6079_v9 }
 0x2d9   : > { %7859 = vmatprep.mubr.msk.bf16.mxu1 %vm1920_vm9, %v7126_v7  ;;  %v5210_v29 = vrot.slane %v5208_v40, 5  ;;  %v5216_v41 = vrot.slane %v5214_v58, 5  ;;  %v5220_v61 = vrot.slane %v5218_v6, 4  ;;  %v5188_v22 = vrot.slane %v5187_v55, 4  ;;  %v10863_v55 = vld [vmem:[#allocation24_spill] sm:$0xff] }
 0x2da   : > { %v5198_v32 = vrot.slane %v5197_v56, 4  ;;  %v5178_v8 = vrot.slane %v5176_v13, 5  ;;  %v5169_v10 = vsel %vm9070_vm10, %v5164_v62, %v5168_v27  ;;  %v5202_v20 = vrot.slane %v5200_v5, 5  ;;  %v10866_v13 = vld [vmem:[#allocation25_spill] sm:$0xff]  ;;  %v10872_v62 = vld [vmem:[#allocation28_spill] sm:$0xff] }
 0x2db   : > { %v5211_v59 = vor.u32 %v5210_v29, %v5207_v14  ;;  %v5221_v16 = vor.u32 %v5220_v61, %v5216_v41  ;;  %v5224_v63 = vshll.u32 %v10204_v1, 16  ;;  %v5193_v33 = vsel %vm9070_vm10, %v5188_v22, %v5192_v21  ;;  %v10877_v14 = vld [vmem:[#allocation32_spill] sm:$0xff]  ;;  %v10878_v29 = vld [vmem:[#allocation33_spill] sm:$0xff]  ;;  %v10881_v22 = vld [vmem:[#allocation34_spill] sm:$0xff] }
 0x2dc   : > { %v5179_v36 = vsel %vm9070_vm10, %v5174_v50, %v5178_v8  ;;  %v5203_v3 = vsel %vm9070_vm10, %v5198_v32, %v5202_v20  ;;  %v5588_v37 = vrot.slane %v9854_v54, 5  ;;  %v7148_v1 = vrot.slane %v5522_v26, 9  ;;  %v10875_v50 = vld [vmem:[#allocation30_spill] sm:$0xff]  ;;  %v10883_v8 = vld [vmem:[#allocation35_spill] sm:$0xff] }
 0x2dd   : > { %v7129_v42 = vcombine.low %v5169_v10, %v5179_v36  ;;  %v7130_v43 = vcombine.low %v5193_v33, %v5203_v3  ;;  %v5212_v46 = vrot.slane %v5211_v59, 4  ;;  %v5222_v27 = vrot.slane %v5221_v16, 4  ;;  %v10884_v10 = vld [vmem:[#allocation36_spill] sm:$0xff]  ;;  %v10887_v59 = vld [vmem:[#allocation37_spill] sm:$0xff]  ;;  %v10888_v16 = vld [vmem:[#allocation38_spill] sm:$0xff] }
 0x2de   : > { %v5226_v7 = vrot.slane %v5224_v63, 5  ;;  %v5590_v57 = vrot.slane %v5588_v37, 4  ;;  %v5591_v23 = vrot.slane %v9866_v39, 5  ;;  %v5595_v21 = vrot.slane %v9863_v12, 5 }
 0x2df   : > { %v5217_v47 = vsel %vm9070_vm10, %v5212_v46, %v5216_v41  ;;  %v6136_v34 = vsel %vm1969_vm1, %v6079_v9, 0  ;;  %v5589_v2 = vsel %vm9573_vm13, %v7148_v1, %v5588_v37  ;;  %v7149_v12 = vrot.slane %v5523_v17, 9 }
 0x2e0   : > { %7860 = vmatmul.mubr.msk.bf16.gmra.mrb[8].mxu1 %vm1920_vm9, %v7127_v45  ;;  %v5227_v54 = vsel %vm9070_vm10, %v5222_v27, %v5226_v7  ;;  %v5592_v4 = vsel %vm9573_vm13, %v5590_v57, %v5591_v23  ;;  %7906 = vmatpush3.bf16.msra.mxu0 %v6136_v34  ;;  %v5597_v51 = vrot.slane %v5595_v21, 4  ;;  %v5598_v35 = vrot.slane %v9878_v30, 5  ;;  %v10865_v45 = vld [vmem:[#allocation22_spill] sm:$0xff] }
 0x2e1   : > { %7863 = vmatprep.mubr.msk.bf16.mxu1 %vm1920_vm9, %v7128_v48  ;;  %v7131_v39 = vcombine.low %v5217_v47, %v5227_v54  ;;  %v7165_v25 = vcombine.low %v5589_v2, %v5592_v4  ;;  %v5596_v53 = vsel %vm9573_vm13, %v7149_v12, %v5595_v21  ;;  %v10859_v58 = vcombine.low %v10056_v11, %v10061_v0  ;;  %v10868_v0 = vld [vmem:[#allocation26_spill] sm:$0xff]  ;;  %v10869_v48 = vld [vmem:[#allocation29_spill] sm:$0xff] }
 0x2e2   : > { %v5599_v18 = vsel %vm9573_vm13, %v5597_v51, %v5598_v35  ;;  %v10860_v6 = vcombine.low %v10072_v28, %v10082_v60  ;;  %v10861_v30 = vcombine.low %v10076_v24, %v10090_v31  ;;  %v10864_v56 = vcombine.low %v10862_v52, %v10863_v55  ;;  %v10871_v60 = vld [vmem:[#allocation27_spill] sm:$0xff] }
 0x2e3   : > { %v7166_v40 = vcombine.low %v5596_v53, %v5599_v18  ;;  %v10867_v11 = vcombine.low %v10865_v45, %v10866_v13  ;;  %v10870_v28 = vcombine.low %v10868_v0, %v10869_v48  ;;  %v10873_v24 = vcombine.low %v10871_v60, %v10872_v62  ;;  %v10874_v31 = vld [vmem:[#allocation31_spill] sm:$0xff] }
 0x2e4   : > { %v10876_v5 = vcombine.low %v10874_v31, %v10875_v50  ;;  %v10879_v41 = vcombine.low %v10877_v14, %v10878_v29  ;;  %v10880_v61 = vcombine.low %v10197_v38, %v10208_v44  ;;  %v10882_v32 = vcombine.low %v10201_v49, %v10881_v22 }
 0x2e5   : > { %v10885_v20 = vcombine.low %v10883_v8, %v10884_v10  ;;  %v10886_v36 = vcombine.low %v10243_v19, %v10247_v15  ;;  %v10889_v44 = vcombine.low %v10887_v59, %v10888_v16 }
 0x2e8   : > { %7864 = vmatmul.mubr.msk.bf16.gmra.mrb[12].mxu1 %vm1920_vm9, %v7129_v42 }
 0x2e9   : > { %7867 = vmatprep.mubr.msk.bf16.mxu1 %vm1920_vm9, %v7130_v43 }
 0x2f0   : > { %7868 = vmatmul.mubr.msk.bf16.gmra.mrb[16].mxu1 %vm1920_vm9, %v7131_v39 }
 0x2f1   : > { %7873 = vmatprep.mubr.msk.bf16.mxu1 %vm1920_vm9, %v7165_v25 }
 0x2f8   : > { %7874 = vmatmul.mubr.msk.bf16.vlgmr.msra.gmra.mrb[20].mxu1 %vm1920_vm9, %v7166_v40 }
 0x2f9   : > { %7877 = vmatprep.mubr.msk.bf16.mxu1 %vm1920_vm9, %v10859_v58  ;;  %v10483_v58 = vld [vmem:[%s10736_s6] ss:$0 sm:$0xff] }
 0x300   : > { %7878 = vmatmul.mubr.msk.bf16.gmra.mrb[24].mxu1 %vm1920_vm9, %v10860_v6 }
 0x301   : > { %7881 = vmatprep.mubr.msk.bf16.mxu1 %vm1920_vm9, %v10861_v30 }
 0x308   : > { %7882 = vmatmul.mubr.msk.bf16.gmra.mrb[28].mxu1 %vm1920_vm9, %v10864_v56 }
 0x309   : > { %7885 = vmatprep.mubr.msk.bf16.mxu1 %vm1920_vm9, %v10867_v11 }
 0x310   : > { %7886 = vmatmul.mubr.msk.bf16.gmra.mrb[32].mxu1 %vm1920_vm9, %v10870_v28 }
 0x311   : > { %7889 = vmatprep.mubr.msk.bf16.mxu1 %vm1920_vm9, %v10873_v24 }
 0x318   : > { %7890 = vmatmul.mubr.msk.bf16.gmra.mrb[4].mxu1 %vm1920_vm9, %v10876_v5 }
 0x319   : > { %7893 = vmatprep.mubr.msk.bf16.mxu1 %vm1920_vm9, %v10879_v41 }
 0x320   : > { %7894 = vmatmul.mubr.msk.bf16.gmra.mrb[8].mxu1 %vm1920_vm9, %v10880_v61 }
 0x321   : > { %7897 = vmatprep.mubr.msk.bf16.mxu1 %vm1920_vm9, %v10882_v32 }
 0x328   : > { %7898 = vmatmul.mubr.msk.bf16.gmra.mrb[12].mxu1 %vm1920_vm9, %v10885_v20 }
 0x329   : > { %7901 = vmatprep.mubr.msk.bf16.mxu1 %vm1920_vm9, %v10886_v36 }
 0x330   : > { %7902 = vmatmul.mubr.msk.bf16.gmra.mrb[16].mxu1 %vm1920_vm9, %v10889_v44  ;;  %v10440_v38 = vpop.f32.mrb[48].mxu0 }
 0x331   : > { %v10442_v49 = vpop.f32.mrb[49].mxu0 }
 0x332   : > { %v10444_v63 = vpop.f32.mrb[50].mxu0 }
 0x333   : > { %v10446_v33 = vpop.f32.mrb[51].mxu0 }
 0x338   : > { %v10448_v3 = vpop.f32.mrb[52].mxu0 }
 0x339   : > { %v10450_v37 = vpop.f32.mrb[53].mxu0 }
 0x33a   : > { %v10452_v19 = vpop.f32.mrb[54].mxu0 }
 0x33b   : > { %v10454_v15 = vpop.f32.mrb[55].mxu0 }
 0x340   : > { %v10456_v42 = vpop.f32.mrb[56].mxu0 }
 0x341   : > { %v10458_v43 = vpop.f32.mrb[57].mxu0 }
 0x342   : > { %v10460_v46 = vpop.f32.mrb[58].mxu0 }
 0x343   : > { %v10462_v27 = vpop.f32.mrb[59].mxu0 }
 0x348   : > { %v10464_v7 = vpop.f32.mrb[60].mxu0 }
 0x349   : > { %v10466_v26 = vpop.f32.mrb[61].mxu0 }
 0x34a   : > { %v10468_v57 = vpop.f32.mrb[62].mxu0 }
 0x34b   : > { %v10470_v1 = vpop.f32.mrb[63].mxu0 }
 0x350   : > { %v7705_v23 = vpop.f32.mrb[32].mxu0 }
 0x351   : > { %v3082_v47 = vpop.f32.mrb[33].mxu0 }
 0x352   : > { %v7706_v54 = vpop.f32.mrb[34].mxu0 }
 0x353   : > { %v3085_v21 = vpop.f32.mrb[35].mxu0 }
 0x358   : > { %v7709_v9 = vpop.f32.mrb[36].mxu0 }
 0x359   : > { %v3098_v4 = vpop.f32.mrb[37].mxu0 }
 0x35a   : > { %v7710_v34 = vpop.f32.mrb[38].mxu0 }
 0x35b   : > { %v3101_v39 = vpop.f32.mrb[39].mxu0 }
 0x360   : > { %v7713_v2 = vpop.f32.mrb[40].mxu0 }
 0x361   : > { %v3114_v17 = vpop.f32.mrb[41].mxu0 }
 0x362   : > { %v7714_v25 = vpop.f32.mrb[42].mxu0 }
 0x363   : > { %v3117_v51 = vpop.f32.mrb[43].mxu0 }
 0x368   : > { %v10472_v12 = vpop.f32.mrb[44].mxu0 }
 0x369   : > { %v10474_v35 = vpop.f32.mrb[45].mxu0 }
 0x36a   : > { %v10476_v18 = vpop.f32.mrb[46].mxu0 }
 0x36b   : > { %v10478_v53 = vpop.f32.mrb[47].mxu0 }
 0x3cb   : > { %v7875_v40 = vpop.f32.mrb[20].mxu1 }
 0x3cc   : > { %v7941_v6 = vadd.f32 %v7875_v40, %v7705_v23  ;;  %v5833_v30 = vpop.f32.mrb[21].mxu1 }
 0x3cd   : > { %v7942_v52 = vadd.f32 %v5833_v30, %v3082_v47  ;;  %v7876_v55 = vpop.f32.mrb[22].mxu1 }
 0x3ce   : > { %v6001_v56 = vadd.f32 %v7941_v6, %v10483_v58  ;;  %v7943_v45 = vadd.f32 %v7876_v55, %v7706_v54  ;;  %v5836_v13 = vpop.f32.mrb[23].mxu1 }
 0x3cf   : > { %v5999_v11 = vadd.f32 %v7942_v52, %v10483_v58  ;;  %v7944_v0 = vadd.f32 %v5836_v13, %v3085_v21 }
 0x3d0   : > { %v6002_v48 = vadd.f32 %v7943_v45, %v10483_v58  ;;  %v6033_v60 = vmax.f32 %v6001_v56, 0.0 }
 0x3d1   : > { %v6000_v28 = vadd.f32 %v7944_v0, %v10483_v58  ;;  %v6031_v24 = vmax.f32 %v5999_v11, 0.0 }
 0x3d2   : > { %v6034_v62 = vmax.f32 %v6002_v48, 0.0 }
 0x3d3   : > { %v6032_v31 = vmax.f32 %v6000_v28, 0.0  ;;  %v7879_v50 = vpop.f32.mrb[24].mxu1 }
 0x3d4   : > { %v6064_v5 = vpack.c.bf16 %v6034_v62, %v6033_v60  ;;  %v7945_v14 = vadd.f32 %v7879_v50, %v7709_v9  ;;  %v5849_v29 = vpop.f32.mrb[25].mxu1 }
 0x3d5   : > { %v6063_v41 = vpack.c.bf16 %v6032_v31, %v6031_v24  ;;  %v7946_v61 = vadd.f32 %v5849_v29, %v3098_v4  ;;  %v7880_v22 = vpop.f32.mrb[26].mxu1 }
 0x3d6   : > { %v6005_v32 = vadd.f32 %v7945_v14, %v10483_v58  ;;  %v7947_v8 = vadd.f32 %v7880_v22, %v7710_v34  ;;  %v5852_v10 = vpop.f32.mrb[27].mxu1 }
 0x3d7   : > { %v6003_v20 = vadd.f32 %v7946_v61, %v10483_v58  ;;  %v7948_v36 = vadd.f32 %v5852_v10, %v3101_v39  ;;  %7907 = vmatprep.mubr.msk.bf16.mxu0 %vm1920_vm9, %v6063_v41 }
 0x3d8   : > { %v6006_v59 = vadd.f32 %v7947_v8, %v10483_v58  ;;  %7908 = vmatmul.mubr.msk.bf16.vlgmr.msra.gmra.mrb[64].mxu0 %vm1920_vm9, %v6064_v5  ;;  %v6037_v44 = vmax.f32 %v6005_v32, 0.0 }
 0x3d9   : > { %v6004_v16 = vadd.f32 %v7948_v36, %v10483_v58  ;;  %v6035_v47 = vmax.f32 %v6003_v20, 0.0 }
 0x3da   : > { %v6038_v23 = vmax.f32 %v6006_v59, 0.0 }
 0x3db   : > { %v6036_v54 = vmax.f32 %v6004_v16, 0.0  ;;  %v7883_v21 = vpop.f32.mrb[28].mxu1 }
 0x3dc   : > { %v6066_v9 = vpack.c.bf16 %v6038_v23, %v6037_v44  ;;  %v7949_v4 = vadd.f32 %v7883_v21, %v7713_v2  ;;  %v5865_v34 = vpop.f32.mrb[29].mxu1 }
 0x3dd   : > { %v6065_v40 = vpack.c.bf16 %v6036_v54, %v6035_v47  ;;  %v7950_v6 = vadd.f32 %v5865_v34, %v3114_v17  ;;  %v7884_v30 = vpop.f32.mrb[30].mxu1 }
 0x3de   : > { %v6009_v39 = vadd.f32 %v7949_v4, %v10483_v58  ;;  %v7951_v52 = vadd.f32 %v7884_v30, %v7714_v25  ;;  %v5868_v55 = vpop.f32.mrb[31].mxu1 }
 0x3df   : > { %v6007_v56 = vadd.f32 %v7950_v6, %v10483_v58  ;;  %v7952_v45 = vadd.f32 %v5868_v55, %v3117_v51  ;;  %7911 = vmatprep.mubr.msk.bf16.mxu0 %vm1920_vm9, %v6065_v40 }
 0x3e0   : > { %v6010_v13 = vadd.f32 %v7951_v52, %v10483_v58  ;;  %7912 = vmatmul.mubr.msk.bf16.gmra.mrb[68].mxu0 %vm1920_vm9, %v6066_v9  ;;  %v6041_v2 = vmax.f32 %v6009_v39, 0.0 }
 0x3e1   : > { %v6008_v11 = vadd.f32 %v7952_v45, %v10483_v58  ;;  %v6039_v48 = vmax.f32 %v6007_v56, 0.0 }
 0x3e2   : > { %v6042_v0 = vmax.f32 %v6010_v13, 0.0 }
 0x3e3   : > { %v6040_v17 = vmax.f32 %v6008_v11, 0.0  ;;  %v7887_v28 = vpop.f32.mrb[32].mxu1 }
 0x3e4   : > { %v6068_v60 = vpack.c.bf16 %v6042_v0, %v6041_v2  ;;  %v7953_v25 = vadd.f32 %v7887_v28, %v10472_v12  ;;  %v5881_v62 = vpop.f32.mrb[33].mxu1 }
 0x3e5   : > { %v6067_v24 = vpack.c.bf16 %v6040_v17, %v6039_v48  ;;  %v7954_v51 = vadd.f32 %v5881_v62, %v10474_v35  ;;  %v7888_v31 = vpop.f32.mrb[34].mxu1 }
 0x3e6   : > { %v6013_v50 = vadd.f32 %v7953_v25, %v10483_v58  ;;  %v7955_v5 = vadd.f32 %v7888_v31, %v10476_v18  ;;  %v5884_v14 = vpop.f32.mrb[35].mxu1 }
 0x3e7   : > { %v6011_v29 = vadd.f32 %v7954_v51, %v10483_v58  ;;  %v7956_v41 = vadd.f32 %v5884_v14, %v10478_v53  ;;  %7915 = vmatprep.mubr.msk.bf16.mxu0 %vm1920_vm9, %v6067_v24 }
 0x3e8   : > { %v6014_v61 = vadd.f32 %v7955_v5, %v10483_v58  ;;  %7916 = vmatmul.mubr.msk.bf16.gmra.mrb[72].mxu0 %vm1920_vm9, %v6068_v60  ;;  %v6045_v22 = vmax.f32 %v6013_v50, 0.0 }
 0x3e9   : > { %v6012_v12 = vadd.f32 %v7956_v41, %v10483_v58  ;;  %v6043_v32 = vmax.f32 %v6011_v29, 0.0 }
 0x3ea   : > { %v6046_v35 = vmax.f32 %v6014_v61, 0.0 }
 0x3eb   : > { %v6044_v8 = vmax.f32 %v6012_v12, 0.0  ;;  %v7891_v10 = vpop.f32.mrb[4].mxu1 }
 0x3ec   : > { %v6070_v20 = vpack.c.bf16 %v6046_v35, %v6045_v22  ;;  %v7957_v18 = vadd.f32 %v7891_v10, %v10440_v38  ;;  %v5897_v36 = vpop.f32.mrb[5].mxu1 }
 0x3ed   : > { %v6069_v59 = vpack.c.bf16 %v6044_v8, %v6043_v32  ;;  %v7958_v53 = vadd.f32 %v5897_v36, %v10442_v49  ;;  %v7892_v16 = vpop.f32.mrb[6].mxu1 }
 0x3ee   : > { %v6017_v44 = vadd.f32 %v7957_v18, %v10483_v58  ;;  %v7959_v23 = vadd.f32 %v7892_v16, %v10444_v63  ;;  %v5900_v47 = vpop.f32.mrb[7].mxu1 }
 0x3ef   : > { %v6015_v54 = vadd.f32 %v7958_v53, %v10483_v58  ;;  %v7960_v21 = vadd.f32 %v5900_v47, %v10446_v33  ;;  %7919 = vmatprep.mubr.msk.bf16.mxu0 %vm1920_vm9, %v6069_v59 }
 0x3f0   : > { %v6018_v9 = vadd.f32 %v7959_v23, %v10483_v58  ;;  %7920 = vmatmul.mubr.msk.bf16.gmra.mrb[76].mxu0 %vm1920_vm9, %v6070_v20  ;;  %v6049_v4 = vmax.f32 %v6017_v44, 0.0 }
 0x3f1   : > { %v6016_v38 = vadd.f32 %v7960_v21, %v10483_v58  ;;  %v6047_v34 = vmax.f32 %v6015_v54, 0.0 }
 0x3f2   : > { %v6050_v49 = vmax.f32 %v6018_v9, 0.0  ;;  %v7354_v9 = vld [vmem:[%s8836_s27 + $0x8] sm:$0xff]  }
 0x3f3   : > { %v6048_v40 = vmax.f32 %v6016_v38, 0.0  ;;  %v7895_v6 = vpop.f32.mrb[8].mxu1  ;;  %v10558_v38 = vld [vmem:[%s10738_s8] ss:$0 sm:$0xff] }
 0x3f4   : > { %v6072_v30 = vpack.c.bf16 %v6050_v49, %v6049_v4  ;;  %v7961_v63 = vadd.f32 %v7895_v6, %v10448_v3  ;;  %v5913_v39 = vpop.f32.mrb[9].mxu1  ;;  %v7295_v4 = vunpack.c.l.bf16 %v7354_v9  ;;  %v7296_v6 = vunpack.c.h.bf16 %v7354_v9 }
 0x3f5   : > { %v6071_v52 = vpack.c.bf16 %v6048_v40, %v6047_v34  ;;  %v7962_v33 = vadd.f32 %v5913_v39, %v10450_v37  ;;  %v7896_v55 = vpop.f32.mrb[10].mxu1 }
 0x3f6   : > { %v6021_v56 = vadd.f32 %v7961_v63, %v10483_v58  ;;  %v7963_v45 = vadd.f32 %v7896_v55, %v10452_v19  ;;  %v5916_v13 = vpop.f32.mrb[11].mxu1 }
 0x3f7   : > { %v6019_v11 = vadd.f32 %v7962_v33, %v10483_v58  ;;  %v7964_v2 = vadd.f32 %v5916_v13, %v10454_v15  ;;  %7923 = vmatprep.mubr.msk.bf16.mxu0 %vm1920_vm9, %v6071_v52  ;;  %v7356_v13 = vld [vmem:[%s8836_s27 + $0x18] sm:$0xff]  }
 0x3f8   : > { %v6022_v0 = vadd.f32 %v7963_v45, %v10483_v58  ;;  %7924 = vmatmul.mubr.msk.bf16.gmra.mrb[80].mxu0 %vm1920_vm9, %v6072_v30  ;;  %v6053_v48 = vmax.f32 %v6021_v56, 0.0 }
 0x3f9   : > { %v6020_v3 = vadd.f32 %v7964_v2, %v10483_v58  ;;  %v6051_v17 = vmax.f32 %v6019_v11, 0.0 }
 0x3fa   : > { %v6054_v37 = vmax.f32 %v6022_v0, 0.0  ;;  %v7355_v0 = vld [vmem:[%s8836_s27 + $0x10] sm:$0xff]  }
 0x3fb   : > { %v6052_v28 = vmax.f32 %v6020_v3, 0.0  ;;  %v7899_v60 = vpop.f32.mrb[12].mxu1 }
 0x3fc   : > { %v6074_v25 = vpack.c.bf16 %v6054_v37, %v6053_v48  ;;  %v7965_v19 = vadd.f32 %v7899_v60, %v10456_v42  ;;  %v5929_v62 = vpop.f32.mrb[13].mxu1 }
 0x3fd   : > { %v6073_v24 = vpack.c.bf16 %v6052_v28, %v6051_v17  ;;  %v7966_v15 = vadd.f32 %v5929_v62, %v10458_v43  ;;  %v7900_v51 = vpop.f32.mrb[14].mxu1  ;;  %v7303_v28 = vunpack.c.l.bf16 %v7356_v13  ;;  %v7299_v62 = vunpack.c.l.bf16 %v7355_v0 }
 0x3fe   : > { %v6025_v31 = vadd.f32 %v7965_v19, %v10483_v58  ;;  %v7967_v50 = vadd.f32 %v7900_v51, %v10460_v46  ;;  %v5932_v5 = vpop.f32.mrb[15].mxu1 }
 0x3ff   : > { %v6023_v14 = vadd.f32 %v7966_v15, %v10483_v58  ;;  %v7968_v29 = vadd.f32 %v5932_v5, %v10462_v27  ;;  %7927 = vmatprep.mubr.msk.bf16.mxu0 %vm1920_vm9, %v6073_v24 }
 0x400   : > { %v6026_v41 = vadd.f32 %v7967_v50, %v10483_v58  ;;  %7928 = vmatmul.mubr.msk.bf16.gmra.mrb[84].mxu0 %vm1920_vm9, %v6074_v25  ;;  %v6057_v61 = vmax.f32 %v6025_v31, 0.0  ;;  %v7304_v31 = vunpack.c.h.bf16 %v7356_v13 }
 0x401   : > { %v6024_v42 = vadd.f32 %v7968_v29, %v10483_v58  ;;  %v6055_v12 = vmax.f32 %v6023_v14, 0.0  ;;  %v7300_v29 = vunpack.c.h.bf16 %v7355_v0 }
 0x402   : > { %v6058_v43 = vmax.f32 %v6026_v41, 0.0 }
 0x403   : > { %v6056_v22 = vmax.f32 %v6024_v42, 0.0  ;;  %v7903_v35 = vpop.f32.mrb[16].mxu1 }
 0x404   : > { %v6076_v32 = vpack.c.bf16 %v6058_v43, %v6057_v61  ;;  %v7969_v46 = vadd.f32 %v7903_v35, %v10464_v7  ;;  %v5945_v8 = vpop.f32.mrb[17].mxu1 }
 0x405   : > { %v6075_v10 = vpack.c.bf16 %v6056_v22, %v6055_v12  ;;  %v7970_v27 = vadd.f32 %v5945_v8, %v10466_v26  ;;  %v7904_v20 = vpop.f32.mrb[18].mxu1  ;;  %v7358_v22 = vld [vmem:[%s8836_s27 + $0x28] sm:$0xff]  }
 0x406   : > { %v6029_v18 = vadd.f32 %v7969_v46, %v10483_v58  ;;  %v7971_v36 = vadd.f32 %v7904_v20, %v10468_v57  ;;  %v5948_v59 = vpop.f32.mrb[19].mxu1  ;;  %v7357_v46 = vld [vmem:[%s8836_s27 + $0x20] sm:$0xff]  }
 0x407   : > { %v6027_v53 = vadd.f32 %v7970_v27, %v10483_v58  ;;  %v7972_v16 = vadd.f32 %v5948_v59, %v10470_v1  ;;  %7931 = vmatprep.mubr.msk.bf16.mxu0 %vm1920_vm9, %v6075_v10  ;;  %v7290_v1 = vld [vmem:[%s8836_s27] sm:$0xff]  }
 0x408   : > { %v6030_v7 = vadd.f32 %v7971_v36, %v10483_v58  ;;  %7932 = vmatmul.mubr.msk.bf16.gmra.mrb[88].mxu0 %vm1920_vm9, %v6076_v32  ;;  %v6061_v44 = vmax.f32 %v6029_v18, 0.0  ;;  %v7291_v49 = vunpack.c.l.bf16 %v7290_v1  ;;  %v7292_v39 = vunpack.c.h.bf16 %v7290_v1 }
 0x409   : > { %v6028_v26 = vadd.f32 %v7972_v16, %v10483_v58  ;;  %v6059_v47 = vmax.f32 %v6027_v53, 0.0  ;;  %v7311_v18 = vunpack.c.l.bf16 %v7358_v22  ;;  %v7307_v16 = vunpack.c.l.bf16 %v7357_v46 }
 0x40a   : > { %v6062_v23 = vmax.f32 %v6030_v7, 0.0 }
 0x40b   : > { %v6060_v54 = vmax.f32 %v6028_v26, 0.0 }
 0x40c   : > { %v6078_v57 = vpack.c.bf16 %v6062_v23, %v6061_v44  ;;  %v7312_v23 = vunpack.c.h.bf16 %v7358_v22 }
 0x40d   : > { %v6077_v21 = vpack.c.bf16 %v6060_v54, %v6059_v47 }
 0x40f   : > { %7935 = vmatprep.mubr.msk.bf16.mxu0 %vm1920_vm9, %v6077_v21  ;;  %v7308_v21 = vunpack.c.h.bf16 %v7357_v46 }
 0x410   : > { %7936 = vmatmul.mubr.msk.bf16.gmra.mrb[92].mxu0 %vm1920_vm9, %v6078_v57 }
 0x4ab   : > { %v7909_v58 = vpop.f32.mrb[64].mxu0 }
 0x4ac   : > { %v6181_v34 = vadd.f32 %v7909_v58, %v10558_v38  ;;  %v6172_v40 = vpop.f32.mrb[65].mxu0 }
 0x4ad   : > { %v6173_v30 = vadd.f32 %v10558_v38, %v6172_v40  ;;  %v7910_v63 = vpop.f32.mrb[66].mxu0 }
 0x4ae   : > { %v6365_v52 = vadd.f32 %v7295_v4, %v6181_v34  ;;  %v6184_v33 = vadd.f32 %v7910_v63, %v10558_v38  ;;  %v6175_v55 = vpop.f32.mrb[67].mxu0  ;;  %v7360_v34 = vld [vmem:[%s8836_s27 + $0x38] sm:$0xff]  }
 0x4af   : > { %v6363_v56 = vadd.f32 %v7291_v49, %v6173_v30  ;;  %v6176_v45 = vadd.f32 %v10558_v38, %v6175_v55  ;;  %v7359_v30 = vld [vmem:[%s8836_s27 + $0x30] sm:$0xff]   ;;  %v7319_v55 = vunpack.c.l.bf16 %v7360_v34 }
 0x4b0   : > { %v6397_v11 = vmax.f32 %v6365_v52, 0.0  ;;  %v6366_v2 = vadd.f32 %v7296_v6, %v6184_v33 }
 0x4b1   : > { %v6395_v3 = vmax.f32 %v6363_v56, 0.0  ;;  %v6364_v48 = vadd.f32 %v7292_v39, %v6176_v45 }
 0x4b2   : > { %v7258_v37 = vpack.c.bf16 %v6397_v11, %v6397_v11  ;;  %v6398_v17 = vmax.f32 %v6366_v2, 0.0  ;;  %v7315_v11 = vunpack.c.l.bf16 %v7359_v30 }
 0x4b3   : > { %v7256_v60 = vpack.c.bf16 %v6395_v3, %v6395_v3  ;;  %v6396_v25 = vmax.f32 %v6364_v48, 0.0  ;;  %v7913_v19 = vpop.f32.mrb[68].mxu0  ;;  %v7320_v48 = vunpack.c.h.bf16 %v7360_v34 }
 0x4b4   : > { %6558 = vst.msk [vmem:[%s10568_s11 + $0x8] sm:$0xf] %vm6555_vm14, %v7258_v37  ;;  %v7259_v24 = vpack.c.bf16 %v6398_v17, %v6398_v17  ;;  %v6197_v15 = vadd.f32 %v7913_v19, %v10558_v38  ;;  %v6188_v51 = vpop.f32.mrb[69].mxu0 }
 0x4b5   : > { %6556 = vst.msk [vmem:[%s10568_s11] sm:$0xf] %vm6555_vm14, %v7256_v60  ;;  %v7257_v50 = vpack.c.bf16 %v6396_v25, %v6396_v25  ;;  %v6189_v5 = vadd.f32 %v10558_v38, %v6188_v51  ;;  %v7914_v14 = vpop.f32.mrb[70].mxu0  ;;  %v7316_v60 = vunpack.c.h.bf16 %v7359_v30  ;;  %v7362_v51 = vld [vmem:[%s8836_s27 + $0x48] sm:$0xff]  }
 0x4b6   : > { %6559 = vst.msk [vmem:[%s10568_s11 + $0xc] sm:$0xf] %vm6555_vm14, %v7259_v24  ;;  %v6369_v41 = vadd.f32 %v7303_v28, %v6197_v15  ;;  %v6200_v42 = vadd.f32 %v7914_v14, %v10558_v38  ;;  %v6191_v61 = vpop.f32.mrb[71].mxu0 }
 0x4b7   : > { %6557 = vst.msk [vmem:[%s10568_s11 + $0x4] sm:$0xf] %vm6555_vm14, %v7257_v50  ;;  %v6367_v43 = vadd.f32 %v7299_v62, %v6189_v5  ;;  %v6192_v12 = vadd.f32 %v10558_v38, %v6191_v61  ;;  %v7361_v5 = vld [vmem:[%s8836_s27 + $0x40] sm:$0xff]   ;;  %v7327_v61 = vunpack.c.l.bf16 %v7362_v51 }
 0x4b8   : > { %v6401_v35 = vmax.f32 %v6369_v41, 0.0  ;;  %v6370_v32 = vadd.f32 %v7304_v31, %v6200_v42 }
 0x4b9   : > { %v6399_v8 = vmax.f32 %v6367_v43, 0.0  ;;  %v6368_v10 = vadd.f32 %v7300_v29, %v6192_v12 }
 0x4ba   : > { %v7262_v27 = vpack.c.bf16 %v6401_v35, %v6401_v35  ;;  %v6402_v20 = vmax.f32 %v6370_v32, 0.0  ;;  %v7323_v35 = vunpack.c.l.bf16 %v7361_v5 }
 0x4bb   : > { %v7260_v36 = vpack.c.bf16 %v6399_v8, %v6399_v8  ;;  %v6400_v59 = vmax.f32 %v6368_v10, 0.0  ;;  %v7917_v53 = vpop.f32.mrb[72].mxu0  ;;  %v7328_v10 = vunpack.c.h.bf16 %v7362_v51 }
 0x4bc   : > { %6562 = vst.msk [vmem:[%s10568_s11 + $0x18] sm:$0xf] %vm6555_vm14, %v7262_v27  ;;  %v7263_v7 = vpack.c.bf16 %v6402_v20, %v6402_v20  ;;  %v6213_v26 = vadd.f32 %v7917_v53, %v10558_v38  ;;  %v6204_v44 = vpop.f32.mrb[73].mxu0 }
 0x4bd   : > { %6560 = vst.msk [vmem:[%s10568_s11 + $0x10] sm:$0xf] %vm6555_vm14, %v7260_v36  ;;  %v7261_v47 = vpack.c.bf16 %v6400_v59, %v6400_v59  ;;  %v6205_v54 = vadd.f32 %v10558_v38, %v6204_v44  ;;  %v7918_v57 = vpop.f32.mrb[74].mxu0  ;;  %v7324_v36 = vunpack.c.h.bf16 %v7361_v5  ;;  %v7364_v44 = vld [vmem:[%s8836_s27 + $0x58] sm:$0xff]  }
 0x4be   : > { %6563 = vst.msk [vmem:[%s10568_s11 + $0x1c] sm:$0xf] %vm6555_vm14, %v7263_v7  ;;  %v6373_v9 = vadd.f32 %v7311_v18, %v6213_v26  ;;  %v6216_v1 = vadd.f32 %v7918_v57, %v10558_v38  ;;  %v6207_v4 = vpop.f32.mrb[75].mxu0 }
 0x4bf   : > { %6561 = vst.msk [vmem:[%s10568_s11 + $0x14] sm:$0xf] %vm6555_vm14, %v7261_v47  ;;  %v6371_v58 = vadd.f32 %v7307_v16, %v6205_v54  ;;  %v6208_v49 = vadd.f32 %v10558_v38, %v6207_v4  ;;  %v7363_v54 = vld [vmem:[%s8836_s27 + $0x50] sm:$0xff]   ;;  %v7335_v4 = vunpack.c.l.bf16 %v7364_v44 }
 0x4c0   : > { %v6405_v40 = vmax.f32 %v6373_v9, 0.0  ;;  %v6374_v6 = vadd.f32 %v7312_v23, %v6216_v1 }
 0x4c1   : > { %v6403_v63 = vmax.f32 %v6371_v58, 0.0  ;;  %v6372_v39 = vadd.f32 %v7308_v21, %v6208_v49 }
 0x4c2   : > { %v7266_v52 = vpack.c.bf16 %v6405_v40, %v6405_v40  ;;  %v6406_v33 = vmax.f32 %v6374_v6, 0.0  ;;  %v7331_v40 = vunpack.c.l.bf16 %v7363_v54 }
 0x4c3   : > { %v7264_v56 = vpack.c.bf16 %v6403_v63, %v6403_v63  ;;  %v6404_v45 = vmax.f32 %v6372_v39, 0.0  ;;  %v7921_v13 = vpop.f32.mrb[76].mxu0  ;;  %v7336_v39 = vunpack.c.h.bf16 %v7364_v44 }
 0x4c4   : > { %6566 = vst.msk [vmem:[%s10568_s11 + $0x28] sm:$0xf] %vm6555_vm14, %v7266_v52  ;;  %v7267_v2 = vpack.c.bf16 %v6406_v33, %v6406_v33  ;;  %v6229_v0 = vadd.f32 %v7921_v13, %v10558_v38  ;;  %v6220_v3 = vpop.f32.mrb[77].mxu0 }
 0x4c5   : > { %6564 = vst.msk [vmem:[%s10568_s11 + $0x20] sm:$0xf] %vm6555_vm14, %v7264_v56  ;;  %v7265_v37 = vpack.c.bf16 %v6404_v45, %v6404_v45  ;;  %v6221_v17 = vadd.f32 %v10558_v38, %v6220_v3  ;;  %v7922_v28 = vpop.f32.mrb[78].mxu0  ;;  %v7332_v56 = vunpack.c.h.bf16 %v7363_v54  ;;  %v7366_v3 = vld [vmem:[%s8836_s27 + $0x68] sm:$0xff]  }
 0x4c6   : > { %6567 = vst.msk [vmem:[%s10568_s11 + $0x2c] sm:$0xf] %vm6555_vm14, %v7267_v2  ;;  %v6377_v25 = vadd.f32 %v7319_v55, %v6229_v0  ;;  %v6232_v19 = vadd.f32 %v7922_v28, %v10558_v38  ;;  %v6223_v62 = vpop.f32.mrb[79].mxu0 }
 0x4c7   : > { %6565 = vst.msk [vmem:[%s10568_s11 + $0x24] sm:$0xf] %vm6555_vm14, %v7265_v37  ;;  %v6375_v24 = vadd.f32 %v7315_v11, %v6221_v17  ;;  %v6224_v15 = vadd.f32 %v10558_v38, %v6223_v62  ;;  %v7365_v17 = vld [vmem:[%s8836_s27 + $0x60] sm:$0xff]   ;;  %v7343_v62 = vunpack.c.l.bf16 %v7366_v3 }
 0x4c8   : > { %v6409_v31 = vmax.f32 %v6377_v25, 0.0  ;;  %v6378_v50 = vadd.f32 %v7320_v48, %v6232_v19 }
 0x4c9   : > { %v6407_v14 = vmax.f32 %v6375_v24, 0.0  ;;  %v6376_v29 = vadd.f32 %v7316_v60, %v6224_v15 }
 0x4ca   : > { %v7270_v41 = vpack.c.bf16 %v6409_v31, %v6409_v31  ;;  %v6410_v42 = vmax.f32 %v6378_v50, 0.0  ;;  %v7339_v31 = vunpack.c.l.bf16 %v7365_v17 }
 0x4cb   : > { %v7268_v43 = vpack.c.bf16 %v6407_v14, %v6407_v14  ;;  %v6408_v12 = vmax.f32 %v6376_v29, 0.0  ;;  %v7925_v22 = vpop.f32.mrb[80].mxu0  ;;  %v7344_v29 = vunpack.c.h.bf16 %v7366_v3 }
 0x4cc   : > { %6570 = vst.msk [vmem:[%s10568_s11 + $0x38] sm:$0xf] %vm6555_vm14, %v7270_v41  ;;  %v7271_v32 = vpack.c.bf16 %v6410_v42, %v6410_v42  ;;  %v6245_v46 = vadd.f32 %v7925_v22, %v10558_v38  ;;  %v6236_v8 = vpop.f32.mrb[81].mxu0 }
 0x4cd   : > { %6568 = vst.msk [vmem:[%s10568_s11 + $0x30] sm:$0xf] %vm6555_vm14, %v7268_v43  ;;  %v7269_v27 = vpack.c.bf16 %v6408_v12, %v6408_v12  ;;  %v6237_v20 = vadd.f32 %v10558_v38, %v6236_v8  ;;  %v7926_v18 = vpop.f32.mrb[82].mxu0  ;;  %v7340_v43 = vunpack.c.h.bf16 %v7365_v17  ;;  %v7368_v8 = vld [vmem:[%s8836_s27 + $0x78] sm:$0xff]  }
 0x4ce   : > { %6571 = vst.msk [vmem:[%s10568_s11 + $0x3c] sm:$0xf] %vm6555_vm14, %v7271_v32  ;;  %v6381_v59 = vadd.f32 %v7327_v61, %v6245_v46  ;;  %v6248_v53 = vadd.f32 %v7926_v18, %v10558_v38  ;;  %v6239_v16 = vpop.f32.mrb[83].mxu0 }
 0x4cf   : > { %6569 = vst.msk [vmem:[%s10568_s11 + $0x34] sm:$0xf] %vm6555_vm14, %v7269_v27  ;;  %v6379_v7 = vadd.f32 %v7323_v35, %v6237_v20  ;;  %v6240_v26 = vadd.f32 %v10558_v38, %v6239_v16  ;;  %v7367_v20 = vld [vmem:[%s8836_s27 + $0x70] sm:$0xff]   ;;  %v7351_v16 = vunpack.c.l.bf16 %v7368_v8  ;;  %s7288_s27 = sshll.u32 %s10890_s24, 11 }
 0x4d0   : > { %v6413_v23 = vmax.f32 %v6381_v59, 0.0  ;;  %v6382_v47 = vadd.f32 %v7328_v10, %v6248_v53  ;;  %s10673_s18 = scalar_lea.hbm %s10892_s17, %s7288_s27 }
 0x4d1   : > { %v6411_v57 = vmax.f32 %v6379_v7, 0.0  ;;  %v6380_v21 = vadd.f32 %v7324_v36, %v6240_v26 }
 0x4d2   : > { %v7274_v9 = vpack.c.bf16 %v6413_v23, %v6413_v23  ;;  %v6414_v1 = vmax.f32 %v6382_v47, 0.0  ;;  %v7347_v23 = vunpack.c.l.bf16 %v7367_v20 }
 0x4d3   : > { %v7272_v58 = vpack.c.bf16 %v6411_v57, %v6411_v57  ;;  %v6412_v49 = vmax.f32 %v6380_v21, 0.0  ;;  %v7929_v34 = vpop.f32.mrb[84].mxu0  ;;  %v7352_v21 = vunpack.c.h.bf16 %v7368_v8 }
 0x4d4   : > { %6574 = vst.msk [vmem:[%s10568_s11 + $0x48] sm:$0xf] %vm6555_vm14, %v7274_v9  ;;  %v7275_v6 = vpack.c.bf16 %v6414_v1, %v6414_v1  ;;  %v6261_v30 = vadd.f32 %v7929_v34, %v10558_v38  ;;  %v6252_v63 = vpop.f32.mrb[85].mxu0 }
 0x4d5   : > { %6572 = vst.msk [vmem:[%s10568_s11 + $0x40] sm:$0xf] %vm6555_vm14, %v7272_v58  ;;  %v7273_v52 = vpack.c.bf16 %v6412_v49, %v6412_v49  ;;  %v6253_v33 = vadd.f32 %v10558_v38, %v6252_v63  ;;  %v7930_v55 = vpop.f32.mrb[86].mxu0  ;;  %v7348_v58 = vunpack.c.h.bf16 %v7367_v20 }
 0x4d6   : > { %6575 = vst.msk [vmem:[%s10568_s11 + $0x4c] sm:$0xf] %vm6555_vm14, %v7275_v6  ;;  %v6385_v45 = vadd.f32 %v7335_v4, %v6261_v30  ;;  %v6264_v13 = vadd.f32 %v7930_v55, %v10558_v38  ;;  %v6255_v11 = vpop.f32.mrb[87].mxu0 }
 0x4d7   : > { %6573 = vst.msk [vmem:[%s10568_s11 + $0x44] sm:$0xf] %vm6555_vm14, %v7273_v52  ;;  %v6383_v2 = vadd.f32 %v7331_v40, %v6253_v33  ;;  %v6256_v0 = vadd.f32 %v10558_v38, %v6255_v11 }
 0x4d8   : > { %v6417_v48 = vmax.f32 %v6385_v45, 0.0  ;;  %v6386_v37 = vadd.f32 %v7336_v39, %v6264_v13 }
 0x4d9   : > { %v6415_v28 = vmax.f32 %v6383_v2, 0.0  ;;  %v6384_v60 = vadd.f32 %v7332_v56, %v6256_v0 }
 0x4da   : > { %v7278_v25 = vpack.c.bf16 %v6417_v48, %v6417_v48  ;;  %v6418_v19 = vmax.f32 %v6386_v37, 0.0 }
 0x4db   : > { %v7276_v24 = vpack.c.bf16 %v6415_v28, %v6415_v28  ;;  %v6416_v15 = vmax.f32 %v6384_v60, 0.0  ;;  %v7933_v51 = vpop.f32.mrb[88].mxu0 }
 0x4dc   : > { %6578 = vst.msk [vmem:[%s10568_s11 + $0x58] sm:$0xf] %vm6555_vm14, %v7278_v25  ;;  %v7279_v50 = vpack.c.bf16 %v6418_v19, %v6418_v19  ;;  %v6277_v5 = vadd.f32 %v7933_v51, %v10558_v38  ;;  %v6268_v14 = vpop.f32.mrb[89].mxu0 }
 0x4dd   : > { %6576 = vst.msk [vmem:[%s10568_s11 + $0x50] sm:$0xf] %vm6555_vm14, %v7276_v24  ;;  %v7277_v41 = vpack.c.bf16 %v6416_v15, %v6416_v15  ;;  %v6269_v42 = vadd.f32 %v10558_v38, %v6268_v14  ;;  %v7934_v61 = vpop.f32.mrb[90].mxu0 }
 0x4de   : > { %6579 = vst.msk [vmem:[%s10568_s11 + $0x5c] sm:$0xf] %vm6555_vm14, %v7279_v50  ;;  %v6389_v12 = vadd.f32 %v7343_v62, %v6277_v5  ;;  %v6280_v22 = vadd.f32 %v7934_v61, %v10558_v38  ;;  %v6271_v35 = vpop.f32.mrb[91].mxu0 }
 0x4df   : > { %6577 = vst.msk [vmem:[%s10568_s11 + $0x54] sm:$0xf] %vm6555_vm14, %v7277_v41  ;;  %v6387_v32 = vadd.f32 %v7339_v31, %v6269_v42  ;;  %v6272_v46 = vadd.f32 %v10558_v38, %v6271_v35 }
 0x4e0   : > { %v6421_v10 = vmax.f32 %v6389_v12, 0.0  ;;  %v6390_v27 = vadd.f32 %v7344_v29, %v6280_v22 }
 0x4e1   : > { %v6419_v18 = vmax.f32 %v6387_v32, 0.0  ;;  %v6388_v36 = vadd.f32 %v7340_v43, %v6272_v46 }
 0x4e2   : > { %v7282_v59 = vpack.c.bf16 %v6421_v10, %v6421_v10  ;;  %v6422_v53 = vmax.f32 %v6390_v27, 0.0 }
 0x4e3   : > { %v7280_v7 = vpack.c.bf16 %v6419_v18, %v6419_v18  ;;  %v6420_v26 = vmax.f32 %v6388_v36, 0.0  ;;  %v7937_v44 = vpop.f32.mrb[92].mxu0 }
 0x4e4   : > { %6582 = vst.msk [vmem:[%s10568_s11 + $0x68] sm:$0xf] %vm6555_vm14, %v7282_v59  ;;  %v7283_v47 = vpack.c.bf16 %v6422_v53, %v6422_v53  ;;  %v6293_v54 = vadd.f32 %v7937_v44, %v10558_v38  ;;  %v6284_v57 = vpop.f32.mrb[93].mxu0 }
 0x4e5   : > { %6580 = vst.msk [vmem:[%s10568_s11 + $0x60] sm:$0xf] %vm6555_vm14, %v7280_v7  ;;  %v7281_v9 = vpack.c.bf16 %v6420_v26, %v6420_v26  ;;  %v6285_v1 = vadd.f32 %v10558_v38, %v6284_v57  ;;  %v7938_v4 = vpop.f32.mrb[94].mxu0 }
 0x4e6   : > { %6583 = vst.msk [vmem:[%s10568_s11 + $0x6c] sm:$0xf] %vm6555_vm14, %v7283_v47  ;;  %v6393_v49 = vadd.f32 %v7351_v16, %v6293_v54  ;;  %v6296_v34 = vadd.f32 %v7938_v4, %v10558_v38  ;;  %v6287_v40 = vpop.f32.mrb[95].mxu0 }
 0x4e7   : > { %6581 = vst.msk [vmem:[%s10568_s11 + $0x64] sm:$0xf] %vm6555_vm14, %v7281_v9  ;;  %v6391_v6 = vadd.f32 %v7347_v23, %v6285_v1  ;;  %v6288_v30 = vadd.f32 %v10558_v38, %v6287_v40 }
 0x4e8   : > { %v6425_v63 = vmax.f32 %v6393_v49, 0.0  ;;  %v6394_v39 = vadd.f32 %v7352_v21, %v6296_v34 }
 0x4e9   : > { %v6423_v52 = vmax.f32 %v6391_v6, 0.0  ;;  %v6392_v33 = vadd.f32 %v7348_v58, %v6288_v30 }
 0x4ea   : > { %v7286_v55 = vpack.c.bf16 %v6425_v63, %v6425_v63  ;;  %v6426_v56 = vmax.f32 %v6394_v39, 0.0 }
 0x4eb   : > { %v7284_v45 = vpack.c.bf16 %v6423_v52, %v6423_v52  ;;  %v6424_v13 = vmax.f32 %v6392_v33, 0.0 }
 0x4ec   : > { %6586 = vst.msk [vmem:[%s10568_s11 + $0x78] sm:$0xf] %vm6555_vm14, %v7286_v55  ;;  %v7287_v11 = vpack.c.bf16 %v6426_v56, %v6426_v56 }
 0x4ed   : > { %6584 = vst.msk [vmem:[%s10568_s11 + $0x70] sm:$0xf] %vm6555_vm14, %v7284_v45  ;;  %v7285_v38 = vpack.c.bf16 %v6424_v13, %v6424_v13 }
 0x4ee   : > { %6587 = vst.msk [vmem:[%s10568_s11 + $0x7c] sm:$0xf] %vm6555_vm14, %v7287_v11 }
 0x4ef   : > { %6585 = vst.msk [vmem:[%s10568_s11 + $0x74] sm:$0xf] %vm6555_vm14, %v7285_v38 }
 0x4f0   : > { %8491 = shalt.err (!%p8488_p13)
}
 0x4f1   : > { %s8492_s30 = scalar_lea.hbm %s10673_s18, 2048  ;;  %s8496_s9 = scalar_lea.hbm %s10892_s17, 4096 }
 0x4f2   : > { %p8493_p7 = scmp.ne.s32.totalorder %s10673_s18, %s8492_s30  ;;  %p8497_p5 = scmp.lt.u32.totalorder %s10673_s18, %s10892_s17 }
 0x4f3   : > { %p8498_p2 = scmp.lt.u32.totalorder %s8496_s9, %s8492_s30  ;;  %p8500_p0 = scmp.lt.u32.totalorder %s8492_s30, %s10673_s18 }
 0x4f4   : > { %p8494_p11 = pnand %p8493_p7, %p10893_p6 }
 0x4f5   : > { %p8499_p1 = por %p8498_p2, %p8497_p5 }
 0x4f6   : > { %p8495_p3 = pneg %p8494_p11 }
 0x4f7   : > { %p8501_p8 = por %p8500_p0, %p8499_p1 }
 0x4f9   : > { %p8502_p9 = pnand %p8501_p8, %p8495_p3 }
 0x4fb   : > { %8505 = shalt.err (!%p8502_p9)
}
 0x4fc   : > { %s8572_s1 = smov 64   ;;  %s8573_s11 = smov 4  }
 0x4fd   : > { %8214 = dma.vmem_to_hbm [thread:$0]  (%p10893_p6), %s10675_s23, 2048, %s10673_s18, %s6589_s15, %s8572_s1, %s8572_s1, %s8573_s11  }
 0x4fe PF: > { %s10894_s24 = sld [smem:[#allocation13_spill]]  ;;  %s10895_s27 = sld [smem:[#allocation21_spill]] }
 0x4ff   : > { %s10896_s12 = sld [smem:[#allocation17_spill]] }
 0x504   : > { %s6620_s22 = sand.u32 1, %s10894_s24   ;;  %p10897_p12 = scmp.ne.s32.totalorder %s10895_s27, 0 }
 0x505   : > { %p10898_p4 = scmp.ge.s32.totalorder %s10896_s12, 2  ;;  %s6621_s21 = scalar_lea.sflag [#allocation5], %s6620_s22 }
 0x507   : > { %p8227_p10 = pnand %p10898_p4, %p10897_p12 }
 0x509   : > { %8539 = dma.done.wait (!%p8227_p10), %s6621_s21, 2048  }
 0x50a   : > { %8541 = vsyncadd (!%p8227_p10), %s6621_s21, 4294965248  ;;  %s28_s14 = sadd.s32 1, %s10896_s12   ;;  %s10899_s28 = sld [smem:[#allocation14_spill]] }
 0x50b   : > { %p25_p13 = scmp.ge.s32.totalorder %s28_s14, 4   ;;  %s10900_s11 = sld [smem:[#allocation20_spill]] }
 0x50c   : > { %s10901_s12 = sld [smem:[#allocation16_spill]]  ;;  %s10902_s13 = sld [smem:[#allocation18_spill]] }
 0x50d   : > { %s10903_s30 = smov %s8548_s10  ;;  %27 = sbr.rel (!%p25_p13) target bundleno = 11 (0xb), region = 136 }
 0x510   : > { %s10904_s10 = smov %s10899_s28 }
 0x514   :  { %6626 = vsyncpa [#allocation4], 1 }
 0x515   :  { %6628 = vsyncpa [#allocation4 + $0x1], 1 }
 0x516   :  { %6629 = vsyncpa [#allocation7], 1 }
 0x517   :  { %6631 = vsyncpa [#allocation7 + $0x1], 1 }
 0x518   :  { %6632 = vsyncpa [#allocation5], 1 }
 0x519   :  { %6634 = vsyncpa [#allocation5 + $0x1], 1 }

</bundles_post_ra>
